<compile_context>
chip_gen: v5e
topology: v5e:2x2
jax: 0.10.0
libtpu: 0.0.40
codegen_flags: <defaults>
</compile_context>

<pallas_src>
import functools

import jax
import jax.numpy as jnp
from jax import lax
from jax.experimental import pallas as pl
from jax.experimental.pallas import tpu as pltpu

CH_ALIGN = 16        # channel padding = bf16 sublane-pack granularity
LANE = 128           # lane tile
ALPHA0 = 0.25        # PyTorch PReLU default init


def _ceil_to(x, m):
    return ((x + m - 1) // m) * m


# ----------------------------------------------------------------------------
# Pallas kernels: transposed GEMM + bias + PReLU (+ optional fused residual)
#   a: (O_rows, K) bf16   b: (K, tm) bf16   bias: (O_rows, 1) f32
#   alpha: (1,) f32 in SMEM    out: (O_rows, tm) bf16  (M lane-dense)
# ----------------------------------------------------------------------------
def _gemm_kernel(a_ref, b_ref, bias_ref, alpha_ref, o_ref):
    y = jnp.dot(a_ref[...], b_ref[...], preferred_element_type=jnp.float32)
    y = y + bias_ref[...]
    alpha = alpha_ref[0]
    y = jnp.where(y > 0.0, y, alpha * y)
    o_ref[...] = y.astype(o_ref.dtype)


def _gemm_res_kernel(a_ref, b_ref, bias_ref, res_ref, alpha_ref, o_ref, *, sub):
    y = jnp.dot(a_ref[...], b_ref[...], preferred_element_type=jnp.float32)
    y = y + bias_ref[...]
    alpha = alpha_ref[0]
    y = jnp.where(y > 0.0, y, alpha * y)
    r = res_ref[...].astype(jnp.float32)
    y = y - r if sub else y + r
    o_ref[...] = y.astype(o_ref.dtype)


def gemm_bias_prelu(wmat, col, bias, alpha, residual=None, *, res_sub=False):
    """out = PReLU(wmat @ col + bias) [+/- residual], stored as bf16.

    wmat: (O_rows, K) bf16, col: (K, M) bf16, bias: (O_rows, 1) f32,
    alpha: (1,) f32, residual: (O_rows, M) bf16 or None.  Returns (O_rows, M) bf16.
    """
    O_rows, K = wmat.shape
    K2, M = col.shape
    assert K == K2
    if residual is not None:
        assert residual.shape == (O_rows, M)

    Mp = _ceil_to(M, LANE)
    if Mp > LANE:
        # keep >= 2 grid steps so both v7x TensorCores get work; cap tile at
        # 1024 so single-TC v5e/v6e amortize per-step overhead (VMEM stays tiny)
        tm = max(LANE, min(1024, (Mp // 2) // LANE * LANE))
        Mp = _ceil_to(Mp, tm)
    else:
        tm = Mp
    if Mp != M:
        col = jnp.pad(col, ((0, 0), (0, Mp - M)))
        if residual is not None:
            residual = jnp.pad(residual, ((0, 0), (0, Mp - M)))

    in_specs = [
        pl.BlockSpec((O_rows, K), lambda i: (0, 0)),    # weights resident
        pl.BlockSpec((K, tm), lambda i: (0, i)),
        pl.BlockSpec((O_rows, 1), lambda i: (0, 0)),
    ]
    args = [wmat, col, bias]
    if residual is not None:
        in_specs.append(pl.BlockSpec((O_rows, tm), lambda i: (0, i)))
        args.append(residual)
        kernel = functools.partial(_gemm_res_kernel, sub=res_sub)
    else:
        kernel = _gemm_kernel
    in_specs.append(pl.BlockSpec(memory_space=pltpu.MemorySpace.SMEM))
    args.append(alpha)

    out = pl.pallas_call(
        kernel,
        out_shape=jax.ShapeDtypeStruct((O_rows, Mp), jnp.bfloat16),
        grid_spec=pltpu.PrefetchScalarGridSpec(
            num_scalar_prefetch=0,
            grid=(Mp // tm,),
            in_specs=in_specs,
            out_specs=pl.BlockSpec((O_rows, tm), lambda i: (0, i)),
        ),
        compiler_params=pltpu.CompilerParams(
            dimension_semantics=("parallel",),
            vmem_limit_bytes=32 * 1024 * 1024,
        ),
    )(*args)
    if Mp != M:
        out = out[:, :M]
    return out


# ----------------------------------------------------------------------------
# Conv / fused phase-decomposed ConvTranspose built on the transposed GEMM.
# Activations are (C_pad, N, H, W) bf16 with padded channel rows == 0.
# ----------------------------------------------------------------------------
def _im2col(x, kh, kw, stride, padding):
    C_pad, N, H, W = x.shape
    Ho = (H + 2 * padding - kh) // stride + 1
    Wo = (W + 2 * padding - kw) // stride + 1
    if kh == 1 and kw == 1 and stride == 1 and padding == 0:
        return x.reshape(C_pad, N * H * W), Ho, Wo
    xp = jnp.pad(x, ((0, 0), (0, 0), (padding, padding), (padding, padding)))
    patches = []
    for i in range(kh):
        for j in range(kw):
            patches.append(
                xp[:, :, i:i + stride * (Ho - 1) + 1:stride,
                         j:j + stride * (Wo - 1) + 1:stride])
    col = jnp.stack(patches, axis=1)               # (C_pad, kh*kw, N, Ho, Wo)
    return col.reshape(C_pad * kh * kw, N * Ho * Wo), Ho, Wo


def conv2d_gemm(x, layer, *, kh, kw, stride, padding,
                residual=None, res_sub=False):
    C_pad, N, H, W = x.shape
    col, Ho, Wo = _im2col(x, kh, kw, stride, padding)
    res2d = None
    if residual is not None:
        res2d = residual.reshape(residual.shape[0], -1)
    out = gemm_bias_prelu(layer["wmat"], col, layer["bias"], layer["alpha"],
                          residual=res2d, res_sub=res_sub)
    return out.reshape(layer["wmat"].shape[0], N, Ho, Wo)


def deconv_s2_fused(x, layer, *, sub_k, sub_pad,
                    residual_phases=None, return_phases=False):
    """Stride-2 ConvTranspose2d + PReLU: the 4 phase sub-convs run as ONE fused
    GEMM (phase weights concatenated along the output-channel axis at init).
    `residual_phases` is added in the epilogue in the phase-separated layout
    (shape (4*O_pad, N, H, W)), i.e. residual[:, :, fh::2, fw::2] per phase."""
    C_pad, N, H, W = x.shape
    y4 = conv2d_gemm(x, layer, kh=sub_k, kw=sub_k, stride=1, padding=sub_pad,
                     residual=residual_phases, res_sub=False)
    O_pad = y4.shape[0] // 4
    # out[o, n, 2a+fh, 2b+fw] = y4[(2*fh+fw)*O_pad + o, n, a, b]
    out = (y4.reshape(2, 2, O_pad, N, H, W)
              .transpose(2, 3, 4, 0, 5, 1)
              .reshape(O_pad, N, 2 * H, 2 * W))
    if return_phases:
        return out, y4
    return out


# ----------------------------------------------------------------------------
# DBPN blocks (residual adds fused into the GEMM epilogue where shapes match)
# ----------------------------------------------------------------------------
def down_block(x, p):
    l0 = conv2d_gemm(x, p["c1"], kh=6, kw=6, stride=2, padding=2)
    h0 = deconv_s2_fused(l0, p["c2"], sub_k=3, sub_pad=1)
    # (h0 - x) fuses into c3's im2col gather; (l1 + l0) fused in c3's epilogue.
    return conv2d_gemm(h0 - x, p["c3"], kh=6, kw=6, stride=2, padding=2,
                       residual=l0, res_sub=False)


def up_block(x, p):
    # keep c1's phase-separated output so (h1 + h0) fuses into c3's epilogue
    h0, h0_ph = deconv_s2_fused(x, p["c1"], sub_k=3, sub_pad=1,
                                return_phases=True)
    # (l0 - x) fused in c2's epilogue as a negative residual.
    d = conv2d_gemm(h0, p["c2"], kh=6, kw=6, stride=2, padding=2,
                    residual=x, res_sub=True)
    return deconv_s2_fused(d, p["c3"], sub_k=3, sub_pad=1,
                           residual_phases=h0_ph)


# ----------------------------------------------------------------------------
# Parameter init + weight preprocessing (flip / transpose / pad / phase-fuse /
# bf16 at init).  Raw (f32, bf16-rounded) copies are kept for the reference.
# ----------------------------------------------------------------------------
def _init_conv_raw(key, out_c, in_c, k):
    kw_, kb_ = jax.random.split(key)
    fan_in = in_c * k * k
    w = jax.random.normal(kw_, (out_c, in_c, k, k), jnp.float32) / jnp.sqrt(fan_in)
    b = 0.01 * jax.random.normal(kb_, (out_c,), jnp.float32)
    return w.astype(jnp.bfloat16).astype(jnp.float32), b


def _init_deconv_raw(key, in_c, out_c, k):
    kw_, kb_ = jax.random.split(key)
    fan_in = in_c * k * k
    w = jax.random.normal(kw_, (in_c, out_c, k, k), jnp.float32) / jnp.sqrt(fan_in)
    b = 0.01 * jax.random.normal(kb_, (out_c,), jnp.float32)
    return w.astype(jnp.bfloat16).astype(jnp.float32), b


def _prep_conv(w, b, in_pad, out_pad, alpha=ALPHA0):
    O, I, kh, kw = w.shape
    w_p = jnp.zeros((out_pad, in_pad, kh, kw), jnp.float32).at[:O, :I].set(w)
    return {
        "wmat": w_p.reshape(out_pad, in_pad * kh * kw).astype(jnp.bfloat16),
        "bias": jnp.zeros((out_pad, 1), jnp.float32).at[:O, 0].set(b),
        "alpha": jnp.full((1,), alpha, jnp.float32),
    }


def _prep_deconv_s1(w_t, b, in_pad, out_pad, alpha=ALPHA0):
    # stride-1 ConvTranspose2d == conv with flipped, channel-swapped kernel
    wc = jnp.flip(w_t, axis=(2, 3)).transpose(1, 0, 2, 3)
    return _prep_conv(wc, b, in_pad, out_pad, alpha)


def _prep_deconv_s2_fused(w_t, b, in_pad, out_pad, k, p, alpha=ALPHA0):
    # Phase decomposition of stride-2 ConvTranspose2d (p % 2 == 0, sub-kernel
    # size 2*(p//2)+1 for every phase; holds for k=6,p=2 and k=2,p=0).  The 4
    # phase weight matrices are stacked along the output-channel axis so the
    # whole deconv is ONE GEMM; phase order is (fh, fw) row-major.
    s = 2
    assert p % s == 0
    P = p // s
    Cin, Cout = w_t.shape[0], w_t.shape[1]
    w_t_p = jnp.zeros((in_pad, out_pad, k, k), jnp.float32).at[:Cin, :Cout].set(w_t)
    mats = []
    for fh in range(s):
        for fw in range(s):
            sub = w_t_p[:, :, fh::s, fw::s]                 # taps fh, fh+2, ...
            kf = sub.shape[2]
            assert kf == 2 * P + 1 and sub.shape[3] == 2 * P + 1
            g = jnp.flip(sub, axis=(2, 3)).transpose(1, 0, 2, 3)  # OIHW sub-kernel
            mats.append(g.reshape(out_pad, in_pad * kf * kf))
    wmat = jnp.concatenate(mats, axis=0).astype(jnp.bfloat16)   # (4*out_pad, K)
    bias1 = jnp.zeros((out_pad, 1), jnp.float32).at[:Cout, 0].set(b)
    return {
        "wmat": wmat,
        "bias": jnp.tile(bias1, (s * s, 1)),
        "alpha": jnp.full((1,), alpha, jnp.float32),
    }


def init_net_params(key, channels, filters, features):
    cp = _ceil_to(channels, CH_ALIGN)
    fp = _ceil_to(filters, CH_ALIGN)
    ep = _ceil_to(features, CH_ALIGN)
    keys = jax.random.split(key, 16)

    def conv(k, in_c, out_c, ks, ip, op):
        w, b = _init_conv_raw(k, out_c, in_c, ks)
        return {"w": w, "b": b}, _prep_conv(w, b, ip, op)

    def deconv2(k, in_c, out_c, ks, p, ip, op):
        w, b = _init_deconv_raw(k, in_c, out_c, ks)
        return {"w": w, "b": b}, _prep_deconv_s2_fused(w, b, ip, op, ks, p)

    def deconv1(k, in_c, out_c, ks, ip, op):
        w, b = _init_deconv_raw(k, in_c, out_c, ks)
        return {"w": w, "b": b}, _prep_deconv_s1(w, b, ip, op)

    def down(k3):
        r1, p1 = conv(k3[0], filters, filters, 6, fp, fp)
        r2, p2 = deconv2(k3[1], filters, filters, 6, 2, fp, fp)
        r3, p3 = conv(k3[2], filters, filters, 6, fp, fp)
        return {"c1": r1, "c2": r2, "c3": r3}, {"c1": p1, "c2": p2, "c3": p3}

    def up(k3):
        r1, p1 = deconv2(k3[0], filters, filters, 6, 2, fp, fp)
        r2, p2 = conv(k3[1], filters, filters, 6, fp, fp)
        r3, p3 = deconv2(k3[2], filters, filters, 6, 2, fp, fp)
        return {"c1": r1, "c2": r2, "c3": r3}, {"c1": p1, "c2": p2, "c3": p3}

    raw, pal = {}, {}
    raw["lay1"], pal["lay1"] = conv(keys[0], channels, features, 3, cp, ep)
    raw["lay2"], pal["lay2"] = conv(keys[1], features, filters, 1, ep, fp)
    raw["down1"], pal["down1"] = down(keys[2:5])
    raw["up1"], pal["up1"] = up(keys[5:8])
    raw["down2"], pal["down2"] = down(keys[8:11])
    raw["up2"], pal["up2"] = up(keys[11:14])
    raw["out1"], pal["out1"] = deconv1(keys[14], filters, features, 1, fp, ep)
    raw["out2"], pal["out2"] = deconv2(keys[15], features, channels, 2, 0, ep, cp)
    return raw, pal


# ----------------------------------------------------------------------------
# Net forward (Pallas path)
# ----------------------------------------------------------------------------
@jax.jit
def net_forward(params, x):
    # x: (N, C, H, W) NCHW f32
    N, C, H, W = x.shape
    cp = _ceil_to(C, CH_ALIGN)
    # internal layout: (C_pad, N, H, W) bf16, padded channel rows stay exactly 0
    t = jnp.pad(x.transpose(1, 0, 2, 3), ((0, cp - C), (0, 0), (0, 0), (0, 0)))
    t = t.astype(jnp.bfloat16)
    t = conv2d_gemm(t, params["lay1"], kh=3, kw=3, stride=1, padding=1)
    t = conv2d_gemm(t, params["lay2"], kh=1, kw=1, stride=1, padding=0)
    t = down_block(t, params["down1"])
    t = up_block(t, params["up1"])
    t = down_block(t, params["down2"])
    t = up_block(t, params["up2"])
    t = conv2d_gemm(t, params["out1"], kh=1, kw=1, stride=1, padding=0)
    t = deconv_s2_fused(t, params["out2"], sub_k=1, sub_pad=0)
    return t[:C].transpose(1, 0, 2, 3).astype(jnp.float32)       # back to NCHW


# ----------------------------------------------------------------------------
# Pure-JAX f32 reference (lax.conv) for tolerance validation
# ----------------------------------------------------------------------------
def _prelu(y, alpha):
    return jnp.where(y > 0.0, y, alpha * y)


def _ref_conv(x, p, stride, padding):
    y = lax.conv_general_dilated(
        x, p["w"], (stride, stride), [(padding, padding)] * 2,
        dimension_numbers=("NCHW", "OIHW", "NCHW"))
    return _prelu(y + p["b"][None, :, None, None], ALPHA0)


def _ref_deconv(x, p, stride, padding):
    k = p["w"].shape[2]
    w = jnp.flip(p["w"], axis=(2, 3)).transpose(1, 0, 2, 3)      # (out,in,k,k)
    y = lax.conv_general_dilated(
        x, w, (1, 1), [(k - 1 - padding, k - 1 - padding)] * 2,
        lhs_dilation=(stride, stride),
        dimension_numbers=("NCHW", "OIHW", "NCHW"))
    return _prelu(y + p["b"][None, :, None, None], ALPHA0)


def _ref_down(x, p):
    l0 = _ref_conv(x, p["c1"], 2, 2)
    h0 = _ref_deconv(l0, p["c2"], 2, 2)
    return _ref_conv(h0 - x, p["c3"], 2, 2) + l0


def _ref_up(x, p):
    h0 = _ref_deconv(x, p["c1"], 2, 2)
    l0 = _ref_conv(h0, p["c2"], 2, 2)
    return _ref_deconv(l0 - x, p["c3"], 2, 2) + h0


@jax.jit
def net_forward_ref(raw, x):
    t = _ref_conv(x, raw["lay1"], 1, 1)
    t = _ref_conv(t, raw["lay2"], 1, 0)
    t = _ref_down(t, raw["down1"])
    t = _ref_up(t, raw["up1"])
    t = _ref_down(t, raw["down2"])
    t = _ref_up(t, raw["up2"])
    t = _ref_deconv(t, raw["out1"], 1, 0)
    t = _ref_deconv(t, raw["out2"], 2, 0)
    return t


if __name__ == "__main__":
    channels, filters, features, scale_fact = 4, 16, 8, 2  # scale_fact unused in fwd
    B, H, W = 2, 16, 16

    key = jax.random.PRNGKey(0)
    k_params, k_x = jax.random.split(key)
    raw_params, pal_params = init_net_params(k_params, channels, filters, features)
    x = jax.random.normal(k_x, (B, channels, H, W), jnp.float32)  # NCHW

    y = jax.block_until_ready(net_forward(pal_params, x))
    y_ref = jax.block_until_ready(net_forward_ref(raw_params, x))

    assert y.shape == (B, channels, 2 * H, 2 * W), y.shape
    assert bool(jnp.all(jnp.isfinite(y)))
    # explicit tolerance vs f32 reference (kernel uses bf16 activations/weights)
    err = float(jnp.max(jnp.abs(y - y_ref)))
    scale = float(jnp.max(jnp.abs(y_ref)))
    assert err <= 0.1 * scale + 0.05, (err, scale)
    print("KERNEL_OK")
</pallas_src>

<mosaic_0001>
module attributes {stable_mosaic.version = 11 : i64} {
  func.func @_gemm_kernel(%arg0: i32, %arg1: memref<16x144xbf16, #tpu.memory_space<vmem>>, %arg2: memref<144x256xbf16, #tpu.memory_space<vmem>>, %arg3: memref<16x1xf32, #tpu.memory_space<vmem>>, %arg4: memref<1xf32, #tpu.memory_space<smem>>, %arg5: memref<16x256xbf16, #tpu.memory_space<vmem>>) attributes {dimension_semantics = [#tpu.dimension_semantics<parallel>], iteration_bounds = array<i64: 2>, scalar_prefetch = 0 : i64, scratch_operands = 0 : i64, tpu.core_type = #tpu.core_type<tc>, window_params = [{pipeline_mode = #tpu.pipeline_mode<synchronous>, transform_indices = @transform_0, window_bounds = array<i64: 16, 144>}, {transform_indices = @transform_1, window_bounds = array<i64: 144, 256>}, {pipeline_mode = #tpu.pipeline_mode<synchronous>, transform_indices = @transform_2, window_bounds = array<i64: 16, 1>}, {transform_indices = @transform_3, window_bounds = array<i64: 1>}, {transform_indices = @transform_4, window_bounds = array<i64: 16, 256>}]} {
    %c0 = arith.constant 0 : index
    %c0_0 = arith.constant 0 : index
    %0 = vector.load %arg1[%c0, %c0_0] : memref<16x144xbf16, #tpu.memory_space<vmem>>, vector<16x144xbf16>
    %c0_1 = arith.constant 0 : index
    %c0_2 = arith.constant 0 : index
    %1 = vector.load %arg2[%c0_1, %c0_2] : memref<144x256xbf16, #tpu.memory_space<vmem>>, vector<144x256xbf16>
    %cst = arith.constant dense<0.000000e+00> : vector<16x256xf32>
    %2 = tpu.matmul %0, %1, %cst {dimension_numbers = #tpu.dot_dimension_numbers<[1], [0], [0], [1], [0, 0, 1, 1], [], []>} : vector<16x144xbf16>, vector<144x256xbf16>, vector<16x256xf32> -> vector<16x256xf32>
    %c0_3 = arith.constant 0 : index
    %c0_4 = arith.constant 0 : index
    %3 = vector.load %arg3[%c0_3, %c0_4] : memref<16x1xf32, #tpu.memory_space<vmem>>, vector<16x1xf32>
    %4 = vector.broadcast %3 : vector<16x1xf32> to vector<16x256xf32>
    %5 = arith.addf %2, %4 : vector<16x256xf32>
    %c0_5 = arith.constant 0 : index
    %6 = memref.load %arg4[%c0_5] : memref<1xf32, #tpu.memory_space<smem>>
    %cst_6 = arith.constant 0.000000e+00 : f32
    %7 = vector.broadcast %cst_6 : f32 to vector<16x256xf32>
    %8 = arith.cmpf ogt, %5, %7 : vector<16x256xf32>
    %9 = vector.broadcast %6 : f32 to vector<16x256xf32>
    %10 = arith.mulf %9, %5 : vector<16x256xf32>
    %11 = arith.select %8, %5, %10 : vector<16x256xi1>, vector<16x256xf32>
    %12 = arith.truncf %11 : vector<16x256xf32> to vector<16x256xbf16>
    %c0_7 = arith.constant 0 : index
    %c0_8 = arith.constant 0 : index
    %13 = vector.load %arg5[%c0_7, %c0_8] : memref<16x256xbf16, #tpu.memory_space<vmem>>, vector<16x256xbf16>
    tpu.vector_store %arg5[%c0_7, %c0_8], %12 {strides = array<i32>} : memref<16x256xbf16, #tpu.memory_space<vmem>>, vector<16x256xbf16>,
    return
  }
  func.func @transform_0(%arg0: i32) -> (i32, i32) {
    %c0_i32 = arith.constant 0 : i32
    %c0_i32_0 = arith.constant 0 : i32
    %c0_i32_1 = arith.constant 0 : i32
    return %c0_i32, %c0_i32_0 : i32, i32
  }
  func.func @transform_1(%arg0: i32) -> (i32, i32) {
    %c0_i32 = arith.constant 0 : i32
    %c0_i32_0 = arith.constant 0 : i32
    return %c0_i32, %arg0 : i32, i32
  }
  func.func @transform_2(%arg0: i32) -> (i32, i32) {
    %c0_i32 = arith.constant 0 : i32
    %c0_i32_0 = arith.constant 0 : i32
    %c0_i32_1 = arith.constant 0 : i32
    return %c0_i32, %c0_i32_0 : i32, i32
  }
  func.func @transform_3(%arg0: i32) -> i32 {
    %c0_i32 = arith.constant 0 : i32
    %c0_i32_0 = arith.constant 0 : i32
    return %c0_i32 : i32
  }
  func.func @transform_4(%arg0: i32) -> (i32, i32) {
    %c0_i32 = arith.constant 0 : i32
    %c0_i32_0 = arith.constant 0 : i32
    return %c0_i32, %arg0 : i32, i32
  }
}

module attributes {stable_mosaic.version = 11 : i64} {
  func.func @_gemm_kernel(%arg0: i32, %arg1: memref<16x16xbf16, #tpu.memory_space<vmem>>, %arg2: memref<16x256xbf16, #tpu.memory_space<vmem>>, %arg3: memref<16x1xf32, #tpu.memory_space<vmem>>, %arg4: memref<1xf32, #tpu.memory_space<smem>>, %arg5: memref<16x256xbf16, #tpu.memory_space<vmem>>) attributes {dimension_semantics = [#tpu.dimension_semantics<parallel>], iteration_bounds = array<i64: 2>, scalar_prefetch = 0 : i64, scratch_operands = 0 : i64, tpu.core_type = #tpu.core_type<tc>, window_params = [{pipeline_mode = #tpu.pipeline_mode<synchronous>, transform_indices = @transform_0, window_bounds = array<i64: 16, 16>}, {transform_indices = @transform_1, window_bounds = array<i64: 16, 256>}, {pipeline_mode = #tpu.pipeline_mode<synchronous>, transform_indices = @transform_2, window_bounds = array<i64: 16, 1>}, {transform_indices = @transform_3, window_bounds = array<i64: 1>}, {transform_indices = @transform_4, window_bounds = array<i64: 16, 256>}]} {
    %c0 = arith.constant 0 : index
    %c0_0 = arith.constant 0 : index
    %0 = vector.load %arg1[%c0, %c0_0] : memref<16x16xbf16, #tpu.memory_space<vmem>>, vector<16x16xbf16>
    %c0_1 = arith.constant 0 : index
    %c0_2 = arith.constant 0 : index
    %1 = vector.load %arg2[%c0_1, %c0_2] : memref<16x256xbf16, #tpu.memory_space<vmem>>, vector<16x256xbf16>
    %cst = arith.constant dense<0.000000e+00> : vector<16x256xf32>
    %2 = tpu.matmul %0, %1, %cst {dimension_numbers = #tpu.dot_dimension_numbers<[1], [0], [0], [1], [0, 0, 1, 1], [], []>} : vector<16x16xbf16>, vector<16x256xbf16>, vector<16x256xf32> -> vector<16x256xf32>
    %c0_3 = arith.constant 0 : index
    %c0_4 = arith.constant 0 : index
    %3 = vector.load %arg3[%c0_3, %c0_4] : memref<16x1xf32, #tpu.memory_space<vmem>>, vector<16x1xf32>
    %4 = vector.broadcast %3 : vector<16x1xf32> to vector<16x256xf32>
    %5 = arith.addf %2, %4 : vector<16x256xf32>
    %c0_5 = arith.constant 0 : index
    %6 = memref.load %arg4[%c0_5] : memref<1xf32, #tpu.memory_space<smem>>
    %cst_6 = arith.constant 0.000000e+00 : f32
    %7 = vector.broadcast %cst_6 : f32 to vector<16x256xf32>
    %8 = arith.cmpf ogt, %5, %7 : vector<16x256xf32>
    %9 = vector.broadcast %6 : f32 to vector<16x256xf32>
    %10 = arith.mulf %9, %5 : vector<16x256xf32>
    %11 = arith.select %8, %5, %10 : vector<16x256xi1>, vector<16x256xf32>
    %12 = arith.truncf %11 : vector<16x256xf32> to vector<16x256xbf16>
    %c0_7 = arith.constant 0 : index
    %c0_8 = arith.constant 0 : index
    %13 = vector.load %arg5[%c0_7, %c0_8] : memref<16x256xbf16, #tpu.memory_space<vmem>>, vector<16x256xbf16>
    tpu.vector_store %arg5[%c0_7, %c0_8], %12 {strides = array<i32>} : memref<16x256xbf16, #tpu.memory_space<vmem>>, vector<16x256xbf16>,
    return
  }
  func.func @transform_0(%arg0: i32) -> (i32, i32) {
    %c0_i32 = arith.constant 0 : i32
    %c0_i32_0 = arith.constant 0 : i32
    %c0_i32_1 = arith.constant 0 : i32
    return %c0_i32, %c0_i32_0 : i32, i32
  }
  func.func @transform_1(%arg0: i32) -> (i32, i32) {
    %c0_i32 = arith.constant 0 : i32
    %c0_i32_0 = arith.constant 0 : i32
    return %c0_i32, %arg0 : i32, i32
  }
  func.func @transform_2(%arg0: i32) -> (i32, i32) {
    %c0_i32 = arith.constant 0 : i32
    %c0_i32_0 = arith.constant 0 : i32
    %c0_i32_1 = arith.constant 0 : i32
    return %c0_i32, %c0_i32_0 : i32, i32
  }
  func.func @transform_3(%arg0: i32) -> i32 {
    %c0_i32 = arith.constant 0 : i32
    %c0_i32_0 = arith.constant 0 : i32
    return %c0_i32 : i32
  }
  func.func @transform_4(%arg0: i32) -> (i32, i32) {
    %c0_i32 = arith.constant 0 : i32
    %c0_i32_0 = arith.constant 0 : i32
    return %c0_i32, %arg0 : i32, i32
  }
}

module attributes {stable_mosaic.version = 11 : i64} {
  func.func @_gemm_kernel(%arg0: i32, %arg1: memref<16x576xbf16, #tpu.memory_space<vmem>>, %arg2: memref<576x128xbf16, #tpu.memory_space<vmem>>, %arg3: memref<16x1xf32, #tpu.memory_space<vmem>>, %arg4: memref<1xf32, #tpu.memory_space<smem>>, %arg5: memref<16x128xbf16, #tpu.memory_space<vmem>>) attributes {dimension_semantics = [#tpu.dimension_semantics<parallel>], iteration_bounds = array<i64: 1>, scalar_prefetch = 0 : i64, scratch_operands = 0 : i64, tpu.core_type = #tpu.core_type<tc>, window_params = [{pipeline_mode = #tpu.pipeline_mode<synchronous>, transform_indices = @transform_0, window_bounds = array<i64: 16, 576>}, {transform_indices = @transform_1, window_bounds = array<i64: 576, 128>}, {pipeline_mode = #tpu.pipeline_mode<synchronous>, transform_indices = @transform_2, window_bounds = array<i64: 16, 1>}, {transform_indices = @transform_3, window_bounds = array<i64: 1>}, {transform_indices = @transform_4, window_bounds = array<i64: 16, 128>}]} {
    %c0 = arith.constant 0 : index
    %c0_0 = arith.constant 0 : index
    %0 = vector.load %arg1[%c0, %c0_0] : memref<16x576xbf16, #tpu.memory_space<vmem>>, vector<16x576xbf16>
    %c0_1 = arith.constant 0 : index
    %c0_2 = arith.constant 0 : index
    %1 = vector.load %arg2[%c0_1, %c0_2] : memref<576x128xbf16, #tpu.memory_space<vmem>>, vector<576x128xbf16>
    %cst = arith.constant dense<0.000000e+00> : vector<16x128xf32>
    %2 = tpu.matmul %0, %1, %cst {dimension_numbers = #tpu.dot_dimension_numbers<[1], [0], [0], [1], [0, 0, 1, 1], [], []>} : vector<16x576xbf16>, vector<576x128xbf16>, vector<16x128xf32> -> vector<16x128xf32>
    %c0_3 = arith.constant 0 : index
    %c0_4 = arith.constant 0 : index
    %3 = vector.load %arg3[%c0_3, %c0_4] : memref<16x1xf32, #tpu.memory_space<vmem>>, vector<16x1xf32>
    %4 = vector.broadcast %3 : vector<16x1xf32> to vector<16x128xf32>
    %5 = arith.addf %2, %4 : vector<16x128xf32>
    %c0_5 = arith.constant 0 : index
    %6 = memref.load %arg4[%c0_5] : memref<1xf32, #tpu.memory_space<smem>>
    %cst_6 = arith.constant 0.000000e+00 : f32
    %7 = vector.broadcast %cst_6 : f32 to vector<16x128xf32>
    %8 = arith.cmpf ogt, %5, %7 : vector<16x128xf32>
    %9 = vector.broadcast %6 : f32 to vector<16x128xf32>
    %10 = arith.mulf %9, %5 : vector<16x128xf32>
    %11 = arith.select %8, %5, %10 : vector<16x128xi1>, vector<16x128xf32>
    %12 = arith.truncf %11 : vector<16x128xf32> to vector<16x128xbf16>
    %c0_7 = arith.constant 0 : index
    %c0_8 = arith.constant 0 : index
    %13 = vector.load %arg5[%c0_7, %c0_8] : memref<16x128xbf16, #tpu.memory_space<vmem>>, vector<16x128xbf16>
    tpu.vector_store %arg5[%c0_7, %c0_8], %12 {strides = array<i32>} : memref<16x128xbf16, #tpu.memory_space<vmem>>, vector<16x128xbf16>,
    return
  }
  func.func @transform_0(%arg0: i32) -> (i32, i32) {
    %c0_i32 = arith.constant 0 : i32
    %c0_i32_0 = arith.constant 0 : i32
    %c0_i32_1 = arith.constant 0 : i32
    return %c0_i32, %c0_i32_0 : i32, i32
  }
  func.func @transform_1(%arg0: i32) -> (i32, i32) {
    %c0_i32 = arith.constant 0 : i32
    %c0_i32_0 = arith.constant 0 : i32
    return %c0_i32, %arg0 : i32, i32
  }
  func.func @transform_2(%arg0: i32) -> (i32, i32) {
    %c0_i32 = arith.constant 0 : i32
    %c0_i32_0 = arith.constant 0 : i32
    %c0_i32_1 = arith.constant 0 : i32
    return %c0_i32, %c0_i32_0 : i32, i32
  }
  func.func @transform_3(%arg0: i32) -> i32 {
    %c0_i32 = arith.constant 0 : i32
    %c0_i32_0 = arith.constant 0 : i32
    return %c0_i32 : i32
  }
  func.func @transform_4(%arg0: i32) -> (i32, i32) {
    %c0_i32 = arith.constant 0 : i32
    %c0_i32_0 = arith.constant 0 : i32
    return %c0_i32, %arg0 : i32, i32
  }
}

module attributes {stable_mosaic.version = 11 : i64} {
  func.func @_gemm_kernel(%arg0: i32, %arg1: memref<64x144xbf16, #tpu.memory_space<vmem>>, %arg2: memref<144x128xbf16, #tpu.memory_space<vmem>>, %arg3: memref<64x1xf32, #tpu.memory_space<vmem>>, %arg4: memref<1xf32, #tpu.memory_space<smem>>, %arg5: memref<64x128xbf16, #tpu.memory_space<vmem>>) attributes {dimension_semantics = [#tpu.dimension_semantics<parallel>], iteration_bounds = array<i64: 1>, scalar_prefetch = 0 : i64, scratch_operands = 0 : i64, tpu.core_type = #tpu.core_type<tc>, window_params = [{pipeline_mode = #tpu.pipeline_mode<synchronous>, transform_indices = @transform_0, window_bounds = array<i64: 64, 144>}, {transform_indices = @transform_1, window_bounds = array<i64: 144, 128>}, {pipeline_mode = #tpu.pipeline_mode<synchronous>, transform_indices = @transform_2, window_bounds = array<i64: 64, 1>}, {transform_indices = @transform_3, window_bounds = array<i64: 1>}, {transform_indices = @transform_4, window_bounds = array<i64: 64, 128>}]} {
    %c0 = arith.constant 0 : index
    %c0_0 = arith.constant 0 : index
    %0 = vector.load %arg1[%c0, %c0_0] : memref<64x144xbf16, #tpu.memory_space<vmem>>, vector<64x144xbf16>
    %c0_1 = arith.constant 0 : index
    %c0_2 = arith.constant 0 : index
    %1 = vector.load %arg2[%c0_1, %c0_2] : memref<144x128xbf16, #tpu.memory_space<vmem>>, vector<144x128xbf16>
    %cst = arith.constant dense<0.000000e+00> : vector<64x128xf32>
    %2 = tpu.matmul %0, %1, %cst {dimension_numbers = #tpu.dot_dimension_numbers<[1], [0], [0], [1], [0, 0, 1, 1], [], []>} : vector<64x144xbf16>, vector<144x128xbf16>, vector<64x128xf32> -> vector<64x128xf32>
    %c0_3 = arith.constant 0 : index
    %c0_4 = arith.constant 0 : index
    %3 = vector.load %arg3[%c0_3, %c0_4] : memref<64x1xf32, #tpu.memory_space<vmem>>, vector<64x1xf32>
    %4 = vector.broadcast %3 : vector<64x1xf32> to vector<64x128xf32>
    %5 = arith.addf %2, %4 : vector<64x128xf32>
    %c0_5 = arith.constant 0 : index
    %6 = memref.load %arg4[%c0_5] : memref<1xf32, #tpu.memory_space<smem>>
    %cst_6 = arith.constant 0.000000e+00 : f32
    %7 = vector.broadcast %cst_6 : f32 to vector<64x128xf32>
    %8 = arith.cmpf ogt, %5, %7 : vector<64x128xf32>
    %9 = vector.broadcast %6 : f32 to vector<64x128xf32>
    %10 = arith.mulf %9, %5 : vector<64x128xf32>
    %11 = arith.select %8, %5, %10 : vector<64x128xi1>, vector<64x128xf32>
    %12 = arith.truncf %11 : vector<64x128xf32> to vector<64x128xbf16>
    %c0_7 = arith.constant 0 : index
    %c0_8 = arith.constant 0 : index
    %13 = vector.load %arg5[%c0_7, %c0_8] : memref<64x128xbf16, #tpu.memory_space<vmem>>, vector<64x128xbf16>
    tpu.vector_store %arg5[%c0_7, %c0_8], %12 {strides = array<i32>} : memref<64x128xbf16, #tpu.memory_space<vmem>>, vector<64x128xbf16>,
    return
  }
  func.func @transform_0(%arg0: i32) -> (i32, i32) {
    %c0_i32 = arith.constant 0 : i32
    %c0_i32_0 = arith.constant 0 : i32
    %c0_i32_1 = arith.constant 0 : i32
    return %c0_i32, %c0_i32_0 : i32, i32
  }
  func.func @transform_1(%arg0: i32) -> (i32, i32) {
    %c0_i32 = arith.constant 0 : i32
    %c0_i32_0 = arith.constant 0 : i32
    return %c0_i32, %arg0 : i32, i32
  }
  func.func @transform_2(%arg0: i32) -> (i32, i32) {
    %c0_i32 = arith.constant 0 : i32
    %c0_i32_0 = arith.constant 0 : i32
    %c0_i32_1 = arith.constant 0 : i32
    return %c0_i32, %c0_i32_0 : i32, i32
  }
  func.func @transform_3(%arg0: i32) -> i32 {
    %c0_i32 = arith.constant 0 : i32
    %c0_i32_0 = arith.constant 0 : i32
    return %c0_i32 : i32
  }
  func.func @transform_4(%arg0: i32) -> (i32, i32) {
    %c0_i32 = arith.constant 0 : i32
    %c0_i32_0 = arith.constant 0 : i32
    return %c0_i32, %arg0 : i32, i32
  }
}

module attributes {stable_mosaic.version = 11 : i64} {
  func.func @_gemm_res_kernel(%arg0: i32, %arg1: memref<16x576xbf16, #tpu.memory_space<vmem>>, %arg2: memref<576x128xbf16, #tpu.memory_space<vmem>>, %arg3: memref<16x1xf32, #tpu.memory_space<vmem>>, %arg4: memref<16x128xbf16, #tpu.memory_space<vmem>>, %arg5: memref<1xf32, #tpu.memory_space<smem>>, %arg6: memref<16x128xbf16, #tpu.memory_space<vmem>>) attributes {dimension_semantics = [#tpu.dimension_semantics<parallel>], iteration_bounds = array<i64: 1>, scalar_prefetch = 0 : i64, scratch_operands = 0 : i64, tpu.core_type = #tpu.core_type<tc>, window_params = [{pipeline_mode = #tpu.pipeline_mode<synchronous>, transform_indices = @transform_0, window_bounds = array<i64: 16, 576>}, {transform_indices = @transform_1, window_bounds = array<i64: 576, 128>}, {pipeline_mode = #tpu.pipeline_mode<synchronous>, transform_indices = @transform_2, window_bounds = array<i64: 16, 1>}, {transform_indices = @transform_3, window_bounds = array<i64: 16, 128>}, {transform_indices = @transform_4, window_bounds = array<i64: 1>}, {transform_indices = @transform_5, window_bounds = array<i64: 16, 128>}]} {
    %c0 = arith.constant 0 : index
    %c0_0 = arith.constant 0 : index
    %0 = vector.load %arg1[%c0, %c0_0] : memref<16x576xbf16, #tpu.memory_space<vmem>>, vector<16x576xbf16>
    %c0_1 = arith.constant 0 : index
    %c0_2 = arith.constant 0 : index
    %1 = vector.load %arg2[%c0_1, %c0_2] : memref<576x128xbf16, #tpu.memory_space<vmem>>, vector<576x128xbf16>
    %cst = arith.constant dense<0.000000e+00> : vector<16x128xf32>
    %2 = tpu.matmul %0, %1, %cst {dimension_numbers = #tpu.dot_dimension_numbers<[1], [0], [0], [1], [0, 0, 1, 1], [], []>} : vector<16x576xbf16>, vector<576x128xbf16>, vector<16x128xf32> -> vector<16x128xf32>
    %c0_3 = arith.constant 0 : index
    %c0_4 = arith.constant 0 : index
    %3 = vector.load %arg3[%c0_3, %c0_4] : memref<16x1xf32, #tpu.memory_space<vmem>>, vector<16x1xf32>
    %4 = vector.broadcast %3 : vector<16x1xf32> to vector<16x128xf32>
    %5 = arith.addf %2, %4 : vector<16x128xf32>
    %c0_5 = arith.constant 0 : index
    %6 = memref.load %arg5[%c0_5] : memref<1xf32, #tpu.memory_space<smem>>
    %cst_6 = arith.constant 0.000000e+00 : f32
    %7 = vector.broadcast %cst_6 : f32 to vector<16x128xf32>
    %8 = arith.cmpf ogt, %5, %7 : vector<16x128xf32>
    %9 = vector.broadcast %6 : f32 to vector<16x128xf32>
    %10 = arith.mulf %9, %5 : vector<16x128xf32>
    %11 = arith.select %8, %5, %10 : vector<16x128xi1>, vector<16x128xf32>
    %c0_7 = arith.constant 0 : index
    %c0_8 = arith.constant 0 : index
    %12 = vector.load %arg4[%c0_7, %c0_8] : memref<16x128xbf16, #tpu.memory_space<vmem>>, vector<16x128xbf16>
    %13 = arith.extf %12 : vector<16x128xbf16> to vector<16x128xf32>
    %14 = arith.addf %11, %13 : vector<16x128xf32>
    %15 = arith.truncf %14 : vector<16x128xf32> to vector<16x128xbf16>
    %c0_9 = arith.constant 0 : index
    %c0_10 = arith.constant 0 : index
    %16 = vector.load %arg6[%c0_9, %c0_10] : memref<16x128xbf16, #tpu.memory_space<vmem>>, vector<16x128xbf16>
    tpu.vector_store %arg6[%c0_9, %c0_10], %15 {strides = array<i32>} : memref<16x128xbf16, #tpu.memory_space<vmem>>, vector<16x128xbf16>,
    return
  }
  func.func @transform_0(%arg0: i32) -> (i32, i32) {
    %c0_i32 = arith.constant 0 : i32
    %c0_i32_0 = arith.constant 0 : i32
    %c0_i32_1 = arith.constant 0 : i32
    return %c0_i32, %c0_i32_0 : i32, i32
  }
  func.func @transform_1(%arg0: i32) -> (i32, i32) {
    %c0_i32 = arith.constant 0 : i32
    %c0_i32_0 = arith.constant 0 : i32
    return %c0_i32, %arg0 : i32, i32
  }
  func.func @transform_2(%arg0: i32) -> (i32, i32) {
    %c0_i32 = arith.constant 0 : i32
    %c0_i32_0 = arith.constant 0 : i32
    %c0_i32_1 = arith.constant 0 : i32
    return %c0_i32, %c0_i32_0 : i32, i32
  }
  func.func @transform_3(%arg0: i32) -> (i32, i32) {
    %c0_i32 = arith.constant 0 : i32
    %c0_i32_0 = arith.constant 0 : i32
    return %c0_i32, %arg0 : i32, i32
  }
  func.func @transform_4(%arg0: i32) -> i32 {
    %c0_i32 = arith.constant 0 : i32
    %c0_i32_0 = arith.constant 0 : i32
    return %c0_i32 : i32
  }
  func.func @transform_5(%arg0: i32) -> (i32, i32) {
    %c0_i32 = arith.constant 0 : i32
    %c0_i32_0 = arith.constant 0 : i32
    return %c0_i32, %arg0 : i32, i32
  }
}

module attributes {stable_mosaic.version = 11 : i64} {
  func.func @_gemm_res_kernel(%arg0: i32, %arg1: memref<16x576xbf16, #tpu.memory_space<vmem>>, %arg2: memref<576x128xbf16, #tpu.memory_space<vmem>>, %arg3: memref<16x1xf32, #tpu.memory_space<vmem>>, %arg4: memref<16x128xbf16, #tpu.memory_space<vmem>>, %arg5: memref<1xf32, #tpu.memory_space<smem>>, %arg6: memref<16x128xbf16, #tpu.memory_space<vmem>>) attributes {dimension_semantics = [#tpu.dimension_semantics<parallel>], iteration_bounds = array<i64: 1>, scalar_prefetch = 0 : i64, scratch_operands = 0 : i64, tpu.core_type = #tpu.core_type<tc>, window_params = [{pipeline_mode = #tpu.pipeline_mode<synchronous>, transform_indices = @transform_0, window_bounds = array<i64: 16, 576>}, {transform_indices = @transform_1, window_bounds = array<i64: 576, 128>}, {pipeline_mode = #tpu.pipeline_mode<synchronous>, transform_indices = @transform_2, window_bounds = array<i64: 16, 1>}, {transform_indices = @transform_3, window_bounds = array<i64: 16, 128>}, {transform_indices = @transform_4, window_bounds = array<i64: 1>}, {transform_indices = @transform_5, window_bounds = array<i64: 16, 128>}]} {
    %c0 = arith.constant 0 : index
    %c0_0 = arith.constant 0 : index
    %0 = vector.load %arg1[%c0, %c0_0] : memref<16x576xbf16, #tpu.memory_space<vmem>>, vector<16x576xbf16>
    %c0_1 = arith.constant 0 : index
    %c0_2 = arith.constant 0 : index
    %1 = vector.load %arg2[%c0_1, %c0_2] : memref<576x128xbf16, #tpu.memory_space<vmem>>, vector<576x128xbf16>
    %cst = arith.constant dense<0.000000e+00> : vector<16x128xf32>
    %2 = tpu.matmul %0, %1, %cst {dimension_numbers = #tpu.dot_dimension_numbers<[1], [0], [0], [1], [0, 0, 1, 1], [], []>} : vector<16x576xbf16>, vector<576x128xbf16>, vector<16x128xf32> -> vector<16x128xf32>
    %c0_3 = arith.constant 0 : index
    %c0_4 = arith.constant 0 : index
    %3 = vector.load %arg3[%c0_3, %c0_4] : memref<16x1xf32, #tpu.memory_space<vmem>>, vector<16x1xf32>
    %4 = vector.broadcast %3 : vector<16x1xf32> to vector<16x128xf32>
    %5 = arith.addf %2, %4 : vector<16x128xf32>
    %c0_5 = arith.constant 0 : index
    %6 = memref.load %arg5[%c0_5] : memref<1xf32, #tpu.memory_space<smem>>
    %cst_6 = arith.constant 0.000000e+00 : f32
    %7 = vector.broadcast %cst_6 : f32 to vector<16x128xf32>
    %8 = arith.cmpf ogt, %5, %7 : vector<16x128xf32>
    %9 = vector.broadcast %6 : f32 to vector<16x128xf32>
    %10 = arith.mulf %9, %5 : vector<16x128xf32>
    %11 = arith.select %8, %5, %10 : vector<16x128xi1>, vector<16x128xf32>
    %c0_7 = arith.constant 0 : index
    %c0_8 = arith.constant 0 : index
    %12 = vector.load %arg4[%c0_7, %c0_8] : memref<16x128xbf16, #tpu.memory_space<vmem>>, vector<16x128xbf16>
    %13 = arith.extf %12 : vector<16x128xbf16> to vector<16x128xf32>
    %14 = arith.subf %11, %13 : vector<16x128xf32>
    %15 = arith.truncf %14 : vector<16x128xf32> to vector<16x128xbf16>
    %c0_9 = arith.constant 0 : index
    %c0_10 = arith.constant 0 : index
    %16 = vector.load %arg6[%c0_9, %c0_10] : memref<16x128xbf16, #tpu.memory_space<vmem>>, vector<16x128xbf16>
    tpu.vector_store %arg6[%c0_9, %c0_10], %15 {strides = array<i32>} : memref<16x128xbf16, #tpu.memory_space<vmem>>, vector<16x128xbf16>,
    return
  }
  func.func @transform_0(%arg0: i32) -> (i32, i32) {
    %c0_i32 = arith.constant 0 : i32
    %c0_i32_0 = arith.constant 0 : i32
    %c0_i32_1 = arith.constant 0 : i32
    return %c0_i32, %c0_i32_0 : i32, i32
  }
  func.func @transform_1(%arg0: i32) -> (i32, i32) {
    %c0_i32 = arith.constant 0 : i32
    %c0_i32_0 = arith.constant 0 : i32
    return %c0_i32, %arg0 : i32, i32
  }
  func.func @transform_2(%arg0: i32) -> (i32, i32) {
    %c0_i32 = arith.constant 0 : i32
    %c0_i32_0 = arith.constant 0 : i32
    %c0_i32_1 = arith.constant 0 : i32
    return %c0_i32, %c0_i32_0 : i32, i32
  }
  func.func @transform_3(%arg0: i32) -> (i32, i32) {
    %c0_i32 = arith.constant 0 : i32
    %c0_i32_0 = arith.constant 0 : i32
    return %c0_i32, %arg0 : i32, i32
  }
  func.func @transform_4(%arg0: i32) -> i32 {
    %c0_i32 = arith.constant 0 : i32
    %c0_i32_0 = arith.constant 0 : i32
    return %c0_i32 : i32
  }
  func.func @transform_5(%arg0: i32) -> (i32, i32) {
    %c0_i32 = arith.constant 0 : i32
    %c0_i32_0 = arith.constant 0 : i32
    return %c0_i32, %arg0 : i32, i32
  }
}

module attributes {stable_mosaic.version = 11 : i64} {
  func.func @_gemm_res_kernel(%arg0: i32, %arg1: memref<64x144xbf16, #tpu.memory_space<vmem>>, %arg2: memref<144x128xbf16, #tpu.memory_space<vmem>>, %arg3: memref<64x1xf32, #tpu.memory_space<vmem>>, %arg4: memref<64x128xbf16, #tpu.memory_space<vmem>>, %arg5: memref<1xf32, #tpu.memory_space<smem>>, %arg6: memref<64x128xbf16, #tpu.memory_space<vmem>>) attributes {dimension_semantics = [#tpu.dimension_semantics<parallel>], iteration_bounds = array<i64: 1>, scalar_prefetch = 0 : i64, scratch_operands = 0 : i64, tpu.core_type = #tpu.core_type<tc>, window_params = [{pipeline_mode = #tpu.pipeline_mode<synchronous>, transform_indices = @transform_0, window_bounds = array<i64: 64, 144>}, {transform_indices = @transform_1, window_bounds = array<i64: 144, 128>}, {pipeline_mode = #tpu.pipeline_mode<synchronous>, transform_indices = @transform_2, window_bounds = array<i64: 64, 1>}, {transform_indices = @transform_3, window_bounds = array<i64: 64, 128>}, {transform_indices = @transform_4, window_bounds = array<i64: 1>}, {transform_indices = @transform_5, window_bounds = array<i64: 64, 128>}]} {
    %c0 = arith.constant 0 : index
    %c0_0 = arith.constant 0 : index
    %0 = vector.load %arg1[%c0, %c0_0] : memref<64x144xbf16, #tpu.memory_space<vmem>>, vector<64x144xbf16>
    %c0_1 = arith.constant 0 : index
    %c0_2 = arith.constant 0 : index
    %1 = vector.load %arg2[%c0_1, %c0_2] : memref<144x128xbf16, #tpu.memory_space<vmem>>, vector<144x128xbf16>
    %cst = arith.constant dense<0.000000e+00> : vector<64x128xf32>
    %2 = tpu.matmul %0, %1, %cst {dimension_numbers = #tpu.dot_dimension_numbers<[1], [0], [0], [1], [0, 0, 1, 1], [], []>} : vector<64x144xbf16>, vector<144x128xbf16>, vector<64x128xf32> -> vector<64x128xf32>
    %c0_3 = arith.constant 0 : index
    %c0_4 = arith.constant 0 : index
    %3 = vector.load %arg3[%c0_3, %c0_4] : memref<64x1xf32, #tpu.memory_space<vmem>>, vector<64x1xf32>
    %4 = vector.broadcast %3 : vector<64x1xf32> to vector<64x128xf32>
    %5 = arith.addf %2, %4 : vector<64x128xf32>
    %c0_5 = arith.constant 0 : index
    %6 = memref.load %arg5[%c0_5] : memref<1xf32, #tpu.memory_space<smem>>
    %cst_6 = arith.constant 0.000000e+00 : f32
    %7 = vector.broadcast %cst_6 : f32 to vector<64x128xf32>
    %8 = arith.cmpf ogt, %5, %7 : vector<64x128xf32>
    %9 = vector.broadcast %6 : f32 to vector<64x128xf32>
    %10 = arith.mulf %9, %5 : vector<64x128xf32>
    %11 = arith.select %8, %5, %10 : vector<64x128xi1>, vector<64x128xf32>
    %c0_7 = arith.constant 0 : index
    %c0_8 = arith.constant 0 : index
    %12 = vector.load %arg4[%c0_7, %c0_8] : memref<64x128xbf16, #tpu.memory_space<vmem>>, vector<64x128xbf16>
    %13 = arith.extf %12 : vector<64x128xbf16> to vector<64x128xf32>
    %14 = arith.addf %11, %13 : vector<64x128xf32>
    %15 = arith.truncf %14 : vector<64x128xf32> to vector<64x128xbf16>
    %c0_9 = arith.constant 0 : index
    %c0_10 = arith.constant 0 : index
    %16 = vector.load %arg6[%c0_9, %c0_10] : memref<64x128xbf16, #tpu.memory_space<vmem>>, vector<64x128xbf16>
    tpu.vector_store %arg6[%c0_9, %c0_10], %15 {strides = array<i32>} : memref<64x128xbf16, #tpu.memory_space<vmem>>, vector<64x128xbf16>,
    return
  }
  func.func @transform_0(%arg0: i32) -> (i32, i32) {
    %c0_i32 = arith.constant 0 : i32
    %c0_i32_0 = arith.constant 0 : i32
    %c0_i32_1 = arith.constant 0 : i32
    return %c0_i32, %c0_i32_0 : i32, i32
  }
  func.func @transform_1(%arg0: i32) -> (i32, i32) {
    %c0_i32 = arith.constant 0 : i32
    %c0_i32_0 = arith.constant 0 : i32
    return %c0_i32, %arg0 : i32, i32
  }
  func.func @transform_2(%arg0: i32) -> (i32, i32) {
    %c0_i32 = arith.constant 0 : i32
    %c0_i32_0 = arith.constant 0 : i32
    %c0_i32_1 = arith.constant 0 : i32
    return %c0_i32, %c0_i32_0 : i32, i32
  }
  func.func @transform_3(%arg0: i32) -> (i32, i32) {
    %c0_i32 = arith.constant 0 : i32
    %c0_i32_0 = arith.constant 0 : i32
    return %c0_i32, %arg0 : i32, i32
  }
  func.func @transform_4(%arg0: i32) -> i32 {
    %c0_i32 = arith.constant 0 : i32
    %c0_i32_0 = arith.constant 0 : i32
    return %c0_i32 : i32
  }
  func.func @transform_5(%arg0: i32) -> (i32, i32) {
    %c0_i32 = arith.constant 0 : i32
    %c0_i32_0 = arith.constant 0 : i32
    return %c0_i32, %arg0 : i32, i32
  }
}

module attributes {stable_mosaic.version = 11 : i64} {
  func.func @_gemm_kernel(%arg0: i32, %arg1: memref<64x16xbf16, #tpu.memory_space<vmem>>, %arg2: memref<16x256xbf16, #tpu.memory_space<vmem>>, %arg3: memref<64x1xf32, #tpu.memory_space<vmem>>, %arg4: memref<1xf32, #tpu.memory_space<smem>>, %arg5: memref<64x256xbf16, #tpu.memory_space<vmem>>) attributes {dimension_semantics = [#tpu.dimension_semantics<parallel>], iteration_bounds = array<i64: 2>, scalar_prefetch = 0 : i64, scratch_operands = 0 : i64, tpu.core_type = #tpu.core_type<tc>, window_params = [{pipeline_mode = #tpu.pipeline_mode<synchronous>, transform_indices = @transform_0, window_bounds = array<i64: 64, 16>}, {transform_indices = @transform_1, window_bounds = array<i64: 16, 256>}, {pipeline_mode = #tpu.pipeline_mode<synchronous>, transform_indices = @transform_2, window_bounds = array<i64: 64, 1>}, {transform_indices = @transform_3, window_bounds = array<i64: 1>}, {transform_indices = @transform_4, window_bounds = array<i64: 64, 256>}]} {
    %c0 = arith.constant 0 : index
    %c0_0 = arith.constant 0 : index
    %0 = vector.load %arg1[%c0, %c0_0] : memref<64x16xbf16, #tpu.memory_space<vmem>>, vector<64x16xbf16>
    %c0_1 = arith.constant 0 : index
    %c0_2 = arith.constant 0 : index
    %1 = vector.load %arg2[%c0_1, %c0_2] : memref<16x256xbf16, #tpu.memory_space<vmem>>, vector<16x256xbf16>
    %cst = arith.constant dense<0.000000e+00> : vector<64x256xf32>
    %2 = tpu.matmul %0, %1, %cst {dimension_numbers = #tpu.dot_dimension_numbers<[1], [0], [0], [1], [0, 0, 1, 1], [], []>} : vector<64x16xbf16>, vector<16x256xbf16>, vector<64x256xf32> -> vector<64x256xf32>
    %c0_3 = arith.constant 0 : index
    %c0_4 = arith.constant 0 : index
    %3 = vector.load %arg3[%c0_3, %c0_4] : memref<64x1xf32, #tpu.memory_space<vmem>>, vector<64x1xf32>
    %4 = vector.broadcast %3 : vector<64x1xf32> to vector<64x256xf32>
    %5 = arith.addf %2, %4 : vector<64x256xf32>
    %c0_5 = arith.constant 0 : index
    %6 = memref.load %arg4[%c0_5] : memref<1xf32, #tpu.memory_space<smem>>
    %cst_6 = arith.constant 0.000000e+00 : f32
    %7 = vector.broadcast %cst_6 : f32 to vector<64x256xf32>
    %8 = arith.cmpf ogt, %5, %7 : vector<64x256xf32>
    %9 = vector.broadcast %6 : f32 to vector<64x256xf32>
    %10 = arith.mulf %9, %5 : vector<64x256xf32>
    %11 = arith.select %8, %5, %10 : vector<64x256xi1>, vector<64x256xf32>
    %12 = arith.truncf %11 : vector<64x256xf32> to vector<64x256xbf16>
    %c0_7 = arith.constant 0 : index
    %c0_8 = arith.constant 0 : index
    %13 = vector.load %arg5[%c0_7, %c0_8] : memref<64x256xbf16, #tpu.memory_space<vmem>>, vector<64x256xbf16>
    tpu.vector_store %arg5[%c0_7, %c0_8], %12 {strides = array<i32>} : memref<64x256xbf16, #tpu.memory_space<vmem>>, vector<64x256xbf16>,
    return
  }
  func.func @transform_0(%arg0: i32) -> (i32, i32) {
    %c0_i32 = arith.constant 0 : i32
    %c0_i32_0 = arith.constant 0 : i32
    %c0_i32_1 = arith.constant 0 : i32
    return %c0_i32, %c0_i32_0 : i32, i32
  }
  func.func @transform_1(%arg0: i32) -> (i32, i32) {
    %c0_i32 = arith.constant 0 : i32
    %c0_i32_0 = arith.constant 0 : i32
    return %c0_i32, %arg0 : i32, i32
  }
  func.func @transform_2(%arg0: i32) -> (i32, i32) {
    %c0_i32 = arith.constant 0 : i32
    %c0_i32_0 = arith.constant 0 : i32
    %c0_i32_1 = arith.constant 0 : i32
    return %c0_i32, %c0_i32_0 : i32, i32
  }
  func.func @transform_3(%arg0: i32) -> i32 {
    %c0_i32 = arith.constant 0 : i32
    %c0_i32_0 = arith.constant 0 : i32
    return %c0_i32 : i32
  }
  func.func @transform_4(%arg0: i32) -> (i32, i32) {
    %c0_i32 = arith.constant 0 : i32
    %c0_i32_0 = arith.constant 0 : i32
    return %c0_i32, %arg0 : i32, i32
  }
}

</mosaic_0001>

<bundles_post_ra>
// kernel: net_forward.16
= control target key start
LH: loop header
LB: loop body
LE: loop exit
PB: predicated region body
PF: predicated region fallthrough
CT: control target
= control target key end

     0   :  { %s972_s0 = inlined_call_operand.vmem [shape: bf16[16,144], index: 0, kind: input, shape index: {}]   ;;  %s973_s1 = inlined_call_operand.vmem [shape: bf16[144,512], index: 1, kind: input, shape index: {}]   ;;  %s974_s2 = inlined_call_operand.vmem [shape: f32[16,1], index: 2, kind: input, shape index: {}]   ;;  %s975_s3 = inlined_call_operand.<no memory space> [shape: f32[1], index: 3, kind: input, shape index: {}]   ;;  %s976_s4 = inlined_call_operand.vmem [shape: bf16[16,512], index: 4, kind: output, shape index: {}]  }
   0x1   :  { %9 = sst [smem:[#allocation2]] %s975_s3 }
   0x2   :  { %s810_s17 = smov 0   ;;  %s812_s18 = smov 0  }
   0x3   :  { %s814_s19 = smov 0  }
   0x4 LB: > { %s612_s3 = sadd.s32 4294967295, %s779_s19   ;;  %s827_s20 = sadd.s32 1, %s779_s19   ;;  %s779_s19 = sphi %s814_s19, %s980_s19   ;;  %s775_s18 = sphi %s812_s18, %s979_s18   ;;  %s771_s17 = sphi %s810_s17, %s978_s17  }
   0x5   : > { %s40_s21 = ssub.s32 %s779_s19, %s827_s20  ;;  %s43_s22 = sadd.s32 1, %s775_s18 }
   0x6   : > { %p41_p0 = scmp.eq.s32.totalorder %s40_s21, 0  ;;  %p50_p1 = scmp.ne.s32.totalorder %s775_s18, %s771_s17 }
   0x7   : > { %p51_p2 = scmp.eq.s32.totalorder %s779_s19, 0  ;;  %p122_p3 = scmp.eq.s32.totalorder %s612_s3, 1 }
   0x8   : > { %s838_s23 = scalar_select %p41_p0, %s775_s18, %s43_s22  }
   0x9   : > { %p52_p4 = por %p51_p2, %p50_p1  ;;  %p840_p5 = por %p122_p3, %p50_p1 }
   0xa   : > { %p615_p6 = scmp.ge.s32.totalorder %s779_s19, 2 }
   0xc   : > { %153 = sbr.rel (%p615_p6) target bundleno = 39 (0x27), region = 28 }
  0x11   : > { %156 = sbr.rel (!%p52_p4) target bundleno = 39 (0x27), region = 32  ;;  %s158_s25 = sand.u32 (%p52_p4), 1, %s775_s18  }
  0x12   : > { %s707_s26 = sshll.u32 (%p52_p4), %s779_s19, 3  ;;  %s729_s27 = smul.u32 (%p52_p4), 144, %s158_s25 }
  0x13   : > { %s850_s30 = scalar_lea.vmem (%p52_p4), %s973_s1, %s707_s26 }
  0x14   : > { %v226_v0 = vld [vmem:[%s850_s30] sm:$0xff] (%p52_p4)  ;;  %v228_v1 = vld [vmem:[%s850_s30 + $0x10] sm:$0xff] (%p52_p4)  ;;  %s855_s5 = scalar_lea.vmem (%p52_p4), [#allocation3], %s729_s27 }
  0x15   : > { %v230_v2 = vld [vmem:[%s850_s30 + $0x20] sm:$0xff] (%p52_p4)  ;;  %227 = vst [vmem:[%s855_s5] sm:$0xff] (%p52_p4), %v226_v0  ;;  %v232_v3 = vld [vmem:[%s850_s30 + $0x30] sm:$0xff] (%p52_p4) }
  0x16   : > { %229 = vst [vmem:[%s855_s5 + $0x8] sm:$0xff] %v228_v1  ;;  %v234_v4 = vld [vmem:[%s850_s30 + $0x40] sm:$0xff]  ;;  %v236_v5 = vld [vmem:[%s850_s30 + $0x50] sm:$0xff] }
  0x17   : > { %231 = vst [vmem:[%s855_s5 + $0x10] sm:$0xff] %v230_v2  ;;  %v238_v6 = vld [vmem:[%s850_s30 + $0x60] sm:$0xff]  ;;  %v240_v7 = vld [vmem:[%s850_s30 + $0x70] sm:$0xff] }
  0x18   : > { %233 = vst [vmem:[%s855_s5 + $0x18] sm:$0xff] %v232_v3  ;;  %v242_v8 = vld [vmem:[%s850_s30 + $0x80] sm:$0xff]  ;;  %v244_v9 = vld [vmem:[%s850_s30 + $0x90] sm:$0xff] }
  0x19   : > { %235 = vst [vmem:[%s855_s5 + $0x20] sm:$0xff] %v234_v4  ;;  %v246_v10 = vld [vmem:[%s850_s30 + $0xa0] sm:$0xff]  ;;  %v248_v11 = vld [vmem:[%s850_s30 + $0xb0] sm:$0xff] }
  0x1a   : > { %237 = vst [vmem:[%s855_s5 + $0x28] sm:$0xff] %v236_v5  ;;  %v250_v12 = vld [vmem:[%s850_s30 + $0xc0] sm:$0xff]  ;;  %v252_v13 = vld [vmem:[%s850_s30 + $0xd0] sm:$0xff] }
  0x1b   : > { %239 = vst [vmem:[%s855_s5 + $0x30] sm:$0xff] %v238_v6  ;;  %v254_v14 = vld [vmem:[%s850_s30 + $0xe0] sm:$0xff]  ;;  %v256_v15 = vld [vmem:[%s850_s30 + $0xf0] sm:$0xff] }
  0x1c   : > { %241 = vst [vmem:[%s855_s5 + $0x38] sm:$0xff] %v240_v7  ;;  %v258_v16 = vld [vmem:[%s850_s30 + $0x100] sm:$0xff]  ;;  %v260_v17 = vld [vmem:[%s850_s30 + $0x110] sm:$0xff] }
  0x1d   : > { %243 = vst [vmem:[%s855_s5 + $0x40] sm:$0xff] %v242_v8 }
  0x1e   : > { %245 = vst [vmem:[%s855_s5 + $0x48] sm:$0xff] %v244_v9 }
  0x1f   : > { %247 = vst [vmem:[%s855_s5 + $0x50] sm:$0xff] %v246_v10 }
  0x20   : > { %249 = vst [vmem:[%s855_s5 + $0x58] sm:$0xff] %v248_v11 }
  0x21   : > { %251 = vst [vmem:[%s855_s5 + $0x60] sm:$0xff] %v250_v12 }
  0x22   : > { %253 = vst [vmem:[%s855_s5 + $0x68] sm:$0xff] %v252_v13 }
  0x23   : > { %255 = vst [vmem:[%s855_s5 + $0x70] sm:$0xff] %v254_v14 }
  0x24   : > { %257 = vst [vmem:[%s855_s5 + $0x78] sm:$0xff] %v256_v15 }
  0x25   : > { %259 = vst [vmem:[%s855_s5 + $0x80] sm:$0xff] %v258_v16 }
  0x26   : > { %261 = vst [vmem:[%s855_s5 + $0x88] sm:$0xff] %v260_v17 }
  0x27 PF: > { %p618_p7 = scmp.ge.s32.totalorder %s779_s19, 1  ;;  %p266_p8 = scmp.lt.s32.totalorder %s779_s19, 3 }
  0x29   : > { %p267_p9 = pnand %p618_p7, %p266_p8 }
  0x2a   : > { %s273_s6 = sand.u32 (!%p267_p9), 1, %s771_s17   ;;  %s491_s27 = sld [smem:[#allocation2]] (!%p267_p9) }
  0x2b   : > { %270 = sbr.rel (%p267_p9) target bundleno = 241 (0xf1), region = 70  ;;  %s619_s28 = sshll.u32 (!%p267_p9), %s273_s6, 4 }
  0x2c   : > { %s730_s7 = smul.u32 (!%p267_p9), 144, %s273_s6  ;;  %s296_s29 = scalar_lea.vmem (!%p267_p9), [#allocation4], %s619_s28 }
  0x2e   : > { %s895_s8 = scalar_lea.vmem (!%p267_p9), [#allocation3], %s730_s7 }
  0x30   : > { %v686_v18 = vld [vmem:[%s895_s8 + $0x70] sm:$0xf]  ;;  %v725_v19 = vld [vmem:[%s895_s8 + $0x74] sm:$0xf0]  ;;  %v724_v20 = vld [vmem:[%s895_s8 + $0x74] sm:$0xf] }
  0x31   : > { %v687_v21 = vor.u32 %v725_v19, %v686_v18  ;;  %v688_v22 = vld [vmem:[%s895_s8 + $0x78] sm:$0xf0]  ;;  %v678_v23 = vld [vmem:[%s895_s8 + $0x60] sm:$0xf]  ;;  %v723_v24 = vld [vmem:[%s895_s8 + $0x64] sm:$0xf0] }
  0x32   : > { %v691_v25 = vor.u32 %v724_v20, %v688_v22  ;;  %v722_v26 = vld [vmem:[%s895_s8 + $0x64] sm:$0xf]  ;;  %v680_v27 = vld [vmem:[%s895_s8 + $0x68] sm:$0xf0]  ;;  %v679_v28 = vor.u32 %v723_v24, %v678_v23  ;;  %v670_v30 = vld [vmem:[%s895_s8 + $0x50] sm:$0xf]  ;;  %v496_v22 = vstv %s491_s27 }
  0x33   : > { %435 = vmatpush.bf16.msra.mxu0 %v687_v21  ;;  %v683_v29 = vor.u32 %v722_v26, %v680_v27  ;;  %v721_v31 = vld [vmem:[%s895_s8 + $0x54] sm:$0xf0]  ;;  %v720_v32 = vld [vmem:[%s895_s8 + $0x54] sm:$0xf]  ;;  %v672_v33 = vld [vmem:[%s895_s8 + $0x58] sm:$0xf0] }
  0x34   : > { %463 = vmatpush.bf16.msra.mxu2 %v691_v25  ;;  %v671_v34 = vor.u32 %v721_v31, %v670_v30  ;;  %v662_v35 = vld [vmem:[%s895_s8 + $0x40] sm:$0xf]  ;;  %v708_v36 = vld [vmem:[%s972_s0 + $0x4] sm:$0xf]  ;;  %v624_v37 = vld [vmem:[%s972_s0 + $0x8] sm:$0xf0]  ;;  %v675_v38 = vor.u32 %v720_v32, %v672_v33 }
  0x35   : > { %v719_v39 = vld [vmem:[%s895_s8 + $0x44] sm:$0xf0]  ;;  %v726_v40 = vld [vmem:[%s895_s8 + $0x84] sm:$0xf]  ;;  %v696_v41 = vld [vmem:[%s895_s8 + $0x88] sm:$0xf0]  ;;  %v627_v45 = vor.u32 %v708_v36, %v624_v37 }
  0x36   : > { %v718_v42 = vld [vmem:[%s895_s8 + $0x44] sm:$0xf]  ;;  %v664_v43 = vld [vmem:[%s895_s8 + $0x48] sm:$0xf0]  ;;  %v699_v44 = vor.u32 %v726_v40, %v696_v41  ;;  %v694_v46 = vld [vmem:[%s895_s8 + $0x80] sm:$0xf]  ;;  %v663_v47 = vor.u32 %v719_v39, %v662_v35 }
  0x37   : > { %436 = vmatpush.bf16.msra.mxu0 %v679_v28  ;;  %vm431_vm0 = vcmask 130048   ;;  %v727_v48 = vld [vmem:[%s895_s8 + $0x84] sm:$0xf0]  ;;  %v667_v49 = vor.u32 %v718_v42, %v664_v43  ;;  %v654_v50 = vld [vmem:[%s895_s8 + $0x30] sm:$0xf]  ;;  %v781_v56 = vmov 0  }
  0x38   : > { %464 = vmatpush.bf16.msra.mxu2 %v683_v29  ;;  %484 = vmatpush.bf16.msra.mxu3 %v699_v44  ;;  %v717_v51 = vld [vmem:[%s895_s8 + $0x34] sm:$0xf0]  ;;  %v695_v52 = vor.u32 %v727_v48, %v694_v46  ;;  %v320_v53 = vld [vmem:[%s974_s2] sm:$0xff]  ;;  %v656_v55 = vld [vmem:[%s895_s8 + $0x38] sm:$0xf0]  ;;  %s728_s17 = sshll.u32 (%p840_p5), %s612_s3, 3 }
  0x39   : > { %v716_v54 = vld [vmem:[%s895_s8 + $0x34] sm:$0xf]  ;;  %756 = vset.pattern.permute.xlu0 %v781_v56  ;;  %v655_v57 = vor.u32 %v717_v51, %v654_v50  ;;  %v646_v59 = vld [vmem:[%s895_s8 + $0x20] sm:$0xf]  ;;  %v715_v60 = vld [vmem:[%s895_s8 + $0x24] sm:$0xf0]  ;;  %s518_s6 = scalar_lea.vmem (%p840_p5), %s976_s4, %s728_s17 }
  0x3a   : > { %456 = vmatpush.bf16.msra.mxu1 %v695_v52  ;;  %324 = vperm.xlu0 %756, %v320_v53   ;;  %v659_v58 = vor.u32 %v716_v54, %v656_v55  ;;  %v714_v61 = vld [vmem:[%s895_s8 + $0x24] sm:$0xf]  ;;  %v648_v62 = vld [vmem:[%s895_s8 + $0x28] sm:$0xf0]  ;;  %v647_v63 = vor.u32 %v715_v60, %v646_v59  ;;  %v638_v1 = vld [vmem:[%s895_s8 + $0x10] sm:$0xf] }
  0x3b   : > { %437 = vmatpush.bf16.msra.mxu0 %v671_v34  ;;  %701 = vmatmul.msk.bf16.vlgmr.msra.gmra.mxu3 %vm431_vm0, %v627_v45  ;;  %v651_v0 = vor.u32 %v714_v61, %v648_v62  ;;  %v713_v2 = vld [vmem:[%s895_s8 + $0x14] sm:$0xf0]  ;;  %v712_v4 = vld [vmem:[%s895_s8 + $0x14] sm:$0xf]  ;;  %v640_v5 = vld [vmem:[%s895_s8 + $0x18] sm:$0xf0] }
  0x3c   : > { %465 = vmatpush.bf16.msra.mxu2 %v675_v38  ;;  %v321_v3 = vld [vmem:[%s974_s2 + $0x8] sm:$0xff]  ;;  %v639_v6 = vor.u32 %v713_v2, %v638_v1  ;;  %v643_v7 = vor.u32 %v712_v4, %v640_v5  ;;  %v630_v8 = vld [vmem:[%s895_s8] sm:$0xf]  ;;  %v710_v10 = vld [vmem:[%s895_s8 + $0x4] sm:$0xf] }
  0x3d   : > { %700 = vmatmul.msk.bf16.vlgmr.msra.gmra.mxu1 %vm431_vm0, %v627_v45  ;;  %v711_v9 = vld [vmem:[%s895_s8 + $0x4] sm:$0xf0]  ;;  %v632_v11 = vld [vmem:[%s895_s8 + $0x8] sm:$0xf0]  ;;  %v622_v13 = vld [vmem:[%s972_s0] sm:$0xf] }
  0x3e   : > { %v631_v12 = vor.u32 %v711_v9, %v630_v8  ;;  %v709_v14 = vld [vmem:[%s972_s0 + $0x4] sm:$0xf0]  ;;  %v635_v15 = vor.u32 %v710_v10, %v632_v11 }
  0x3f   : > { %438 = vmatpush.bf16.msra.mxu0 %v663_v47  ;;  %v623_v16 = vor.u32 %v709_v14, %v622_v13 }
  0x40   : > { %466 = vmatpush.bf16.msra.mxu2 %v667_v49 }
  0x42   : > { %329 = vperm.xlu0 %756, %v321_v3  }
  0x43   : > { %439 = vmatpush.bf16.msra.mxu0 %v655_v57 }
  0x44   : > { %467 = vmatpush.bf16.msra.mxu2 %v659_v58 }
  0x47   : > { %440 = vmatpush.bf16.msra.mxu0 %v647_v63 }
  0x48   : > { %468 = vmatpush.bf16.msra.mxu2 %v651_v0 }
  0x4b   : > { %441 = vmatpush.bf16.msra.mxu0 %v639_v6 }
  0x4c   : > { %469 = vmatpush.bf16.msra.mxu2 %v643_v7 }
  0x4f   : > { %442 = vmatpush.bf16.msra.mxu0 %v631_v12 }
  0x50   : > { %470 = vmatpush.bf16.msra.mxu2 %v635_v15 }
  0x52   : > { %443 = vmatmul.bf16.vlgmr.msra.gmra.mxu0 %v623_v16 }
  0x53   : > { %471 = vmatmul.bf16.vlgmr.msra.gmra.mxu2 %v623_v16 }
  0xac   : > { %v325_v17 = vpop.permute.xlu0 %324 }
  0xb4   : > { %v330_v27 = vpop.permute.xlu0 %329 }
  0xba   : > { %v458_v20 = vpop.f32.mrf.mxu1 }
  0xbe   : > { %v486_v23 = vpop.f32.mrf.mxu3 }
  0xc2   : > { %v460_v32 = vpop.f32.mrf.mxu1 }
  0xc6   : > { %v488_v39 = vpop.f32.mrf.mxu3 }
  0xcf   : > { %v444_v18 = vpop.f32.mrf.mxu0 }
  0xd0   : > { %v445_v19 = vadd.f32 %v444_v18, %v325_v17 }
  0xd2   : > { %v459_v21 = vadd.f32 %v458_v20, %v445_v19 }
  0xd4   : > { %v497_v28 = vmul.f32 %v496_v22, %v459_v21  ;;  %vm492_vm1 = vcmp.gt.f32.partialorder %v459_v21, 0.0 }
  0xd6   : > { %v472_v24 = vpop.f32.mrf.mxu2  ;;  %v501_v33 = vsel %vm492_vm1, %v459_v21, %v497_v28 }
  0xd7   : > { %v473_v25 = vadd.f32 %v472_v24, %v325_v17  ;;  %v446_v26 = vpop.f32.mrf.mxu0 }
  0xd8   : > { %v447_v30 = vadd.f32 %v446_v26, %v330_v27 }
  0xd9   : > { %v487_v29 = vadd.f32 %v486_v23, %v473_v25 }
  0xda   : > { %v461_v35 = vadd.f32 %v460_v32, %v447_v30 }
  0xdb   : > { %vm493_vm2 = vcmp.gt.f32.partialorder %v487_v29, 0.0  ;;  %v498_v31 = vmul.f32 %v496_v22, %v487_v29 }
  0xdc   : > { %v499_v40 = vmul.f32 %v496_v22, %v461_v35  ;;  %vm494_vm3 = vcmp.gt.f32.partialorder %v461_v35, 0.0 }
  0xdd   : > { %v502_v34 = vsel %vm493_vm2, %v487_v29, %v498_v31 }
  0xde   : > { %v505_v36 = vpack.c.bf16 %v502_v34, %v501_v33  ;;  %v474_v37 = vpop.f32.mrf.mxu2  ;;  %v503_v43 = vsel %vm494_vm3, %v461_v35, %v499_v40 }
  0xdf   : > { %v475_v38 = vadd.f32 %v474_v37, %v330_v27 }
  0xe0   : > { %507 = vst [vmem:[%s296_s29] sm:$0xff] %v505_v36 }
  0xe1   : > { %v489_v41 = vadd.f32 %v488_v39, %v475_v38 }
  0xe3   : > { %vm495_vm4 = vcmp.gt.f32.partialorder %v489_v41, 0.0  ;;  %v500_v42 = vmul.f32 %v496_v22, %v489_v41 }
  0xe4   : > { %515 = sbr.rel (!%p840_p5) target bundleno = 241 (0xf1), region = 78 }
  0xe5   : > { %v504_v44 = vsel %vm495_vm4, %v489_v41, %v500_v42 }
  0xe6   : > { %v506_v45 = vpack.c.bf16 %v504_v44, %v503_v43 }
  0xe7   : > { %v549_v46 = vld [vmem:[%s296_s29] sm:$0xff] (%p840_p5) }
  0xe8   : > { %508 = vst [vmem:[%s296_s29 + $0x8] sm:$0xff] %v506_v45 }
  0xe9   : > { %550 = vst [vmem:[%s518_s6] sm:$0xff] %v549_v46 }
  0xef   : > { %v551_v47 = vld [vmem:[%s296_s29 + $0x8] sm:$0xff] }
  0xf0   : > { %552 = vst [vmem:[%s518_s6 + $0x10] sm:$0xff] %v551_v47 }
  0xf1 PF: > { %p12_p10 = scmp.ge.s32.totalorder %s827_s20, 4   ;;  %s978_s17 = smov %s775_s18 }
  0xf2   : > { %s979_s18 = smov %s838_s23  ;;  %s980_s19 = smov %s827_s20 }
  0xf3   :  { %14 = sbr.rel (!%p12_p10) target bundleno = 4 (0x4), region = 147 }

// kernel: net_forward.17
= control target key start
LH: loop header
LB: loop body
LE: loop exit
PB: predicated region body
PF: predicated region fallthrough
CT: control target
= control target key end

     0   :  { %s606_s0 = inlined_call_operand.vmem [shape: bf16[16,16], index: 0, kind: input, shape index: {}]   ;;  %s607_s1 = inlined_call_operand.vmem [shape: bf16[16,512], index: 1, kind: input, shape index: {}]   ;;  %s608_s2 = inlined_call_operand.vmem [shape: f32[16,1], index: 2, kind: input, shape index: {}]   ;;  %s609_s3 = inlined_call_operand.<no memory space> [shape: f32[1], index: 3, kind: input, shape index: {}]   ;;  %s610_s4 = inlined_call_operand.vmem [shape: bf16[16,512], index: 4, kind: output, shape index: {}]  }
   0x1   :  { %9 = sst [smem:[#allocation2]] %s609_s3 }
   0x2   :  { %s533_s17 = smov 0   ;;  %s535_s18 = smov 0  }
   0x3   :  { %s537_s19 = smov 0  }
   0x4 LB: > { %s420_s3 = sadd.s32 4294967295, %s502_s19   ;;  %s550_s20 = sadd.s32 1, %s502_s19   ;;  %s502_s19 = sphi %s537_s19, %s614_s19   ;;  %s498_s18 = sphi %s535_s18, %s613_s18   ;;  %s494_s17 = sphi %s533_s17, %s612_s17  }
   0x5   : > { %s40_s21 = ssub.s32 %s502_s19, %s550_s20  ;;  %s43_s22 = sadd.s32 1, %s498_s18 }
   0x6   : > { %p41_p0 = scmp.eq.s32.totalorder %s40_s21, 0  ;;  %p50_p1 = scmp.ne.s32.totalorder %s498_s18, %s494_s17 }
   0x7   : > { %p51_p2 = scmp.eq.s32.totalorder %s502_s19, 0  ;;  %p122_p3 = scmp.eq.s32.totalorder %s420_s3, 1 }
   0x8   : > { %s561_s23 = scalar_select %p41_p0, %s498_s18, %s43_s22  }
   0x9   : > { %p52_p4 = por %p51_p2, %p50_p1  ;;  %p563_p5 = por %p122_p3, %p50_p1 }
   0xa   : > { %p423_p6 = scmp.ge.s32.totalorder %s502_s19, 2 }
   0xc   : > { %153 = sbr.rel (%p423_p6) target bundleno = 23 (0x17), region = 28 }
  0x11   : > { %156 = sbr.rel (!%p52_p4) target bundleno = 23 (0x17), region = 32  ;;  %s158_s25 = sand.u32 (%p52_p4), 1, %s498_s18  }
  0x12   : > { %s449_s26 = sshll.u32 (%p52_p4), %s502_s19, 3  ;;  %s424_s27 = sshll.u32 (%p52_p4), %s158_s25, 4 }
  0x13   : > { %s163_s30 = scalar_lea.vmem (%p52_p4), %s607_s1, %s449_s26  ;;  %s160_s5 = scalar_lea.vmem (%p52_p4), [#allocation3], %s424_s27 }
  0x14   : > { %v194_v0 = vld [vmem:[%s163_s30] sm:$0xff] (%p52_p4)  ;;  %v196_v1 = vld [vmem:[%s163_s30 + $0x10] sm:$0xff] (%p52_p4) }
  0x15   : > { %195 = vst [vmem:[%s160_s5] sm:$0xff] (%p52_p4), %v194_v0 }
  0x16   : > { %197 = vst [vmem:[%s160_s5 + $0x8] sm:$0xff] %v196_v1 }
  0x17 PF: > { %p427_p7 = scmp.ge.s32.totalorder %s502_s19, 1  ;;  %p202_p8 = scmp.lt.s32.totalorder %s502_s19, 3 }
  0x19   : > { %p203_p9 = pnand %p427_p7, %p202_p8 }
  0x1a   : > { %s209_s6 = sand.u32 (!%p203_p9), 1, %s494_s17   ;;  %s299_s15 = sld [smem:[#allocation2]] (!%p203_p9) }
  0x1b   : > { %206 = sbr.rel (%p203_p9) target bundleno = 189 (0xbd), region = 70  ;;  %s579_s9 = sshll.u32 (!%p203_p9), %s209_s6, 4 }
  0x1c   : > { %s211_s10 = scalar_lea.vmem (!%p203_p9), [#allocation3], %s579_s9  ;;  %s232_s16 = scalar_lea.vmem (!%p203_p9), [#allocation4], %s579_s9 }
  0x20   : > { %v240_v2 = vld [vmem:[%s608_s2] sm:$0xff]  ;;  %v504_v3 = vmov 0   ;;  %v452_v5 = vld [vmem:[%s211_s10 + $0x4] sm:$0xf0]  ;;  %v438_v8 = vld [vmem:[%s211_s10 + $0x8] sm:$0xf0]  ;;  %v304_v14 = vstv %s299_s15 }
  0x21   : > { %479 = vset.pattern.permute.xlu0 %v504_v3  ;;  %v436_v4 = vld [vmem:[%s211_s10] sm:$0xf]  ;;  %v451_v6 = vld [vmem:[%s211_s10 + $0x4] sm:$0xf]  ;;  %vm267_vm0 = vcmask 130048   ;;  %v241_v11 = vld [vmem:[%s608_s2 + $0x8] sm:$0xff] }
  0x22   : > { %244 = vperm.xlu0 %479, %v240_v2   ;;  %v437_v7 = vor.u32 %v452_v5, %v436_v4  ;;  %v441_v9 = vor.u32 %v451_v6, %v438_v8  ;;  %v450_v10 = vld [vmem:[%s606_s0] sm:$0xff]  ;;  %s453_s17 = sshll.u32 (%p563_p5), %s420_s3, 3 }
  0x23   : > { %s326_s25 = scalar_lea.vmem (%p563_p5), %s610_s4, %s453_s17 }
  0x24   : > { %278 = vmatpush.bf16.msra.mxu0 %v437_v7  ;;  %292 = vmatpush.bf16.msra.mxu1 %v441_v9 }
  0x27   : > { %442 = vmatmul.msk.bf16.vlgmr.msra.gmra.mxu0 %vm267_vm0, %v450_v10  ;;  %443 = vmatmul.msk.bf16.vlgmr.msra.gmra.mxu1 %vm267_vm0, %v450_v10 }
  0x2a   : > { %249 = vperm.xlu0 %479, %v241_v11  }
  0x94   : > { %v245_v12 = vpop.permute.xlu0 %244 }
  0x9c   : > { %v250_v23 = vpop.permute.xlu0 %249 }
  0xa4   : > { %v280_v13 = vpop.f32.mrf.mxu0  ;;  %v294_v16 = vpop.f32.mrf.mxu1 }
  0xa5   : > { %v281_v15 = vadd.f32 %v280_v13, %v245_v12  ;;  %v295_v17 = vadd.f32 %v294_v16, %v245_v12 }
  0xa7   : > { %vm300_vm1 = vcmp.gt.f32.partialorder %v281_v15, 0.0  ;;  %v305_v18 = vmul.f32 %v304_v14, %v281_v15  ;;  %vm301_vm2 = vcmp.gt.f32.partialorder %v295_v17, 0.0  ;;  %v306_v19 = vmul.f32 %v304_v14, %v295_v17 }
  0xa9   : > { %v309_v20 = vsel %vm300_vm1, %v281_v15, %v305_v18  ;;  %v310_v21 = vsel %vm301_vm2, %v295_v17, %v306_v19 }
  0xaa   : > { %v313_v22 = vpack.c.bf16 %v310_v21, %v309_v20 }
  0xac   : > { %v282_v24 = vpop.f32.mrf.mxu0  ;;  %315 = vst [vmem:[%s232_s16] sm:$0xff] %v313_v22  ;;  %v296_v26 = vpop.f32.mrf.mxu1 }
  0xad   : > { %v283_v25 = vadd.f32 %v282_v24, %v250_v23  ;;  %v297_v27 = vadd.f32 %v296_v26, %v250_v23 }
  0xaf   : > { %vm302_vm3 = vcmp.gt.f32.partialorder %v283_v25, 0.0  ;;  %v307_v28 = vmul.f32 %v304_v14, %v283_v25  ;;  %vm303_vm4 = vcmp.gt.f32.partialorder %v297_v27, 0.0  ;;  %v308_v29 = vmul.f32 %v304_v14, %v297_v27 }
  0xb0   : > { %323 = sbr.rel (!%p563_p5) target bundleno = 189 (0xbd), region = 78 }
  0xb1   : > { %v311_v30 = vsel %vm302_vm3, %v283_v25, %v307_v28  ;;  %v312_v31 = vsel %vm303_vm4, %v297_v27, %v308_v29 }
  0xb2   : > { %v314_v32 = vpack.c.bf16 %v312_v31, %v311_v30 }
  0xb3   : > { %v357_v33 = vld [vmem:[%s232_s16] sm:$0xff] (%p563_p5) }
  0xb4   : > { %316 = vst [vmem:[%s232_s16 + $0x8] sm:$0xff] %v314_v32 }
  0xb5   : > { %358 = vst [vmem:[%s326_s25] sm:$0xff] %v357_v33 }
  0xbb   : > { %v359_v34 = vld [vmem:[%s232_s16 + $0x8] sm:$0xff] }
  0xbc   : > { %360 = vst [vmem:[%s326_s25 + $0x10] sm:$0xff] %v359_v34 }
  0xbd PF: > { %p12_p10 = scmp.ge.s32.totalorder %s550_s20, 4   ;;  %s612_s17 = smov %s498_s18 }
  0xbe   : > { %s613_s18 = smov %s561_s23  ;;  %s614_s19 = smov %s550_s20 }
  0xbf   :  { %14 = sbr.rel (!%p12_p10) target bundleno = 4 (0x4), region = 147 }

// kernel: net_forward.18
= control target key start
LH: loop header
LB: loop body
LE: loop exit
PB: predicated region body
PF: predicated region fallthrough
CT: control target
= control target key end

     0   :  { %v653_v12 = vmov 0   ;;  %vm350_vm0 = vcmask 523264   ;;  %s829_s1 = inlined_call_operand.vmem [shape: bf16[576,128], index: 1, kind: input, shape index: {}]   ;;  %s830_s2 = inlined_call_operand.vmem [shape: f32[16,1], index: 2, kind: input, shape index: {}]   ;;  %s831_s0 = inlined_call_operand.vmem [shape: bf16[16,576], index: 0, kind: input, shape index: {}]   ;;  %s832_s3 = inlined_call_operand.<no memory space> [shape: f32[1], index: 3, kind: input, shape index: {}]   ;;  %s833_s4 = inlined_call_operand.vmem [shape: bf16[16,128], index: 4, kind: output, shape index: {}]  }
   0x1   :  { %v617_v0 = vld [vmem:[%s829_s1 + $0x38] sm:$0xff]  ;;  %v616_v4 = vld [vmem:[%s829_s1 + $0x30] sm:$0xff]  ;;  %v615_v8 = vld [vmem:[%s829_s1 + $0x28] sm:$0xff]  ;;  %652 = vset.pattern.permute.xlu0 %v653_v12 }
   0x2   :  { %v633_v1 = vld [vmem:[%s829_s1 + $0xb8] sm:$0xff]  ;;  %354 = vmatpush.bf16.msra.mxu0 %v617_v0  ;;  %v632_v5 = vld [vmem:[%s829_s1 + $0xb0] sm:$0xff]  ;;  %v631_v9 = vld [vmem:[%s829_s1 + $0xa8] sm:$0xff] }
   0x3   :  { %v641_v2 = vld [vmem:[%s829_s1 + $0xf8] sm:$0xff]  ;;  %382 = vmatpush.bf16.msra.mxu2 %v633_v1  ;;  %v640_v6 = vld [vmem:[%s829_s1 + $0xf0] sm:$0xff]  ;;  %v639_v10 = vld [vmem:[%s829_s1 + $0xe8] sm:$0xff] }
   0x4   :  { %v625_v3 = vld [vmem:[%s829_s1 + $0x78] sm:$0xff]  ;;  %396 = vmatpush.bf16.msra.mxu3 %v641_v2  ;;  %v624_v7 = vld [vmem:[%s829_s1 + $0x70] sm:$0xff]  ;;  %v623_v11 = vld [vmem:[%s829_s1 + $0x68] sm:$0xff] }
   0x5   :  { %368 = vmatpush.bf16.msra.mxu1 %v625_v3  ;;  %v614_v13 = vld [vmem:[%s829_s1 + $0x20] sm:$0xff]  ;;  %v613_v17 = vld [vmem:[%s829_s1 + $0x18] sm:$0xff]  ;;  %v612_v22 = vld [vmem:[%s829_s1 + $0x10] sm:$0xff] }
   0x6   :  { %355 = vmatpush.bf16.msra.mxu0 %v616_v4  ;;  %v630_v14 = vld [vmem:[%s829_s1 + $0xa0] sm:$0xff]  ;;  %v629_v18 = vld [vmem:[%s829_s1 + $0x98] sm:$0xff]  ;;  %v628_v23 = vld [vmem:[%s829_s1 + $0x90] sm:$0xff] }
   0x7   :  { %383 = vmatpush.bf16.msra.mxu2 %v632_v5  ;;  %v638_v15 = vld [vmem:[%s829_s1 + $0xe0] sm:$0xff]  ;;  %v637_v20 = vld [vmem:[%s829_s1 + $0xd8] sm:$0xff]  ;;  %v636_v24 = vld [vmem:[%s829_s1 + $0xd0] sm:$0xff] }
   0x8   :  { %397 = vmatpush.bf16.msra.mxu3 %v640_v6  ;;  %v622_v16 = vld [vmem:[%s829_s1 + $0x60] sm:$0xff]  ;;  %v621_v21 = vld [vmem:[%s829_s1 + $0x58] sm:$0xff]  ;;  %v620_v25 = vld [vmem:[%s829_s1 + $0x50] sm:$0xff] }
   0x9   :  { %369 = vmatpush.bf16.msra.mxu1 %v624_v7  ;;  %v97_v19 = vld [vmem:[%s830_s2] sm:$0xff]  ;;  %v98_v26 = vld [vmem:[%s830_s2 + $0x8] sm:$0xff]  ;;  %v607_v36 = vld [vmem:[%s831_s0 + $0x10] sm:$0xf0] }
   0xa   :  { %356 = vmatpush.bf16.msra.mxu0 %v615_v8  ;;  %101 = vperm.xlu0 %652, %v97_v19   ;;  %v611_v27 = vld [vmem:[%s829_s1 + $0x8] sm:$0xff]  ;;  %v610_v31 = vld [vmem:[%s829_s1] sm:$0xff]  ;;  %v608_v38 = vld [vmem:[%s831_s0 + $0x18] sm:$0xf0] }
   0xb   :  { %384 = vmatpush.bf16.msra.mxu2 %v631_v9  ;;  %v627_v28 = vld [vmem:[%s829_s1 + $0x88] sm:$0xff]  ;;  %v626_v32 = vld [vmem:[%s829_s1 + $0x80] sm:$0xff]  ;;  %v444_v42 = vld [vmem:[%s831_s0 + $0x14] sm:$0xf0]  ;;  %v427_v9 = vstv %s832_s3 }
   0xc   :  { %398 = vmatpush.bf16.msra.mxu3 %v639_v10  ;;  %v635_v29 = vld [vmem:[%s829_s1 + $0xc8] sm:$0xff]  ;;  %v634_v33 = vld [vmem:[%s829_s1 + $0xc0] sm:$0xff]  ;;  %v645_v43 = vld [vmem:[%s829_s1 + $0x118] sm:$0xff] }
   0xd   :  { %370 = vmatpush.bf16.msra.mxu1 %v623_v11  ;;  %v619_v30 = vld [vmem:[%s829_s1 + $0x48] sm:$0xff]  ;;  %v618_v34 = vld [vmem:[%s829_s1 + $0x40] sm:$0xff]  ;;  %v644_v48 = vld [vmem:[%s829_s1 + $0x110] sm:$0xff] }
   0xe   :  { %357 = vmatpush.bf16.msra.mxu0 %v614_v13  ;;  %v442_v35 = vld [vmem:[%s831_s0] sm:$0xf]  ;;  %v450_v37 = vld [vmem:[%s831_s0 + $0x8] sm:$0xf]  ;;  %v606_v39 = vld [vmem:[%s831_s0 + $0xc] sm:$0xf] }
   0xf   :  { %385 = vmatpush.bf16.msra.mxu2 %v630_v14  ;;  %v452_v40 = vld [vmem:[%s831_s0 + $0x1c] sm:$0xf0]  ;;  %v605_v41 = vld [vmem:[%s831_s0 + $0x4] sm:$0xf]  ;;  %v443_v44 = vor.u32 %v607_v36, %v442_v35  ;;  %v451_v45 = vor.u32 %v608_v38, %v450_v37  ;;  %v643_v49 = vld [vmem:[%s829_s1 + $0x108] sm:$0xff] }
  0x10   :  { %399 = vmatpush.bf16.msra.mxu3 %v638_v15  ;;  %v455_v46 = vor.u32 %v606_v39, %v452_v40  ;;  %v447_v47 = vor.u32 %v605_v41, %v444_v42  ;;  %v642_v50 = vld [vmem:[%s829_s1 + $0x100] sm:$0xff]  ;;  %v458_v51 = vld [vmem:[%s831_s0 + $0x10] sm:$0xf] }
  0x11   :  { %371 = vmatpush.bf16.msra.mxu1 %v622_v16  ;;  %v609_v52 = vld [vmem:[%s831_s0 + $0x20] sm:$0xf0] }
  0x12   :  { %358 = vmatpush.bf16.msra.mxu0 %v613_v17  ;;  %106 = vperm.xlu0 %652, %v98_v26   ;;  %v459_v53 = vor.u32 %v609_v52, %v458_v51 }
  0x13   :  { %386 = vmatpush.bf16.msra.mxu2 %v629_v18 }
  0x14   :  { %400 = vmatpush.bf16.msra.mxu3 %v637_v20 }
  0x15   :  { %372 = vmatpush.bf16.msra.mxu1 %v621_v21 }
  0x16   :  { %359 = vmatpush.bf16.msra.mxu0 %v612_v22 }
  0x17   :  { %387 = vmatpush.bf16.msra.mxu2 %v628_v23 }
  0x18   :  { %401 = vmatpush.bf16.msra.mxu3 %v636_v24 }
  0x19   :  { %373 = vmatpush.bf16.msra.mxu1 %v620_v25 }
  0x1a   :  { %360 = vmatpush.bf16.msra.mxu0 %v611_v27 }
  0x1b   :  { %388 = vmatpush.bf16.msra.mxu2 %v627_v28 }
  0x1c   :  { %402 = vmatpush.bf16.msra.mxu3 %v635_v29 }
  0x1d   :  { %374 = vmatpush.bf16.msra.mxu1 %v619_v30 }
  0x1e   :  { %361 = vmatpush.bf16.msra.mxu0 %v610_v31 }
  0x1f   :  { %389 = vmatpush.bf16.msra.mxu2 %v626_v32 }
  0x20   :  { %403 = vmatpush.bf16.msra.mxu3 %v634_v33 }
  0x21   :  { %375 = vmatpush.bf16.msra.mxu1 %v618_v34  ;;  %362 = vmatmul.bf16.vlgmr.msra.gmra.mxu0 %v443_v44 }
  0x22   :  { %414 = vmatpush.bf16.msrb.mxu0 %v645_v43  ;;  %390 = vmatmul.bf16.vlgmr.msra.gmra.mxu2 %v451_v45 }
  0x23   :  { %404 = vmatmul.bf16.vlgmr.msra.gmra.mxu3 %v455_v46 }
  0x24   :  { %376 = vmatmul.bf16.vlgmr.msra.gmra.mxu1 %v447_v47 }
  0x26   :  { %415 = vmatpush.bf16.msrb.mxu0 %v644_v48 }
  0x2a   :  { %416 = vmatpush.bf16.msrb.mxu0 %v643_v49 }
  0x2e   :  { %417 = vmatpush.bf16.msrb.mxu0 %v642_v50 }
  0x31   :  { %604 = vmatmul.msk.bf16.vlgmr.msrb.gmra.mxu0 %vm350_vm0, %v459_v53 }
  0x7c   :  { %v102_v54 = vpop.permute.xlu0 %101 }
  0x84   :  { %v107_v60 = vpop.permute.xlu0 %106 }
  0x9e   :  { %v363_v55 = vpop.f32.mrf.mxu0 }
  0x9f   :  { %v364_v59 = vadd.f32 %v363_v55, %v102_v54 }
  0xa1   :  { %v377_v56 = vpop.f32.mrf.mxu1 }
  0xa2   :  { %v378_v62 = vadd.f32 %v377_v56, %v364_v59 }
  0xa5   :  { %v391_v57 = vpop.f32.mrf.mxu2 }
  0xa6   :  { %v365_v58 = vpop.f32.mrf.mxu0  ;;  %v405_v61 = vpop.f32.mrf.mxu3  ;;  %v392_v1 = vadd.f32 %v391_v57, %v378_v62 }
  0xa7   :  { %v366_v63 = vadd.f32 %v365_v58, %v107_v60 }
  0xa8   :  { %v406_v5 = vadd.f32 %v405_v61, %v392_v1 }
  0xa9   :  { %v379_v0 = vpop.f32.mrf.mxu1 }
  0xaa   :  { %v380_v4 = vadd.f32 %v379_v0, %v366_v63 }
  0xad   :  { %v393_v2 = vpop.f32.mrf.mxu2 }
  0xae   :  { %v419_v3 = vpop.f32.mrf.mxu0  ;;  %v394_v6 = vadd.f32 %v393_v2, %v380_v4  ;;  %v407_v8 = vpop.f32.mrf.mxu3 }
  0xaf   :  { %v420_v7 = vadd.f32 %v419_v3, %v406_v5 }
  0xb0   :  { %v408_v10 = vadd.f32 %v407_v8, %v394_v6 }
  0xb1   :  { %v428_v12 = vmul.f32 %v427_v9, %v420_v7  ;;  %vm425_vm1 = vcmp.gt.f32.partialorder %v420_v7, 0.0 }
  0xb3   :  { %v430_v15 = vsel %vm425_vm1, %v420_v7, %v428_v12 }
  0xb6   :  { %v421_v11 = vpop.f32.mrf.mxu0 }
  0xb7   :  { %v422_v13 = vadd.f32 %v421_v11, %v408_v10 }
  0xb9   :  { %vm426_vm2 = vcmp.gt.f32.partialorder %v422_v13, 0.0  ;;  %v429_v14 = vmul.f32 %v427_v9, %v422_v13 }
  0xbb   :  { %v431_v16 = vsel %vm426_vm2, %v422_v13, %v429_v14 }
  0xbc   :  { %v649_v17 = vpack.c.bf16 %v431_v16, %v430_v15 }
  0xbe   :  { %650 = vst [vmem:[%s833_s4] sm:$0xff] %v649_v17  }

// kernel: net_forward.19
= control target key start
LH: loop header
LB: loop body
LE: loop exit
PB: predicated region body
PF: predicated region fallthrough
CT: control target
= control target key end

     0   :  { %vm183_vm0 = vcmask 130048   ;;  %v425_v6 = vmov 0   ;;  %s569_s1 = inlined_call_operand.vmem [shape: bf16[144,128], index: 1, kind: input, shape index: {}]   ;;  %s570_s0 = inlined_call_operand.vmem [shape: bf16[64,144], index: 0, kind: input, shape index: {}]   ;;  %s571_s2 = inlined_call_operand.vmem [shape: f32[64,1], index: 2, kind: input, shape index: {}]   ;;  %s572_s3 = inlined_call_operand.<no memory space> [shape: f32[1], index: 3, kind: input, shape index: {}]   ;;  %s573_s4 = inlined_call_operand.vmem [shape: bf16[64,128], index: 4, kind: output, shape index: {}]  }
   0x1   :  { %v387_v0 = vld [vmem:[%s569_s1 + $0x38] sm:$0xff]  ;;  %v388_v1 = vld [vmem:[%s569_s1 + $0x40] sm:$0xff]  ;;  %v374_v2 = vld [vmem:[%s570_s0 + $0x14] sm:$0xf]  ;;  %423 = vset.pattern.permute.xlu1 %v425_v6  ;;  %422 = vset.pattern.permute.xlu0 %v425_v6  ;;  %v263_v53 = vstv %s572_s3 }
   0x2   :  { %v312_v3 = vld [vmem:[%s570_s0 + $0x18] sm:$0xf0]  ;;  %196 = vmatpush.bf16.msra.mxu0 %v387_v0  ;;  %412 = vmatpush.bf16.msra.mxu2 %v387_v0  ;;  %v386_v4 = vld [vmem:[%s569_s1 + $0x30] sm:$0xff]  ;;  %v385_v7 = vld [vmem:[%s569_s1 + $0x28] sm:$0xff] }
   0x3   :  { %420 = vmatpush.bf16.msra.mxu3 %v388_v1  ;;  %v315_v5 = vor.u32 %v374_v2, %v312_v3  ;;  %232 = vmatpush.bf16.msra.mxu1 %v388_v1  ;;  %v372_v8 = vld [vmem:[%s570_s0 + $0x4] sm:$0xf]  ;;  %v304_v9 = vld [vmem:[%s570_s0 + $0x8] sm:$0xf0]  ;;  %v47_v10 = vld [vmem:[%s571_s2 + $0x10] sm:$0xff] }
   0x4   :  { %424 = vset.pattern.permute.xlu2 %v425_v6  ;;  %v45_v11 = vld [vmem:[%s571_s2] sm:$0xff]  ;;  %v307_v12 = vor.u32 %v372_v8, %v304_v9  ;;  %65 = vperm.xlu1 %423, %v47_v10   ;;  %v383_v14 = vld [vmem:[%s569_s1 + $0x18] sm:$0xff]  ;;  %v320_v16 = vld [vmem:[%s570_s0 + $0x28] sm:$0xf0] }
   0x5   :  { %55 = vperm.xlu0 %422, %v45_v11   ;;  %v384_v13 = vld [vmem:[%s569_s1 + $0x20] sm:$0xff]  ;;  %v48_v17 = vld [vmem:[%s571_s2 + $0x18] sm:$0xff]  ;;  %v46_v18 = vld [vmem:[%s571_s2 + $0x8] sm:$0xff] }
   0x6   :  { %197 = vmatpush.bf16.msra.mxu0 %v386_v4  ;;  %413 = vmatpush.bf16.msra.mxu2 %v386_v4  ;;  %v376_v15 = vld [vmem:[%s570_s0 + $0x24] sm:$0xf]  ;;  %v382_v19 = vld [vmem:[%s569_s1 + $0x10] sm:$0xff]  ;;  %v381_v22 = vld [vmem:[%s569_s1 + $0x8] sm:$0xff] }
   0x7   :  { %369 = vmatmul.msk.bf16.vlgmr.msra.gmra.mxu3 %vm183_vm0, %v315_v5  ;;  %368 = vmatmul.msk.bf16.vlgmr.msra.gmra.mxu1 %vm183_vm0, %v307_v12  ;;  %v49_v20 = vld [vmem:[%s571_s2 + $0x20] sm:$0xff]  ;;  %v323_v21 = vor.u32 %v376_v15, %v320_v16  ;;  %v52_v23 = vld [vmem:[%s571_s2 + $0x38] sm:$0xff]  ;;  %v51_v24 = vld [vmem:[%s571_s2 + $0x30] sm:$0xff] }
   0x8   :  { %75 = vperm.xlu2 %424, %v49_v20   ;;  %v380_v25 = vld [vmem:[%s569_s1] sm:$0xff]  ;;  %v50_v27 = vld [vmem:[%s571_s2 + $0x28] sm:$0xff]  ;;  %v378_v33 = vld [vmem:[%s570_s0 + $0x34] sm:$0xf] }
   0x9   :  { %v302_v26 = vld [vmem:[%s570_s0] sm:$0xf]  ;;  %v373_v28 = vld [vmem:[%s570_s0 + $0x4] sm:$0xf0]  ;;  %v328_v34 = vld [vmem:[%s570_s0 + $0x38] sm:$0xf0] }
   0xa   :  { %198 = vmatpush.bf16.msra.mxu0 %v385_v7  ;;  %414 = vmatpush.bf16.msra.mxu2 %v385_v7  ;;  %v318_v29 = vld [vmem:[%s570_s0 + $0x20] sm:$0xf]  ;;  %v377_v30 = vld [vmem:[%s570_s0 + $0x24] sm:$0xf0]  ;;  %v303_v31 = vor.u32 %v373_v28, %v302_v26  ;;  %v331_v35 = vor.u32 %v378_v33, %v328_v34  ;;  %v310_v36 = vld [vmem:[%s570_s0 + $0x10] sm:$0xf] }
   0xb   :  { %v319_v32 = vor.u32 %v377_v30, %v318_v29  ;;  %v375_v37 = vld [vmem:[%s570_s0 + $0x14] sm:$0xf0]  ;;  %v326_v38 = vld [vmem:[%s570_s0 + $0x30] sm:$0xf] }
   0xc   :  { %70 = vperm.xlu1 %423, %v48_v17   ;;  %v379_v39 = vld [vmem:[%s570_s0 + $0x34] sm:$0xf0]  ;;  %v311_v40 = vor.u32 %v375_v37, %v310_v36 }
   0xd   :  { %60 = vperm.xlu0 %422, %v46_v18   ;;  %v327_v41 = vor.u32 %v379_v39, %v326_v38 }
   0xe   :  { %199 = vmatpush.bf16.msra.mxu0 %v384_v13  ;;  %415 = vmatpush.bf16.msra.mxu2 %v384_v13 }
  0x10   :  { %80 = vperm.xlu2 %424, %v50_v27  }
  0x12   :  { %200 = vmatpush.bf16.msra.mxu0 %v383_v14  ;;  %416 = vmatpush.bf16.msra.mxu2 %v383_v14 }
  0x14   :  { %90 = vperm.xlu1 %423, %v52_v23  }
  0x15   :  { %85 = vperm.xlu0 %422, %v51_v24  }
  0x16   :  { %201 = vmatpush.bf16.msra.mxu0 %v382_v19  ;;  %417 = vmatpush.bf16.msra.mxu2 %v382_v19 }
  0x17   :  { %370 = vmatmul.msk.bf16.gmra.mxu3 %vm183_vm0, %v323_v21 }
  0x1a   :  { %202 = vmatpush.bf16.msra.mxu0 %v381_v22  ;;  %418 = vmatpush.bf16.msra.mxu2 %v381_v22 }
  0x1e   :  { %203 = vmatpush.bf16.msra.mxu0 %v380_v25  ;;  %419 = vmatpush.bf16.msra.mxu2 %v380_v25 }
  0x21   :  { %204 = vmatmul.bf16.vlgmr.msra.gmra.mxu0 %v303_v31  ;;  %214 = vmatmul.bf16.vlgmr.msra.gmra.mxu2 %v319_v32 }
  0x27   :  { %371 = vmatmul.msk.bf16.gmra.mxu3 %vm183_vm0, %v331_v35 }
  0x31   :  { %209 = vmatmul.bf16.gmra.mxu0 %v311_v40  ;;  %219 = vmatmul.bf16.gmra.mxu2 %v327_v41 }
  0x62   :  { %v76_v48 = vpop.permute.xlu2 %75 }
  0x6a   :  { %v81_v62 = vpop.permute.xlu2 %80 }
  0x76   :  { %v66_v58 = vpop.permute.xlu1 %65 }
  0x77   :  { %v56_v44 = vpop.permute.xlu0 %55 }
  0x7e   :  { %v71_v11 = vpop.permute.xlu1 %70 }
  0x7f   :  { %v61_v52 = vpop.permute.xlu0 %60 }
  0x84   :  { %v234_v45 = vpop.f32.mrf.mxu1 }
  0x86   :  { %v91_v26 = vpop.permute.xlu1 %90 }
  0x87   :  { %v86_v18 = vpop.permute.xlu0 %85 }
  0x8a   :  { %v239_v42 = vpop.f32.mrf.mxu3 }
  0x8c   :  { %v236_v55 = vpop.f32.mrf.mxu1 }
  0x92   :  { %v241_v43 = vpop.f32.mrf.mxu3 }
  0x9a   :  { %v244_v47 = vpop.f32.mrf.mxu3 }
  0x9e   :  { %v205_v46 = vpop.f32.mrf.mxu0 }
  0x9f   :  { %v206_v49 = vadd.f32 %v205_v46, %v56_v44 }
  0xa1   :  { %v235_v51 = vadd.f32 %v234_v45, %v206_v49 }
  0xa2   :  { %v246_v61 = vpop.f32.mrf.mxu3 }
  0xa3   :  { %v264_v59 = vmul.f32 %v263_v53, %v235_v51  ;;  %vm255_vm1 = vcmp.gt.f32.partialorder %v235_v51, 0.0 }
  0xa4   :  { %v215_v50 = vpop.f32.mrf.mxu2 }
  0xa5   :  { %v216_v56 = vadd.f32 %v215_v50, %v76_v48  ;;  %v272_v2 = vsel %vm255_vm1, %v235_v51, %v264_v59 }
  0xa6   :  { %v207_v54 = vpop.f32.mrf.mxu0 }
  0xa7   :  { %v208_v57 = vadd.f32 %v207_v54, %v61_v52  ;;  %v245_v63 = vadd.f32 %v244_v47, %v216_v56 }
  0xa9   :  { %v237_v60 = vadd.f32 %v236_v55, %v208_v57  ;;  %v268_v7 = vmul.f32 %v263_v53, %v245_v63  ;;  %vm259_vm3 = vcmp.gt.f32.partialorder %v245_v63, 0.0 }
  0xaa   :  { %v249_v15 = vpop.f32.mrf.mxu3 }
  0xab   :  { %vm256_vm2 = vcmp.gt.f32.partialorder %v237_v60, 0.0  ;;  %v265_v0 = vmul.f32 %v263_v53, %v237_v60  ;;  %v276_v12 = vsel %vm259_vm3, %v245_v63, %v268_v7 }
  0xac   :  { %v217_v1 = vpop.f32.mrf.mxu2 }
  0xad   :  { %v273_v3 = vsel %vm256_vm2, %v237_v60, %v265_v0  ;;  %v218_v4 = vadd.f32 %v217_v1, %v81_v62 }
  0xae   :  { %v392_v5 = vpack.c.bf16 %v273_v3, %v272_v2  ;;  %v210_v6 = vpop.f32.mrf.mxu0 }
  0xaf   :  { %v247_v8 = vadd.f32 %v246_v61, %v218_v4  ;;  %v211_v10 = vadd.f32 %v210_v6, %v66_v58 }
  0xb0   :  { %393 = vst [vmem:[%s573_s4] sm:$0xff] %v392_v5  }
  0xb1   :  { %vm260_vm4 = vcmp.gt.f32.partialorder %v247_v8, 0.0  ;;  %v269_v9 = vmul.f32 %v263_v53, %v247_v8  ;;  %v240_v17 = vadd.f32 %v239_v42, %v211_v10 }
  0xb2   :  { %v251_v32 = vpop.f32.mrf.mxu3 }
  0xb3   :  { %v277_v13 = vsel %vm260_vm4, %v247_v8, %v269_v9  ;;  %v266_v22 = vmul.f32 %v263_v53, %v240_v17  ;;  %vm257_vm5 = vcmp.gt.f32.partialorder %v240_v17, 0.0 }
  0xb4   :  { %v402_v14 = vpack.c.bf16 %v277_v13, %v276_v12  ;;  %v220_v16 = vpop.f32.mrf.mxu2 }
  0xb5   :  { %v221_v20 = vadd.f32 %v220_v16, %v86_v18  ;;  %v274_v28 = vsel %vm257_vm5, %v240_v17, %v266_v22 }
  0xb6   :  { %410 = vst [vmem:[%s573_s4 + $0x10] sm:$0xff] %v402_v14   ;;  %v212_v19 = vpop.f32.mrf.mxu0 }
  0xb7   :  { %v213_v21 = vadd.f32 %v212_v19, %v71_v11  ;;  %v250_v24 = vadd.f32 %v249_v15, %v221_v20 }
  0xb9   :  { %v242_v23 = vadd.f32 %v241_v43, %v213_v21  ;;  %v270_v33 = vmul.f32 %v263_v53, %v250_v24  ;;  %vm261_vm7 = vcmp.gt.f32.partialorder %v250_v24, 0.0 }
  0xbb   :  { %vm258_vm6 = vcmp.gt.f32.partialorder %v242_v23, 0.0  ;;  %v267_v25 = vmul.f32 %v263_v53, %v242_v23  ;;  %v278_v36 = vsel %vm261_vm7, %v250_v24, %v270_v33 }
  0xbc   :  { %v222_v27 = vpop.f32.mrf.mxu2 }
  0xbd   :  { %v275_v29 = vsel %vm258_vm6, %v242_v23, %v267_v25  ;;  %v223_v30 = vadd.f32 %v222_v27, %v91_v26 }
  0xbe   :  { %v397_v31 = vpack.c.bf16 %v275_v29, %v274_v28 }
  0xbf   :  { %v252_v34 = vadd.f32 %v251_v32, %v223_v30 }
  0xc0   :  { %409 = vst [vmem:[%s573_s4 + $0x8] sm:$0xff] %v397_v31  }
  0xc1   :  { %vm262_vm8 = vcmp.gt.f32.partialorder %v252_v34, 0.0  ;;  %v271_v35 = vmul.f32 %v263_v53, %v252_v34 }
  0xc3   :  { %v279_v37 = vsel %vm262_vm8, %v252_v34, %v271_v35 }
  0xc4   :  { %v407_v38 = vpack.c.bf16 %v279_v37, %v278_v36 }
  0xc6   :  { %411 = vst [vmem:[%s573_s4 + $0x18] sm:$0xff] %v407_v38  }

// kernel: sub.2
= control target key start
LH: loop header
LB: loop body
LE: loop exit
PB: predicated region body
PF: predicated region fallthrough
CT: control target
= control target key end

     0   :  { %s1808_s0 = inlined_call_operand.vmem [shape: bf16[16,2,16,16], index: 0, kind: input, shape index: {}]   ;;  %s1809_s1 = inlined_call_operand.vmem [shape: bf16[16,2,16,16], index: 1, kind: input, shape index: {}]   ;;  %s1810_s2 = inlined_call_operand.vmem [shape: bf16[16,2,16,16], index: 2, kind: output, shape index: {}]  }
   0x1   :  { %v1167_v0 = vld [vmem:[%s1808_s0] sm:$0xff]   ;;  %v1190_v7 = vld [vmem:[%s1808_s0 + $0x8] sm:$0xff]   ;;  %v1214_v15 = vld [vmem:[%s1808_s0 + $0x10] sm:$0xff]  }
   0x2   :  { %v1172_v1 = vld [vmem:[%s1809_s1] sm:$0xff]   ;;  %v4_v3 = vunpack.c.l.bf16 %v1167_v0  ;;  %v1195_v8 = vld [vmem:[%s1809_s1 + $0x8] sm:$0xff]   ;;  %v32_v11 = vunpack.c.l.bf16 %v1190_v7  ;;  %v62_v20 = vunpack.c.l.bf16 %v1214_v15  ;;  %v1223_v21 = vld [vmem:[%s1809_s1 + $0x10] sm:$0xff]   ;;  %v1830_v0 = vunpack.c.h.bf16 %v1167_v0 }
   0x3   :  { %v1177_v2 = vld [vmem:[%s1808_s0 + $0x80] sm:$0xff]   ;;  %v7_v4 = vunpack.c.l.bf16 %v1172_v1  ;;  %v36_v12 = vunpack.c.l.bf16 %v1195_v8  ;;  %v1204_v13 = vld [vmem:[%s1808_s0 + $0x88] sm:$0xff]   ;;  %v1228_v22 = vld [vmem:[%s1808_s0 + $0x90] sm:$0xff]   ;;  %v66_v26 = vunpack.c.l.bf16 %v1223_v21  ;;  %v1829_v1 = vunpack.c.h.bf16 %v1172_v1 }
   0x4   :  { %v17_v5 = vunpack.c.l.bf16 %v1177_v2  ;;  %v1185_v6 = vld [vmem:[%s1809_s1 + $0x80] sm:$0xff]   ;;  %v1209_v14 = vld [vmem:[%s1809_s1 + $0x88] sm:$0xff]   ;;  %v47_v18 = vunpack.c.l.bf16 %v1204_v13  ;;  %v1233_v23 = vld [vmem:[%s1809_s1 + $0x90] sm:$0xff]   ;;  %v77_v27 = vunpack.c.l.bf16 %v1228_v22  ;;  %v497_v2 = vunpack.c.h.bf16 %v1177_v2 }
   0x5   :  { %v21_v10 = vunpack.c.l.bf16 %v1185_v6  ;;  %v11_v17 = vsub.f32 %v4_v3, %v7_v4  ;;  %v51_v19 = vunpack.c.l.bf16 %v1209_v14  ;;  %v40_v25 = vsub.f32 %v32_v11, %v36_v12  ;;  %v1240_v28 = vld [vmem:[%s1808_s0 + $0x18] sm:$0xff]   ;;  %v1262_v36 = vld [vmem:[%s1808_s0 + $0x20] sm:$0xff]   ;;  %v1288_v48 = vld [vmem:[%s1808_s0 + $0x28] sm:$0xff]  }
   0x6   :  { %v1245_v29 = vld [vmem:[%s1809_s1 + $0x18] sm:$0xff]   ;;  %v81_v33 = vunpack.c.l.bf16 %v1233_v23  ;;  %v92_v34 = vunpack.c.l.bf16 %v1240_v28  ;;  %v1267_v37 = vld [vmem:[%s1809_s1 + $0x20] sm:$0xff]   ;;  %v70_v40 = vsub.f32 %v62_v20, %v66_v26  ;;  %v1293_v49 = vld [vmem:[%s1809_s1 + $0x28] sm:$0xff]   ;;  %v122_v52 = vunpack.c.l.bf16 %v1262_v36 }
   0x7   :  { %v25_v24 = vsub.f32 %v17_v5, %v21_v10  ;;  %v1250_v30 = vld [vmem:[%s1808_s0 + $0x98] sm:$0xff]   ;;  %v13_v31 = vpack.c.bf16 0.0, %v11_v17  ;;  %v55_v32 = vsub.f32 %v47_v18, %v51_v19  ;;  %v43_v39 = vpack.c.bf16 0.0, %v40_v25  ;;  %v1273_v42 = vld [vmem:[%s1808_s0 + $0xa0] sm:$0xff]   ;;  %v1303_v54 = vld [vmem:[%s1808_s0 + $0xa8] sm:$0xff]  }
   0x8   :  { %v1257_v35 = vld [vmem:[%s1809_s1 + $0x98] sm:$0xff]   ;;  %v96_v41 = vunpack.c.l.bf16 %v1245_v29  ;;  %v1278_v43 = vld [vmem:[%s1809_s1 + $0xa0] sm:$0xff]   ;;  %v85_v45 = vsub.f32 %v77_v27, %v81_v33  ;;  %v107_v46 = vunpack.c.l.bf16 %v1250_v30  ;;  %v73_v50 = vpack.c.bf16 0.0, %v70_v40  ;;  %v1308_v55 = vld [vmem:[%s1809_s1 + $0xa8] sm:$0xff]  }
   0x9   :  { %v28_v38 = vpack.c.bf16 0.0, %v25_v24  ;;  %14 = vst [vmem:[%s1810_s2] sm:$0xf] %v13_v31  ;;  %v58_v44 = vpack.c.bf16 0.0, %v55_v32  ;;  %v111_v47 = vunpack.c.l.bf16 %v1257_v35  ;;  %v126_v53 = vunpack.c.l.bf16 %v1267_v37  ;;  %v1318_v60 = vld [vmem:[%s1808_s0 + $0x30] sm:$0xff]   ;;  %v1348_v19 = vld [vmem:[%s1808_s0 + $0x38] sm:$0xff]   ;;  %v1378_v40 = vld [vmem:[%s1808_s0 + $0x40] sm:$0xff]  }
   0xa   :  { %v100_v51 = vsub.f32 %v92_v34, %v96_v41  ;;  %965 = vst [vmem:[%s1810_s2 + $0x8] sm:$0xf] %v43_v39  ;;  %v88_v56 = vpack.c.bf16 0.0, %v85_v45  ;;  %v137_v58 = vunpack.c.l.bf16 %v1273_v42  ;;  %v141_v59 = vunpack.c.l.bf16 %v1278_v43  ;;  %v1323_v61 = vld [vmem:[%s1809_s1 + $0x30] sm:$0xff]   ;;  %v1353_v20 = vld [vmem:[%s1809_s1 + $0x38] sm:$0xff]   ;;  %v1383_v41 = vld [vmem:[%s1809_s1 + $0x40] sm:$0xff]  }
   0xb   :  { %962 = vst [vmem:[%s1810_s2 + $0x80] sm:$0xf] %v28_v38  ;;  %v115_v57 = vsub.f32 %v107_v46, %v111_v47  ;;  %v130_v63 = vsub.f32 %v122_v52, %v126_v53  ;;  %v152_v3 = vunpack.c.l.bf16 %v1288_v48  ;;  %v156_v4 = vunpack.c.l.bf16 %v1293_v49  ;;  %v1333_v5 = vld [vmem:[%s1808_s0 + $0xb0] sm:$0xff]   ;;  %v1363_v31 = vld [vmem:[%s1808_s0 + $0xb8] sm:$0xff]   ;;  %v1533_v9 = vld [vmem:[%s1809_s1 + $0x68] sm:$0xff]  }
   0xc   :  { %968 = vst [vmem:[%s1810_s2 + $0x88] sm:$0xf] %v58_v44  ;;  %v103_v62 = vpack.c.bf16 0.0, %v100_v51  ;;  %v1338_v10 = vld [vmem:[%s1809_s1 + $0xb0] sm:$0xff]   ;;  %v145_v12 = vsub.f32 %v137_v58, %v141_v59  ;;  %v167_v17 = vunpack.c.l.bf16 %v1303_v54  ;;  %v171_v18 = vunpack.c.l.bf16 %v1308_v55  ;;  %v1368_v32 = vld [vmem:[%s1809_s1 + $0xb8] sm:$0xff]   ;;  %v1398_v51 = vld [vmem:[%s1809_s1 + $0xc0] sm:$0xff]  }
   0xd   :  { %971 = vst [vmem:[%s1810_s2 + $0x10] sm:$0xf] %v73_v50  ;;  %v118_v11 = vpack.c.bf16 0.0, %v115_v57  ;;  %v133_v24 = vpack.c.bf16 0.0, %v130_v63  ;;  %v160_v25 = vsub.f32 %v152_v3, %v156_v4  ;;  %v182_v26 = vunpack.c.l.bf16 %v1318_v60  ;;  %v1393_v50 = vld [vmem:[%s1808_s0 + $0xc0] sm:$0xff]   ;;  %v1408_v58 = vld [vmem:[%s1808_s0 + $0x48] sm:$0xff]  }
   0xe   :  { %974 = vst [vmem:[%s1810_s2 + $0x90] sm:$0xf] %v88_v56  ;;  %v186_v27 = vunpack.c.l.bf16 %v1323_v61  ;;  %v148_v33 = vpack.c.bf16 0.0, %v145_v12  ;;  %v175_v34 = vsub.f32 %v167_v17, %v171_v18  ;;  %v197_v38 = vunpack.c.l.bf16 %v1333_v5  ;;  %v1413_v59 = vld [vmem:[%s1809_s1 + $0x48] sm:$0xff]  }
   0xf   :  { %977 = vst [vmem:[%s1810_s2 + $0x18] sm:$0xf] %v103_v62  ;;  %v201_v39 = vunpack.c.l.bf16 %v1338_v10  ;;  %v163_v44 = vpack.c.bf16 0.0, %v160_v25  ;;  %v212_v46 = vunpack.c.l.bf16 %v1348_v19  ;;  %v216_v47 = vunpack.c.l.bf16 %v1353_v20  ;;  %v1428_v12 = vld [vmem:[%s1809_s1 + $0xc8] sm:$0xff]  }
  0x10   :  { %980 = vst [vmem:[%s1810_s2 + $0x98] sm:$0xf] %v118_v11  ;;  %v190_v45 = vsub.f32 %v182_v26, %v186_v27  ;;  %v178_v52 = vpack.c.bf16 0.0, %v175_v34  ;;  %v227_v56 = vunpack.c.l.bf16 %v1363_v31  ;;  %v231_v57 = vunpack.c.l.bf16 %v1368_v32  ;;  %v1423_v11 = vld [vmem:[%s1808_s0 + $0xc8] sm:$0xff]   ;;  %v1438_v26 = vld [vmem:[%s1808_s0 + $0x50] sm:$0xff]  }
  0x11   :  { %983 = vst [vmem:[%s1810_s2 + $0x20] sm:$0xf] %v133_v24  ;;  %v205_v53 = vsub.f32 %v197_v38, %v201_v39  ;;  %v220_v63 = vsub.f32 %v212_v46, %v216_v47  ;;  %v242_v3 = vunpack.c.l.bf16 %v1378_v40  ;;  %v246_v4 = vunpack.c.l.bf16 %v1383_v41  ;;  %v1443_v27 = vld [vmem:[%s1809_s1 + $0x50] sm:$0xff]   ;;  %v1543_v16 = vld [vmem:[%s1808_s0 + $0xe8] sm:$0xff]  }
  0x12   :  { %986 = vst [vmem:[%s1810_s2 + $0xa0] sm:$0xf] %v148_v33  ;;  %v193_v62 = vpack.c.bf16 0.0, %v190_v45  ;;  %v235_v18 = vsub.f32 %v227_v56, %v231_v57  ;;  %v257_v24 = vunpack.c.l.bf16 %v1393_v50  ;;  %v261_v25 = vunpack.c.l.bf16 %v1398_v51  ;;  %v1458_v45 = vld [vmem:[%s1809_s1 + $0xd0] sm:$0xff]   ;;  %v1468_v56 = vld [vmem:[%s1808_s0 + $0x58] sm:$0xff]  }
  0x13   :  { %989 = vst [vmem:[%s1810_s2 + $0x28] sm:$0xf] %v163_v44  ;;  %v208_v17 = vpack.c.bf16 0.0, %v205_v53  ;;  %v223_v33 = vpack.c.bf16 0.0, %v220_v63  ;;  %v250_v34 = vsub.f32 %v242_v3, %v246_v4  ;;  %v272_v38 = vunpack.c.l.bf16 %v1408_v58  ;;  %v1453_v44 = vld [vmem:[%s1808_s0 + $0xd0] sm:$0xff]   ;;  %v1473_v57 = vld [vmem:[%s1809_s1 + $0x58] sm:$0xff]  }
  0x14   :  { %992 = vst [vmem:[%s1810_s2 + $0xa8] sm:$0xf] %v178_v52  ;;  %v276_v39 = vunpack.c.l.bf16 %v1413_v59  ;;  %v238_v46 = vpack.c.bf16 0.0, %v235_v18  ;;  %v265_v47 = vsub.f32 %v257_v24, %v261_v25  ;;  %v287_v52 = vunpack.c.l.bf16 %v1423_v11  ;;  %v1488_v18 = vld [vmem:[%s1809_s1 + $0xd8] sm:$0xff]  }
  0x15   :  { %995 = vst [vmem:[%s1810_s2 + $0x30] sm:$0xf] %v193_v62  ;;  %v291_v53 = vunpack.c.l.bf16 %v1428_v12  ;;  %v253_v62 = vpack.c.bf16 0.0, %v250_v34  ;;  %v302_v3 = vunpack.c.l.bf16 %v1438_v26  ;;  %v306_v4 = vunpack.c.l.bf16 %v1443_v27 }
  0x16   :  { %998 = vst [vmem:[%s1810_s2 + $0xb0] sm:$0xf] %v208_v17  ;;  %v280_v63 = vsub.f32 %v272_v38, %v276_v39  ;;  %v1483_v17 = vld [vmem:[%s1808_s0 + $0xd8] sm:$0xff]   ;;  %v268_v24 = vpack.c.bf16 0.0, %v265_v47  ;;  %v321_v34 = vunpack.c.l.bf16 %v1458_v45  ;;  %v1498_v38 = vld [vmem:[%s1808_s0 + $0x60] sm:$0xff]   ;;  %v501_v6 = vunpack.c.h.bf16 %v1185_v6 }
  0x17   :  { %1001 = vst [vmem:[%s1810_s2 + $0x38] sm:$0xf] %v223_v33  ;;  %v295_v25 = vsub.f32 %v287_v52, %v291_v53  ;;  %v317_v33 = vunpack.c.l.bf16 %v1453_v44  ;;  %v1503_v39 = vld [vmem:[%s1809_s1 + $0x60] sm:$0xff]   ;;  %v310_v47 = vsub.f32 %v302_v3, %v306_v4  ;;  %v332_v52 = vunpack.c.l.bf16 %v1468_v56 }
  0x18   :  { %1820 = vst [vmem:[#allocation1_spill] sm:$0xff] %v1503_v39  ;;  %v336_v53 = vunpack.c.l.bf16 %v1473_v57  ;;  %v1518_v3 = vld [vmem:[%s1809_s1 + $0xe0] sm:$0xff]   ;;  %v512_v7 = vunpack.c.h.bf16 %v1190_v7  ;;  %v516_v8 = vunpack.c.h.bf16 %v1195_v8  ;;  %v527_v13 = vunpack.c.h.bf16 %v1204_v13 }
  0x19   :  { %1004 = vst [vmem:[%s1810_s2 + $0xb8] sm:$0xf] %v238_v46  ;;  %v283_v46 = vpack.c.bf16 0.0, %v280_v63  ;;  %v1513_v63 = vld [vmem:[%s1808_s0 + $0xe0] sm:$0xff]   ;;  %v325_v4 = vsub.f32 %v317_v33, %v321_v34  ;;  %v351_v33 = vunpack.c.l.bf16 %v1488_v18  ;;  %v1528_v34 = vld [vmem:[%s1808_s0 + $0x68] sm:$0xff]   ;;  %v531_v14 = vunpack.c.h.bf16 %v1209_v14 }
  0x1a   :  { %1821 = vst [vmem:[#allocation2_spill] sm:$0xff] %v1513_v63  ;;  %v542_v15 = vunpack.c.h.bf16 %v1214_v15  ;;  %v546_v21 = vunpack.c.h.bf16 %v1223_v21  ;;  %v557_v22 = vunpack.c.h.bf16 %v1228_v22  ;;  %v561_v23 = vunpack.c.h.bf16 %v1233_v23 }
  0x1b   :  { %1822 = vst [vmem:[#allocation3_spill] sm:$0xff] %v1518_v3  ;;  %v572_v28 = vunpack.c.h.bf16 %v1240_v28  ;;  %v576_v29 = vunpack.c.h.bf16 %v1245_v29  ;;  %v587_v30 = vunpack.c.h.bf16 %v1250_v30  ;;  %v591_v35 = vunpack.c.h.bf16 %v1257_v35 }
  0x1c   :  { %1007 = vst [vmem:[%s1810_s2 + $0x40] sm:$0xf] %v253_v62  ;;  %v298_v62 = vpack.c.bf16 0.0, %v295_v25  ;;  %v347_v25 = vunpack.c.l.bf16 %v1483_v17  ;;  %v602_v36 = vunpack.c.h.bf16 %v1262_v36  ;;  %v606_v37 = vunpack.c.h.bf16 %v1267_v37 }
  0x1d   :  { %1823 = vst [vmem:[#allocation4_spill] sm:$0xff] %v1528_v34  ;;  %v617_v42 = vunpack.c.h.bf16 %v1273_v42  ;;  %v621_v43 = vunpack.c.h.bf16 %v1278_v43  ;;  %v632_v48 = vunpack.c.h.bf16 %v1288_v48  ;;  %v636_v49 = vunpack.c.h.bf16 %v1293_v49 }
  0x1e   :  { %1824 = vst [vmem:[#allocation5_spill] sm:$0xff] %v1533_v9  ;;  %v647_v54 = vunpack.c.h.bf16 %v1303_v54  ;;  %v651_v55 = vunpack.c.h.bf16 %v1308_v55  ;;  %v662_v60 = vunpack.c.h.bf16 %v1318_v60  ;;  %v666_v61 = vunpack.c.h.bf16 %v1323_v61 }
  0x1f   :  { %1010 = vst [vmem:[%s1810_s2 + $0xc0] sm:$0xf] %v268_v24  ;;  %v313_v24 = vpack.c.bf16 0.0, %v310_v47  ;;  %v340_v47 = vsub.f32 %v332_v52, %v336_v53  ;;  %v362_v52 = vunpack.c.l.bf16 %v1498_v38  ;;  %v366_v53 = vunpack.c.l.bf16 %v1503_v39  ;;  %v1548_v39 = vld [vmem:[%s1809_s1 + $0xe8] sm:$0xff]  }
  0x20   :  { %1825 = vst [vmem:[#allocation6_spill] sm:$0xff] %v1543_v16  ;;  %v677_v5 = vunpack.c.h.bf16 %v1333_v5  ;;  %v681_v10 = vunpack.c.h.bf16 %v1338_v10  ;;  %v692_v19 = vunpack.c.h.bf16 %v1348_v19  ;;  %v696_v20 = vunpack.c.h.bf16 %v1353_v20 }
  0x21   :  { %1826 = vst [vmem:[#allocation7_spill] sm:$0xff] %v1548_v39  ;;  %v707_v31 = vunpack.c.h.bf16 %v1363_v31  ;;  %v711_v32 = vunpack.c.h.bf16 %v1368_v32  ;;  %v722_v40 = vunpack.c.h.bf16 %v1378_v40  ;;  %v726_v41 = vunpack.c.h.bf16 %v1383_v41 }
  0x22   :  { %1013 = vst [vmem:[%s1810_s2 + $0x48] sm:$0xf] %v283_v46  ;;  %v328_v46 = vpack.c.bf16 0.0, %v325_v4  ;;  %v355_v4 = vsub.f32 %v347_v25, %v351_v33  ;;  %v377_v25 = vunpack.c.l.bf16 %v1513_v63  ;;  %v381_v33 = vunpack.c.l.bf16 %v1518_v3  ;;  %v1558_v3 = vld [vmem:[%s1808_s0 + $0x70] sm:$0xff]  }
  0x23   :  { %1827 = vst [vmem:[#allocation8_spill] sm:$0xff] %v1558_v3  ;;  %v1563_v63 = vld [vmem:[%s1809_s1 + $0x70] sm:$0xff]   ;;  %v737_v50 = vunpack.c.h.bf16 %v1393_v50  ;;  %v741_v51 = vunpack.c.h.bf16 %v1398_v51  ;;  %v752_v58 = vunpack.c.h.bf16 %v1408_v58  ;;  %v756_v59 = vunpack.c.h.bf16 %v1413_v59 }
  0x24   :  { %1828 = vst [vmem:[#allocation9_spill] sm:$0xff] %v1563_v63  ;;  %v767_v11 = vunpack.c.h.bf16 %v1423_v11  ;;  %v771_v12 = vunpack.c.h.bf16 %v1428_v12  ;;  %v782_v26 = vunpack.c.h.bf16 %v1438_v26  ;;  %v786_v27 = vunpack.c.h.bf16 %v1443_v27 }
  0x25   :  { %1016 = vst [vmem:[%s1810_s2 + $0xc8] sm:$0xf] %v298_v62  ;;  %v343_v62 = vpack.c.bf16 0.0, %v340_v47  ;;  %v370_v47 = vsub.f32 %v362_v52, %v366_v53  ;;  %v392_v52 = vunpack.c.l.bf16 %v1528_v34  ;;  %v396_v53 = vunpack.c.l.bf16 %v1533_v9  ;;  %v1573_v9 = vld [vmem:[%s1808_s0 + $0xf0] sm:$0xff]  }
  0x26   :  { %v1578_v34 = vld [vmem:[%s1809_s1 + $0xf0] sm:$0xff]   ;;  %1019 = vst [vmem:[%s1810_s2 + $0x50] sm:$0xf] %v313_v24  ;;  %v358_v24 = vpack.c.bf16 0.0, %v355_v4  ;;  %v385_v4 = vsub.f32 %v377_v25, %v381_v33  ;;  %v407_v25 = vunpack.c.l.bf16 %v1543_v16  ;;  %v411_v33 = vunpack.c.l.bf16 %v1548_v39  ;;  %v1588_v39 = vld [vmem:[%s1808_s0 + $0x78] sm:$0xff]  }
  0x27   :  { %v1593_v16 = vld [vmem:[%s1809_s1 + $0x78] sm:$0xff]   ;;  %1022 = vst [vmem:[%s1810_s2 + $0xd0] sm:$0xf] %v328_v46  ;;  %v373_v46 = vpack.c.bf16 0.0, %v370_v47  ;;  %v400_v47 = vsub.f32 %v392_v52, %v396_v53  ;;  %v422_v52 = vunpack.c.l.bf16 %v1558_v3  ;;  %v426_v53 = vunpack.c.l.bf16 %v1563_v63 }
  0x28   :  { %v1603_v63 = vld [vmem:[%s1808_s0 + $0xf8] sm:$0xff]   ;;  %1025 = vst [vmem:[%s1810_s2 + $0x58] sm:$0xf] %v343_v62  ;;  %v388_v62 = vpack.c.bf16 0.0, %v385_v4  ;;  %v415_v4 = vsub.f32 %v407_v25, %v411_v33  ;;  %v437_v25 = vunpack.c.l.bf16 %v1573_v9  ;;  %v441_v33 = vunpack.c.l.bf16 %v1578_v34 }
  0x29   :  { %v1608_v3 = vld [vmem:[%s1809_s1 + $0xf8] sm:$0xff]   ;;  %1028 = vst [vmem:[%s1810_s2 + $0xd8] sm:$0xf] %v358_v24  ;;  %v403_v24 = vpack.c.bf16 0.0, %v400_v47  ;;  %v430_v47 = vsub.f32 %v422_v52, %v426_v53  ;;  %v452_v52 = vunpack.c.l.bf16 %v1588_v39  ;;  %v456_v53 = vunpack.c.l.bf16 %v1593_v16 }
  0x2a   :  { %1031 = vst [vmem:[%s1810_s2 + $0x60] sm:$0xf] %v373_v46  ;;  %v418_v46 = vpack.c.bf16 0.0, %v415_v4  ;;  %v445_v4 = vsub.f32 %v437_v25, %v441_v33  ;;  %v467_v25 = vunpack.c.l.bf16 %v1603_v63  ;;  %v471_v33 = vunpack.c.l.bf16 %v1608_v3 }
  0x2b   :  { %1034 = vst [vmem:[%s1810_s2 + $0xe0] sm:$0xf] %v388_v62  ;;  %v433_v62 = vpack.c.bf16 0.0, %v430_v47  ;;  %v460_v47 = vsub.f32 %v452_v52, %v456_v53  ;;  %v490_v52 = vsub.f32 %v1830_v0, %v1829_v1  ;;  %v535_v1 = vsub.f32 %v527_v13, %v531_v14 }
  0x2c   :  { %1037 = vst [vmem:[%s1810_s2 + $0x68] sm:$0xf] %v403_v24  ;;  %v448_v24 = vpack.c.bf16 0.0, %v445_v4  ;;  %v475_v53 = vsub.f32 %v467_v25, %v471_v33  ;;  %v505_v33 = vsub.f32 %v497_v2, %v501_v6  ;;  %v565_v2 = vsub.f32 %v557_v22, %v561_v23 }
  0x2d   :  { %1040 = vst [vmem:[%s1810_s2 + $0xe8] sm:$0xf] %v418_v46  ;;  %v463_v46 = vpack.c.bf16 0.0, %v460_v47  ;;  %v493_v4 = vpack.c.bf16 0.0, %v490_v52  ;;  %v550_v52 = vsub.f32 %v542_v15, %v546_v21  ;;  %v640_v14 = vsub.f32 %v632_v48, %v636_v49 }
  0x2e   :  { %1043 = vst [vmem:[%s1810_s2 + $0x70] sm:$0xf] %v433_v62  ;;  %v478_v25 = vpack.c.bf16 0.0, %v475_v53  ;;  %v520_v62 = vsub.f32 %v512_v7, %v516_v8  ;;  %v508_v47 = vpack.c.bf16 0.0, %v505_v33  ;;  %v580_v53 = vsub.f32 %v572_v28, %v576_v29 }
  0x2f   :  { %1046 = vst [vmem:[%s1810_s2 + $0xf0] sm:$0xf] %v448_v24  ;;  %v538_v24 = vpack.c.bf16 0.0, %v535_v1  ;;  %v553_v6 = vpack.c.bf16 0.0, %v550_v52  ;;  %v568_v7 = vpack.c.bf16 0.0, %v565_v2  ;;  %v610_v8 = vsub.f32 %v602_v36, %v606_v37 }
  0x30   :  { %1049 = vst [vmem:[%s1810_s2 + $0x78] sm:$0xf] %v463_v46  ;;  %v523_v0 = vpack.c.bf16 0.0, %v520_v62  ;;  %v583_v46 = vpack.c.bf16 0.0, %v580_v53  ;;  %v655_v15 = vsub.f32 %v647_v54, %v651_v55  ;;  %v670_v21 = vsub.f32 %v662_v60, %v666_v61  ;;  %v1832_v54 = vld [vmem:[#allocation2_spill] sm:$0xff]  ;;  %v1833_v60 = vld [vmem:[#allocation3_spill] sm:$0xff] }
  0x31   :  { %1052 = vst [vmem:[%s1810_s2 + $0xf8] sm:$0xf] %v478_v25  ;;  %v625_v25 = vsub.f32 %v617_v42, %v621_v43  ;;  %v613_v33 = vpack.c.bf16 0.0, %v610_v8  ;;  %v643_v22 = vpack.c.bf16 0.0, %v640_v14  ;;  %v685_v1 = vsub.f32 %v677_v5, %v681_v10  ;;  %v1836_v10 = vld [vmem:[#allocation6_spill] sm:$0xff] }
  0x32   :  { %1055 = vst [vmem:[%s1810_s2 + $0x4] sm:$0xf] %v493_v4  ;;  %v595_v4 = vsub.f32 %v587_v30, %v591_v35  ;;  %v658_v23 = vpack.c.bf16 0.0, %v655_v15  ;;  %v700_v28 = vsub.f32 %v692_v19, %v696_v20  ;;  %v730_v2 = vsub.f32 %v722_v40, %v726_v41  ;;  %v1837_v20 = vld [vmem:[#allocation7_spill] sm:$0xff]  ;;  %v1839_v40 = vld [vmem:[#allocation9_spill] sm:$0xff] }
  0x33   :  { %1058 = vst [vmem:[%s1810_s2 + $0x84] sm:$0xf] %v508_v47  ;;  %v628_v62 = vpack.c.bf16 0.0, %v625_v25  ;;  %v673_v47 = vpack.c.bf16 0.0, %v670_v21  ;;  %v688_v29 = vpack.c.bf16 0.0, %v685_v1  ;;  %v745_v30 = vsub.f32 %v737_v50, %v741_v51 }
  0x34   :  { %1061 = vst [vmem:[%s1810_s2 + $0xc] sm:$0xf] %v523_v0  ;;  %v598_v13 = vpack.c.bf16 0.0, %v595_v4  ;;  %v715_v0 = vsub.f32 %v707_v31, %v711_v32  ;;  %v703_v52 = vpack.c.bf16 0.0, %v700_v28  ;;  %v760_v53 = vsub.f32 %v752_v58, %v756_v59  ;;  %v1831_v4 = vld [vmem:[#allocation1_spill] sm:$0xff] }
  0x35   :  { %1064 = vst [vmem:[%s1810_s2 + $0x8c] sm:$0xf] %v538_v24  ;;  %v733_v35 = vpack.c.bf16 0.0, %v730_v2  ;;  %v748_v36 = vpack.c.bf16 0.0, %v745_v30  ;;  %v797_v44 = vunpack.c.h.bf16 %v1453_v44  ;;  %v801_v45 = vunpack.c.h.bf16 %v1458_v45 }
  0x36   :  { %1067 = vst [vmem:[%s1810_s2 + $0x14] sm:$0xf] %v553_v6  ;;  %v718_v24 = vpack.c.bf16 0.0, %v715_v0  ;;  %v763_v6 = vpack.c.bf16 0.0, %v760_v53  ;;  %v812_v56 = vunpack.c.h.bf16 %v1468_v56  ;;  %v790_v37 = vsub.f32 %v782_v26, %v786_v27 }
  0x37   :  { %1070 = vst [vmem:[%s1810_s2 + $0x94] sm:$0xf] %v568_v7  ;;  %v775_v7 = vsub.f32 %v767_v11, %v771_v12  ;;  %v816_v57 = vunpack.c.h.bf16 %v1473_v57  ;;  %v827_v17 = vunpack.c.h.bf16 %v1483_v17  ;;  %v831_v18 = vunpack.c.h.bf16 %v1488_v18 }
  0x38   :  { %1073 = vst [vmem:[%s1810_s2 + $0x1c] sm:$0xf] %v583_v46  ;;  %v805_v46 = vsub.f32 %v797_v44, %v801_v45  ;;  %v842_v38 = vunpack.c.h.bf16 %v1498_v38  ;;  %v846_v43 = vunpack.c.h.bf16 %v1831_v4  ;;  %v793_v48 = vpack.c.bf16 0.0, %v790_v37 }
  0x39   :  { %1076 = vst [vmem:[%s1810_s2 + $0x9c] sm:$0xf] %v598_v13  ;;  %v778_v42 = vpack.c.bf16 0.0, %v775_v7  ;;  %v820_v8 = vsub.f32 %v812_v56, %v816_v57  ;;  %v835_v49 = vsub.f32 %v827_v17, %v831_v18  ;;  %v857_v55 = vunpack.c.h.bf16 %v1832_v54 }
  0x3a   :  { %1079 = vst [vmem:[%s1810_s2 + $0x24] sm:$0xf] %v613_v33  ;;  %v808_v13 = vpack.c.bf16 0.0, %v805_v46  ;;  %v850_v25 = vsub.f32 %v842_v38, %v846_v43  ;;  %v861_v61 = vunpack.c.h.bf16 %v1833_v60  ;;  %v1834_v33 = vld [vmem:[#allocation4_spill] sm:$0xff]  ;;  %v887_v19 = vunpack.c.h.bf16 %v1836_v10 }
  0x3b   :  { %1082 = vst [vmem:[%s1810_s2 + $0xa4] sm:$0xf] %v628_v62  ;;  %v872_v14 = vunpack.c.h.bf16 %v1834_v33  ;;  %v823_v15 = vpack.c.bf16 0.0, %v820_v8  ;;  %v838_v5 = vpack.c.bf16 0.0, %v835_v49  ;;  %v1835_v62 = vld [vmem:[#allocation5_spill] sm:$0xff]  ;;  %v891_v31 = vunpack.c.h.bf16 %v1837_v20 }
  0x3c   :  { %1085 = vst [vmem:[%s1810_s2 + $0x2c] sm:$0xf] %v643_v22  ;;  %v876_v21 = vunpack.c.h.bf16 %v1835_v62  ;;  %v853_v22 = vpack.c.bf16 0.0, %v850_v25  ;;  %v906_v28 = vunpack.c.h.bf16 %v1839_v40  ;;  %v917_v9 = vunpack.c.h.bf16 %v1573_v9 }
  0x3d   :  { %1088 = vst [vmem:[%s1810_s2 + $0xac] sm:$0xf] %v658_v23  ;;  %v865_v23 = vsub.f32 %v857_v55, %v861_v61  ;;  %v921_v34 = vunpack.c.h.bf16 %v1578_v34  ;;  %v895_v50 = vsub.f32 %v887_v19, %v891_v31  ;;  %v932_v39 = vunpack.c.h.bf16 %v1588_v39 }
  0x3e   :  { %1091 = vst [vmem:[%s1810_s2 + $0x34] sm:$0xf] %v673_v47  ;;  %v1838_v47 = vld [vmem:[#allocation8_spill] sm:$0xff]  ;;  %v880_v32 = vsub.f32 %v872_v14, %v876_v21  ;;  %v936_v16 = vunpack.c.h.bf16 %v1593_v16  ;;  %v947_v63 = vunpack.c.h.bf16 %v1603_v63  ;;  %v951_v3 = vunpack.c.h.bf16 %v1608_v3 }
  0x3f   :  { %1094 = vst [vmem:[%s1810_s2 + $0xb4] sm:$0xf] %v688_v29  ;;  %v902_v1 = vunpack.c.h.bf16 %v1838_v47  ;;  %v868_v41 = vpack.c.bf16 0.0, %v865_v23  ;;  %v925_v0 = vsub.f32 %v917_v9, %v921_v34  ;;  %v898_v58 = vpack.c.bf16 0.0, %v895_v50 }
  0x40   :  { %1097 = vst [vmem:[%s1810_s2 + $0x3c] sm:$0xf] %v703_v52  ;;  %v883_v51 = vpack.c.bf16 0.0, %v880_v32  ;;  %v940_v59 = vsub.f32 %v932_v39, %v936_v16  ;;  %v955_v11 = vsub.f32 %v947_v63, %v951_v3 }
  0x41   :  { %1100 = vst [vmem:[%s1810_s2 + $0xbc] sm:$0xf] %v718_v24  ;;  %v910_v29 = vsub.f32 %v902_v1, %v906_v28  ;;  %v928_v2 = vpack.c.bf16 0.0, %v925_v0 }
  0x42   :  { %1103 = vst [vmem:[%s1810_s2 + $0x44] sm:$0xf] %v733_v35  ;;  %v943_v30 = vpack.c.bf16 0.0, %v940_v59  ;;  %v958_v24 = vpack.c.bf16 0.0, %v955_v11 }
  0x43   :  { %1106 = vst [vmem:[%s1810_s2 + $0xc4] sm:$0xf] %v748_v36  ;;  %v913_v52 = vpack.c.bf16 0.0, %v910_v29 }
  0x44   :  { %1109 = vst [vmem:[%s1810_s2 + $0x4c] sm:$0xf] %v763_v6 }
  0x45   :  { %1112 = vst [vmem:[%s1810_s2 + $0xcc] sm:$0xf] %v778_v42 }
  0x46   :  { %1115 = vst [vmem:[%s1810_s2 + $0x54] sm:$0xf] %v793_v48 }
  0x47   :  { %1118 = vst [vmem:[%s1810_s2 + $0xd4] sm:$0xf] %v808_v13 }
  0x48   :  { %1121 = vst [vmem:[%s1810_s2 + $0x5c] sm:$0xf] %v823_v15 }
  0x49   :  { %1124 = vst [vmem:[%s1810_s2 + $0xdc] sm:$0xf] %v838_v5 }
  0x4a   :  { %1127 = vst [vmem:[%s1810_s2 + $0x64] sm:$0xf] %v853_v22 }
  0x4b   :  { %1130 = vst [vmem:[%s1810_s2 + $0xe4] sm:$0xf] %v868_v41 }
  0x4c   :  { %1133 = vst [vmem:[%s1810_s2 + $0x6c] sm:$0xf] %v883_v51 }
  0x4d   :  { %1136 = vst [vmem:[%s1810_s2 + $0xec] sm:$0xf] %v898_v58 }
  0x4e   :  { %1139 = vst [vmem:[%s1810_s2 + $0x74] sm:$0xf] %v913_v52 }
  0x4f   :  { %1142 = vst [vmem:[%s1810_s2 + $0xf4] sm:$0xf] %v928_v2 }
  0x50   :  { %1145 = vst [vmem:[%s1810_s2 + $0x7c] sm:$0xf] %v943_v30 }
  0x51   :  { %1148 = vst [vmem:[%s1810_s2 + $0xfc] sm:$0xf] %v958_v24 }

// kernel: net_forward.20
= control target key start
LH: loop header
LB: loop body
LE: loop exit
PB: predicated region body
PF: predicated region fallthrough
CT: control target
= control target key end

     0   :  { %v666_v12 = vmov 0   ;;  %vm353_vm0 = vcmask 523264   ;;  %s850_s1 = inlined_call_operand.vmem [shape: bf16[576,128], index: 1, kind: input, shape index: {}]   ;;  %s851_s2 = inlined_call_operand.vmem [shape: f32[16,1], index: 2, kind: input, shape index: {}]   ;;  %s852_s0 = inlined_call_operand.vmem [shape: bf16[16,576], index: 0, kind: input, shape index: {}]   ;;  %s853_s4 = inlined_call_operand.<no memory space> [shape: f32[1], index: 4, kind: input, shape index: {}]   ;;  %s854_s3 = inlined_call_operand.vmem [shape: bf16[16,128], index: 3, kind: input, shape index: {}]   ;;  %s855_s5 = inlined_call_operand.vmem [shape: bf16[16,128], index: 5, kind: output, shape index: {}]  }
   0x1   :  { %v626_v0 = vld [vmem:[%s850_s1 + $0x38] sm:$0xff]  ;;  %v625_v4 = vld [vmem:[%s850_s1 + $0x30] sm:$0xff]  ;;  %v624_v8 = vld [vmem:[%s850_s1 + $0x28] sm:$0xff]  ;;  %665 = vset.pattern.permute.xlu0 %v666_v12 }
   0x2   :  { %v642_v1 = vld [vmem:[%s850_s1 + $0xb8] sm:$0xff]  ;;  %357 = vmatpush.bf16.msra.mxu0 %v626_v0  ;;  %v641_v5 = vld [vmem:[%s850_s1 + $0xb0] sm:$0xff]  ;;  %v640_v9 = vld [vmem:[%s850_s1 + $0xa8] sm:$0xff] }
   0x3   :  { %v650_v2 = vld [vmem:[%s850_s1 + $0xf8] sm:$0xff]  ;;  %385 = vmatpush.bf16.msra.mxu2 %v642_v1  ;;  %v649_v6 = vld [vmem:[%s850_s1 + $0xf0] sm:$0xff]  ;;  %v648_v10 = vld [vmem:[%s850_s1 + $0xe8] sm:$0xff] }
   0x4   :  { %v634_v3 = vld [vmem:[%s850_s1 + $0x78] sm:$0xff]  ;;  %399 = vmatpush.bf16.msra.mxu3 %v650_v2  ;;  %v633_v7 = vld [vmem:[%s850_s1 + $0x70] sm:$0xff]  ;;  %v632_v11 = vld [vmem:[%s850_s1 + $0x68] sm:$0xff] }
   0x5   :  { %371 = vmatpush.bf16.msra.mxu1 %v634_v3  ;;  %v623_v13 = vld [vmem:[%s850_s1 + $0x20] sm:$0xff]  ;;  %v622_v17 = vld [vmem:[%s850_s1 + $0x18] sm:$0xff]  ;;  %v621_v22 = vld [vmem:[%s850_s1 + $0x10] sm:$0xff] }
   0x6   :  { %358 = vmatpush.bf16.msra.mxu0 %v625_v4  ;;  %v639_v14 = vld [vmem:[%s850_s1 + $0xa0] sm:$0xff]  ;;  %v638_v18 = vld [vmem:[%s850_s1 + $0x98] sm:$0xff]  ;;  %v637_v23 = vld [vmem:[%s850_s1 + $0x90] sm:$0xff] }
   0x7   :  { %386 = vmatpush.bf16.msra.mxu2 %v641_v5  ;;  %v647_v15 = vld [vmem:[%s850_s1 + $0xe0] sm:$0xff]  ;;  %v646_v20 = vld [vmem:[%s850_s1 + $0xd8] sm:$0xff]  ;;  %v645_v24 = vld [vmem:[%s850_s1 + $0xd0] sm:$0xff] }
   0x8   :  { %400 = vmatpush.bf16.msra.mxu3 %v649_v6  ;;  %v631_v16 = vld [vmem:[%s850_s1 + $0x60] sm:$0xff]  ;;  %v630_v21 = vld [vmem:[%s850_s1 + $0x58] sm:$0xff]  ;;  %v629_v25 = vld [vmem:[%s850_s1 + $0x50] sm:$0xff] }
   0x9   :  { %372 = vmatpush.bf16.msra.mxu1 %v633_v7  ;;  %v100_v19 = vld [vmem:[%s851_s2] sm:$0xff]  ;;  %v101_v26 = vld [vmem:[%s851_s2 + $0x8] sm:$0xff]  ;;  %v616_v36 = vld [vmem:[%s852_s0 + $0x10] sm:$0xf0] }
   0xa   :  { %359 = vmatpush.bf16.msra.mxu0 %v624_v8  ;;  %104 = vperm.xlu0 %665, %v100_v19   ;;  %v620_v27 = vld [vmem:[%s850_s1 + $0x8] sm:$0xff]  ;;  %v619_v31 = vld [vmem:[%s850_s1] sm:$0xff]  ;;  %v617_v38 = vld [vmem:[%s852_s0 + $0x18] sm:$0xf0]  ;;  %v430_v8 = vstv %s853_s4 }
   0xb   :  { %387 = vmatpush.bf16.msra.mxu2 %v640_v9  ;;  %v636_v28 = vld [vmem:[%s850_s1 + $0x88] sm:$0xff]  ;;  %v635_v32 = vld [vmem:[%s850_s1 + $0x80] sm:$0xff]  ;;  %v453_v42 = vld [vmem:[%s852_s0 + $0x14] sm:$0xf0] }
   0xc   :  { %401 = vmatpush.bf16.msra.mxu3 %v648_v10  ;;  %v644_v29 = vld [vmem:[%s850_s1 + $0xc8] sm:$0xff]  ;;  %v643_v33 = vld [vmem:[%s850_s1 + $0xc0] sm:$0xff]  ;;  %v654_v43 = vld [vmem:[%s850_s1 + $0x118] sm:$0xff] }
   0xd   :  { %373 = vmatpush.bf16.msra.mxu1 %v632_v11  ;;  %v628_v30 = vld [vmem:[%s850_s1 + $0x48] sm:$0xff]  ;;  %v627_v34 = vld [vmem:[%s850_s1 + $0x40] sm:$0xff]  ;;  %v653_v48 = vld [vmem:[%s850_s1 + $0x110] sm:$0xff] }
   0xe   :  { %360 = vmatpush.bf16.msra.mxu0 %v623_v13  ;;  %v451_v35 = vld [vmem:[%s852_s0] sm:$0xf]  ;;  %v459_v37 = vld [vmem:[%s852_s0 + $0x8] sm:$0xf]  ;;  %v615_v39 = vld [vmem:[%s852_s0 + $0xc] sm:$0xf] }
   0xf   :  { %388 = vmatpush.bf16.msra.mxu2 %v639_v14  ;;  %v461_v40 = vld [vmem:[%s852_s0 + $0x1c] sm:$0xf0]  ;;  %v614_v41 = vld [vmem:[%s852_s0 + $0x4] sm:$0xf]  ;;  %v452_v44 = vor.u32 %v616_v36, %v451_v35  ;;  %v460_v45 = vor.u32 %v617_v38, %v459_v37  ;;  %v652_v49 = vld [vmem:[%s850_s1 + $0x108] sm:$0xff] }
  0x10   :  { %402 = vmatpush.bf16.msra.mxu3 %v647_v15  ;;  %v464_v46 = vor.u32 %v615_v39, %v461_v40  ;;  %v456_v47 = vor.u32 %v614_v41, %v453_v42  ;;  %v651_v50 = vld [vmem:[%s850_s1 + $0x100] sm:$0xff]  ;;  %v467_v51 = vld [vmem:[%s852_s0 + $0x10] sm:$0xf] }
  0x11   :  { %374 = vmatpush.bf16.msra.mxu1 %v631_v16  ;;  %v618_v52 = vld [vmem:[%s852_s0 + $0x20] sm:$0xf0] }
  0x12   :  { %361 = vmatpush.bf16.msra.mxu0 %v622_v17  ;;  %109 = vperm.xlu0 %665, %v101_v26   ;;  %v468_v53 = vor.u32 %v618_v52, %v467_v51  ;;  %v656_v12 = vld [vmem:[%s854_s3] sm:$0xff]  }
  0x13   :  { %389 = vmatpush.bf16.msra.mxu2 %v638_v18  ;;  %v657_v15 = vunpack.c.l.bf16 %v656_v12  ;;  %v658_v16 = vunpack.c.h.bf16 %v656_v12 }
  0x14   :  { %403 = vmatpush.bf16.msra.mxu3 %v646_v20 }
  0x15   :  { %375 = vmatpush.bf16.msra.mxu1 %v630_v21 }
  0x16   :  { %362 = vmatpush.bf16.msra.mxu0 %v621_v22 }
  0x17   :  { %390 = vmatpush.bf16.msra.mxu2 %v637_v23 }
  0x18   :  { %404 = vmatpush.bf16.msra.mxu3 %v645_v24 }
  0x19   :  { %376 = vmatpush.bf16.msra.mxu1 %v629_v25 }
  0x1a   :  { %363 = vmatpush.bf16.msra.mxu0 %v620_v27 }
  0x1b   :  { %391 = vmatpush.bf16.msra.mxu2 %v636_v28 }
  0x1c   :  { %405 = vmatpush.bf16.msra.mxu3 %v644_v29 }
  0x1d   :  { %377 = vmatpush.bf16.msra.mxu1 %v628_v30 }
  0x1e   :  { %364 = vmatpush.bf16.msra.mxu0 %v619_v31 }
  0x1f   :  { %392 = vmatpush.bf16.msra.mxu2 %v635_v32 }
  0x20   :  { %406 = vmatpush.bf16.msra.mxu3 %v643_v33 }
  0x21   :  { %378 = vmatpush.bf16.msra.mxu1 %v627_v34  ;;  %365 = vmatmul.bf16.vlgmr.msra.gmra.mxu0 %v452_v44 }
  0x22   :  { %417 = vmatpush.bf16.msrb.mxu0 %v654_v43  ;;  %393 = vmatmul.bf16.vlgmr.msra.gmra.mxu2 %v460_v45 }
  0x23   :  { %407 = vmatmul.bf16.vlgmr.msra.gmra.mxu3 %v464_v46 }
  0x24   :  { %379 = vmatmul.bf16.vlgmr.msra.gmra.mxu1 %v456_v47 }
  0x26   :  { %418 = vmatpush.bf16.msrb.mxu0 %v653_v48 }
  0x2a   :  { %419 = vmatpush.bf16.msrb.mxu0 %v652_v49 }
  0x2e   :  { %420 = vmatpush.bf16.msrb.mxu0 %v651_v50 }
  0x31   :  { %613 = vmatmul.msk.bf16.vlgmr.msrb.gmra.mxu0 %vm353_vm0, %v468_v53 }
  0x7c   :  { %v105_v54 = vpop.permute.xlu0 %104 }
  0x84   :  { %v110_v60 = vpop.permute.xlu0 %109 }
  0x9e   :  { %v366_v55 = vpop.f32.mrf.mxu0 }
  0x9f   :  { %v367_v58 = vadd.f32 %v366_v55, %v105_v54 }
  0xa1   :  { %v380_v56 = vpop.f32.mrf.mxu1 }
  0xa2   :  { %v381_v61 = vadd.f32 %v380_v56, %v367_v58 }
  0xa5   :  { %v394_v57 = vpop.f32.mrf.mxu2 }
  0xa6   :  { %v368_v59 = vpop.f32.mrf.mxu0  ;;  %v408_v62 = vpop.f32.mrf.mxu3  ;;  %v395_v63 = vadd.f32 %v394_v57, %v381_v61 }
  0xa7   :  { %v369_v0 = vadd.f32 %v368_v59, %v110_v60 }
  0xa8   :  { %v409_v4 = vadd.f32 %v408_v62, %v395_v63 }
  0xa9   :  { %v382_v1 = vpop.f32.mrf.mxu1 }
  0xaa   :  { %v383_v5 = vadd.f32 %v382_v1, %v369_v0 }
  0xad   :  { %v396_v2 = vpop.f32.mrf.mxu2 }
  0xae   :  { %v422_v3 = vpop.f32.mrf.mxu0  ;;  %v397_v6 = vadd.f32 %v396_v2, %v383_v5  ;;  %v410_v9 = vpop.f32.mrf.mxu3 }
  0xaf   :  { %v423_v7 = vadd.f32 %v422_v3, %v409_v4 }
  0xb0   :  { %v411_v10 = vadd.f32 %v410_v9, %v397_v6 }
  0xb1   :  { %v431_v11 = vmul.f32 %v430_v8, %v423_v7  ;;  %vm428_vm1 = vcmp.gt.f32.partialorder %v423_v7, 0.0 }
  0xb3   :  { %v433_v17 = vsel %vm428_vm1, %v423_v7, %v431_v11 }
  0xb4   :  { %v439_v20 = vadd.f32 %v657_v15, %v433_v17 }
  0xb6   :  { %v424_v13 = vpop.f32.mrf.mxu0 }
  0xb7   :  { %v425_v14 = vadd.f32 %v424_v13, %v411_v10 }
  0xb9   :  { %vm429_vm2 = vcmp.gt.f32.partialorder %v425_v14, 0.0  ;;  %v432_v18 = vmul.f32 %v430_v8, %v425_v14 }
  0xbb   :  { %v434_v19 = vsel %vm429_vm2, %v425_v14, %v432_v18 }
  0xbc   :  { %v440_v21 = vadd.f32 %v658_v16, %v434_v19 }
  0xbe   :  { %v662_v22 = vpack.c.bf16 %v440_v21, %v439_v20 }
  0xc0   :  { %663 = vst [vmem:[%s855_s5] sm:$0xff] %v662_v22  }

// kernel: net_forward.22
= control target key start
LH: loop header
LB: loop body
LE: loop exit
PB: predicated region body
PF: predicated region fallthrough
CT: control target
= control target key end

     0   :  { %v666_v12 = vmov 0   ;;  %vm353_vm0 = vcmask 523264   ;;  %s850_s1 = inlined_call_operand.vmem [shape: bf16[576,128], index: 1, kind: input, shape index: {}]   ;;  %s851_s2 = inlined_call_operand.vmem [shape: f32[16,1], index: 2, kind: input, shape index: {}]   ;;  %s852_s0 = inlined_call_operand.vmem [shape: bf16[16,576], index: 0, kind: input, shape index: {}]   ;;  %s853_s4 = inlined_call_operand.<no memory space> [shape: f32[1], index: 4, kind: input, shape index: {}]   ;;  %s854_s3 = inlined_call_operand.vmem [shape: bf16[16,128], index: 3, kind: input, shape index: {}]   ;;  %s855_s5 = inlined_call_operand.vmem [shape: bf16[16,128], index: 5, kind: output, shape index: {}]  }
   0x1   :  { %v626_v0 = vld [vmem:[%s850_s1 + $0x38] sm:$0xff]  ;;  %v625_v4 = vld [vmem:[%s850_s1 + $0x30] sm:$0xff]  ;;  %v624_v8 = vld [vmem:[%s850_s1 + $0x28] sm:$0xff]  ;;  %665 = vset.pattern.permute.xlu0 %v666_v12 }
   0x2   :  { %v642_v1 = vld [vmem:[%s850_s1 + $0xb8] sm:$0xff]  ;;  %357 = vmatpush.bf16.msra.mxu0 %v626_v0  ;;  %v641_v5 = vld [vmem:[%s850_s1 + $0xb0] sm:$0xff]  ;;  %v640_v9 = vld [vmem:[%s850_s1 + $0xa8] sm:$0xff] }
   0x3   :  { %v650_v2 = vld [vmem:[%s850_s1 + $0xf8] sm:$0xff]  ;;  %385 = vmatpush.bf16.msra.mxu2 %v642_v1  ;;  %v649_v6 = vld [vmem:[%s850_s1 + $0xf0] sm:$0xff]  ;;  %v648_v10 = vld [vmem:[%s850_s1 + $0xe8] sm:$0xff] }
   0x4   :  { %v634_v3 = vld [vmem:[%s850_s1 + $0x78] sm:$0xff]  ;;  %399 = vmatpush.bf16.msra.mxu3 %v650_v2  ;;  %v633_v7 = vld [vmem:[%s850_s1 + $0x70] sm:$0xff]  ;;  %v632_v11 = vld [vmem:[%s850_s1 + $0x68] sm:$0xff] }
   0x5   :  { %371 = vmatpush.bf16.msra.mxu1 %v634_v3  ;;  %v623_v13 = vld [vmem:[%s850_s1 + $0x20] sm:$0xff]  ;;  %v622_v17 = vld [vmem:[%s850_s1 + $0x18] sm:$0xff]  ;;  %v621_v22 = vld [vmem:[%s850_s1 + $0x10] sm:$0xff] }
   0x6   :  { %358 = vmatpush.bf16.msra.mxu0 %v625_v4  ;;  %v639_v14 = vld [vmem:[%s850_s1 + $0xa0] sm:$0xff]  ;;  %v638_v18 = vld [vmem:[%s850_s1 + $0x98] sm:$0xff]  ;;  %v637_v23 = vld [vmem:[%s850_s1 + $0x90] sm:$0xff] }
   0x7   :  { %386 = vmatpush.bf16.msra.mxu2 %v641_v5  ;;  %v647_v15 = vld [vmem:[%s850_s1 + $0xe0] sm:$0xff]  ;;  %v646_v20 = vld [vmem:[%s850_s1 + $0xd8] sm:$0xff]  ;;  %v645_v24 = vld [vmem:[%s850_s1 + $0xd0] sm:$0xff] }
   0x8   :  { %400 = vmatpush.bf16.msra.mxu3 %v649_v6  ;;  %v631_v16 = vld [vmem:[%s850_s1 + $0x60] sm:$0xff]  ;;  %v630_v21 = vld [vmem:[%s850_s1 + $0x58] sm:$0xff]  ;;  %v629_v25 = vld [vmem:[%s850_s1 + $0x50] sm:$0xff] }
   0x9   :  { %372 = vmatpush.bf16.msra.mxu1 %v633_v7  ;;  %v100_v19 = vld [vmem:[%s851_s2] sm:$0xff]  ;;  %v101_v26 = vld [vmem:[%s851_s2 + $0x8] sm:$0xff]  ;;  %v616_v36 = vld [vmem:[%s852_s0 + $0x10] sm:$0xf0] }
   0xa   :  { %359 = vmatpush.bf16.msra.mxu0 %v624_v8  ;;  %104 = vperm.xlu0 %665, %v100_v19   ;;  %v620_v27 = vld [vmem:[%s850_s1 + $0x8] sm:$0xff]  ;;  %v619_v31 = vld [vmem:[%s850_s1] sm:$0xff]  ;;  %v617_v38 = vld [vmem:[%s852_s0 + $0x18] sm:$0xf0]  ;;  %v430_v8 = vstv %s853_s4 }
   0xb   :  { %387 = vmatpush.bf16.msra.mxu2 %v640_v9  ;;  %v636_v28 = vld [vmem:[%s850_s1 + $0x88] sm:$0xff]  ;;  %v635_v32 = vld [vmem:[%s850_s1 + $0x80] sm:$0xff]  ;;  %v453_v42 = vld [vmem:[%s852_s0 + $0x14] sm:$0xf0] }
   0xc   :  { %401 = vmatpush.bf16.msra.mxu3 %v648_v10  ;;  %v644_v29 = vld [vmem:[%s850_s1 + $0xc8] sm:$0xff]  ;;  %v643_v33 = vld [vmem:[%s850_s1 + $0xc0] sm:$0xff]  ;;  %v654_v43 = vld [vmem:[%s850_s1 + $0x118] sm:$0xff] }
   0xd   :  { %373 = vmatpush.bf16.msra.mxu1 %v632_v11  ;;  %v628_v30 = vld [vmem:[%s850_s1 + $0x48] sm:$0xff]  ;;  %v627_v34 = vld [vmem:[%s850_s1 + $0x40] sm:$0xff]  ;;  %v653_v48 = vld [vmem:[%s850_s1 + $0x110] sm:$0xff] }
   0xe   :  { %360 = vmatpush.bf16.msra.mxu0 %v623_v13  ;;  %v451_v35 = vld [vmem:[%s852_s0] sm:$0xf]  ;;  %v459_v37 = vld [vmem:[%s852_s0 + $0x8] sm:$0xf]  ;;  %v615_v39 = vld [vmem:[%s852_s0 + $0xc] sm:$0xf] }
   0xf   :  { %388 = vmatpush.bf16.msra.mxu2 %v639_v14  ;;  %v461_v40 = vld [vmem:[%s852_s0 + $0x1c] sm:$0xf0]  ;;  %v614_v41 = vld [vmem:[%s852_s0 + $0x4] sm:$0xf]  ;;  %v452_v44 = vor.u32 %v616_v36, %v451_v35  ;;  %v460_v45 = vor.u32 %v617_v38, %v459_v37  ;;  %v652_v49 = vld [vmem:[%s850_s1 + $0x108] sm:$0xff] }
  0x10   :  { %402 = vmatpush.bf16.msra.mxu3 %v647_v15  ;;  %v464_v46 = vor.u32 %v615_v39, %v461_v40  ;;  %v456_v47 = vor.u32 %v614_v41, %v453_v42  ;;  %v651_v50 = vld [vmem:[%s850_s1 + $0x100] sm:$0xff]  ;;  %v467_v51 = vld [vmem:[%s852_s0 + $0x10] sm:$0xf] }
  0x11   :  { %374 = vmatpush.bf16.msra.mxu1 %v631_v16  ;;  %v618_v52 = vld [vmem:[%s852_s0 + $0x20] sm:$0xf0] }
  0x12   :  { %361 = vmatpush.bf16.msra.mxu0 %v622_v17  ;;  %109 = vperm.xlu0 %665, %v101_v26   ;;  %v468_v53 = vor.u32 %v618_v52, %v467_v51  ;;  %v656_v12 = vld [vmem:[%s854_s3] sm:$0xff]  }
  0x13   :  { %389 = vmatpush.bf16.msra.mxu2 %v638_v18  ;;  %v657_v15 = vunpack.c.l.bf16 %v656_v12  ;;  %v658_v16 = vunpack.c.h.bf16 %v656_v12 }
  0x14   :  { %403 = vmatpush.bf16.msra.mxu3 %v646_v20 }
  0x15   :  { %375 = vmatpush.bf16.msra.mxu1 %v630_v21 }
  0x16   :  { %362 = vmatpush.bf16.msra.mxu0 %v621_v22 }
  0x17   :  { %390 = vmatpush.bf16.msra.mxu2 %v637_v23 }
  0x18   :  { %404 = vmatpush.bf16.msra.mxu3 %v645_v24 }
  0x19   :  { %376 = vmatpush.bf16.msra.mxu1 %v629_v25 }
  0x1a   :  { %363 = vmatpush.bf16.msra.mxu0 %v620_v27 }
  0x1b   :  { %391 = vmatpush.bf16.msra.mxu2 %v636_v28 }
  0x1c   :  { %405 = vmatpush.bf16.msra.mxu3 %v644_v29 }
  0x1d   :  { %377 = vmatpush.bf16.msra.mxu1 %v628_v30 }
  0x1e   :  { %364 = vmatpush.bf16.msra.mxu0 %v619_v31 }
  0x1f   :  { %392 = vmatpush.bf16.msra.mxu2 %v635_v32 }
  0x20   :  { %406 = vmatpush.bf16.msra.mxu3 %v643_v33 }
  0x21   :  { %378 = vmatpush.bf16.msra.mxu1 %v627_v34  ;;  %365 = vmatmul.bf16.vlgmr.msra.gmra.mxu0 %v452_v44 }
  0x22   :  { %417 = vmatpush.bf16.msrb.mxu0 %v654_v43  ;;  %393 = vmatmul.bf16.vlgmr.msra.gmra.mxu2 %v460_v45 }
  0x23   :  { %407 = vmatmul.bf16.vlgmr.msra.gmra.mxu3 %v464_v46 }
  0x24   :  { %379 = vmatmul.bf16.vlgmr.msra.gmra.mxu1 %v456_v47 }
  0x26   :  { %418 = vmatpush.bf16.msrb.mxu0 %v653_v48 }
  0x2a   :  { %419 = vmatpush.bf16.msrb.mxu0 %v652_v49 }
  0x2e   :  { %420 = vmatpush.bf16.msrb.mxu0 %v651_v50 }
  0x31   :  { %613 = vmatmul.msk.bf16.vlgmr.msrb.gmra.mxu0 %vm353_vm0, %v468_v53 }
  0x7c   :  { %v105_v54 = vpop.permute.xlu0 %104 }
  0x84   :  { %v110_v60 = vpop.permute.xlu0 %109 }
  0x9e   :  { %v366_v55 = vpop.f32.mrf.mxu0 }
  0x9f   :  { %v367_v58 = vadd.f32 %v366_v55, %v105_v54 }
  0xa1   :  { %v380_v56 = vpop.f32.mrf.mxu1 }
  0xa2   :  { %v381_v61 = vadd.f32 %v380_v56, %v367_v58 }
  0xa5   :  { %v394_v57 = vpop.f32.mrf.mxu2 }
  0xa6   :  { %v368_v59 = vpop.f32.mrf.mxu0  ;;  %v408_v62 = vpop.f32.mrf.mxu3  ;;  %v395_v63 = vadd.f32 %v394_v57, %v381_v61 }
  0xa7   :  { %v369_v0 = vadd.f32 %v368_v59, %v110_v60 }
  0xa8   :  { %v409_v4 = vadd.f32 %v408_v62, %v395_v63 }
  0xa9   :  { %v382_v1 = vpop.f32.mrf.mxu1 }
  0xaa   :  { %v383_v5 = vadd.f32 %v382_v1, %v369_v0 }
  0xad   :  { %v396_v2 = vpop.f32.mrf.mxu2 }
  0xae   :  { %v422_v3 = vpop.f32.mrf.mxu0  ;;  %v397_v6 = vadd.f32 %v396_v2, %v383_v5  ;;  %v410_v9 = vpop.f32.mrf.mxu3 }
  0xaf   :  { %v423_v7 = vadd.f32 %v422_v3, %v409_v4 }
  0xb0   :  { %v411_v10 = vadd.f32 %v410_v9, %v397_v6 }
  0xb1   :  { %v431_v11 = vmul.f32 %v430_v8, %v423_v7  ;;  %vm428_vm1 = vcmp.gt.f32.partialorder %v423_v7, 0.0 }
  0xb3   :  { %v433_v17 = vsel %vm428_vm1, %v423_v7, %v431_v11 }
  0xb4   :  { %v439_v20 = vsub.f32 %v433_v17, %v657_v15 }
  0xb6   :  { %v424_v13 = vpop.f32.mrf.mxu0 }
  0xb7   :  { %v425_v14 = vadd.f32 %v424_v13, %v411_v10 }
  0xb9   :  { %vm429_vm2 = vcmp.gt.f32.partialorder %v425_v14, 0.0  ;;  %v432_v18 = vmul.f32 %v430_v8, %v425_v14 }
  0xbb   :  { %v434_v19 = vsel %vm429_vm2, %v425_v14, %v432_v18 }
  0xbc   :  { %v440_v21 = vsub.f32 %v434_v19, %v658_v16 }
  0xbe   :  { %v662_v22 = vpack.c.bf16 %v440_v21, %v439_v20 }
  0xc0   :  { %663 = vst [vmem:[%s855_s5] sm:$0xff] %v662_v22  }

// kernel: net_forward.23
= control target key start
LH: loop header
LB: loop body
LE: loop exit
PB: predicated region body
PF: predicated region fallthrough
CT: control target
= control target key end

     0   :  { %vm186_vm0 = vcmask 130048   ;;  %v471_v6 = vmov 0   ;;  %s645_s1 = inlined_call_operand.vmem [shape: bf16[144,128], index: 1, kind: input, shape index: {}]   ;;  %s646_s0 = inlined_call_operand.vmem [shape: bf16[64,144], index: 0, kind: input, shape index: {}]   ;;  %s647_s2 = inlined_call_operand.vmem [shape: f32[64,1], index: 2, kind: input, shape index: {}]   ;;  %s648_s4 = inlined_call_operand.<no memory space> [shape: f32[1], index: 4, kind: input, shape index: {}]   ;;  %s649_s3 = inlined_call_operand.vmem [shape: bf16[64,128], index: 3, kind: input, shape index: {}]   ;;  %s650_s5 = inlined_call_operand.vmem [shape: bf16[64,128], index: 5, kind: output, shape index: {}]  }
   0x1   :  { %v414_v0 = vld [vmem:[%s645_s1 + $0x38] sm:$0xff]  ;;  %v415_v1 = vld [vmem:[%s645_s1 + $0x40] sm:$0xff]  ;;  %v401_v2 = vld [vmem:[%s646_s0 + $0x14] sm:$0xf]  ;;  %469 = vset.pattern.permute.xlu1 %v471_v6  ;;  %468 = vset.pattern.permute.xlu0 %v471_v6  ;;  %v610_v51 = vstv %s648_s4 }
   0x2   :  { %v339_v3 = vld [vmem:[%s646_s0 + $0x18] sm:$0xf0]  ;;  %199 = vmatpush.bf16.msra.mxu0 %v414_v0  ;;  %458 = vmatpush.bf16.msra.mxu2 %v414_v0  ;;  %v413_v4 = vld [vmem:[%s645_s1 + $0x30] sm:$0xff]  ;;  %v412_v7 = vld [vmem:[%s645_s1 + $0x28] sm:$0xff] }
   0x3   :  { %466 = vmatpush.bf16.msra.mxu3 %v415_v1  ;;  %v342_v5 = vor.u32 %v401_v2, %v339_v3  ;;  %235 = vmatpush.bf16.msra.mxu1 %v415_v1  ;;  %v399_v8 = vld [vmem:[%s646_s0 + $0x4] sm:$0xf]  ;;  %v331_v9 = vld [vmem:[%s646_s0 + $0x8] sm:$0xf0]  ;;  %v50_v10 = vld [vmem:[%s647_s2 + $0x10] sm:$0xff] }
   0x4   :  { %470 = vset.pattern.permute.xlu2 %v471_v6  ;;  %v48_v11 = vld [vmem:[%s647_s2] sm:$0xff]  ;;  %v334_v12 = vor.u32 %v399_v8, %v331_v9  ;;  %68 = vperm.xlu1 %469, %v50_v10   ;;  %v410_v14 = vld [vmem:[%s645_s1 + $0x18] sm:$0xff]  ;;  %v347_v16 = vld [vmem:[%s646_s0 + $0x28] sm:$0xf0] }
   0x5   :  { %58 = vperm.xlu0 %468, %v48_v11   ;;  %v411_v13 = vld [vmem:[%s645_s1 + $0x20] sm:$0xff]  ;;  %v51_v17 = vld [vmem:[%s647_s2 + $0x18] sm:$0xff]  ;;  %v49_v18 = vld [vmem:[%s647_s2 + $0x8] sm:$0xff] }
   0x6   :  { %200 = vmatpush.bf16.msra.mxu0 %v413_v4  ;;  %459 = vmatpush.bf16.msra.mxu2 %v413_v4  ;;  %v403_v15 = vld [vmem:[%s646_s0 + $0x24] sm:$0xf]  ;;  %v409_v19 = vld [vmem:[%s645_s1 + $0x10] sm:$0xff]  ;;  %v408_v22 = vld [vmem:[%s645_s1 + $0x8] sm:$0xff] }
   0x7   :  { %396 = vmatmul.msk.bf16.vlgmr.msra.gmra.mxu3 %vm186_vm0, %v342_v5  ;;  %395 = vmatmul.msk.bf16.vlgmr.msra.gmra.mxu1 %vm186_vm0, %v334_v12  ;;  %v52_v20 = vld [vmem:[%s647_s2 + $0x20] sm:$0xff]  ;;  %v350_v21 = vor.u32 %v403_v15, %v347_v16  ;;  %v55_v23 = vld [vmem:[%s647_s2 + $0x38] sm:$0xff]  ;;  %v54_v24 = vld [vmem:[%s647_s2 + $0x30] sm:$0xff] }
   0x8   :  { %78 = vperm.xlu2 %470, %v52_v20   ;;  %v407_v25 = vld [vmem:[%s645_s1] sm:$0xff]  ;;  %v53_v27 = vld [vmem:[%s647_s2 + $0x28] sm:$0xff]  ;;  %v405_v33 = vld [vmem:[%s646_s0 + $0x34] sm:$0xf] }
   0x9   :  { %v329_v26 = vld [vmem:[%s646_s0] sm:$0xf]  ;;  %v400_v28 = vld [vmem:[%s646_s0 + $0x4] sm:$0xf0]  ;;  %v355_v34 = vld [vmem:[%s646_s0 + $0x38] sm:$0xf0] }
   0xa   :  { %201 = vmatpush.bf16.msra.mxu0 %v412_v7  ;;  %460 = vmatpush.bf16.msra.mxu2 %v412_v7  ;;  %v345_v29 = vld [vmem:[%s646_s0 + $0x20] sm:$0xf]  ;;  %v404_v30 = vld [vmem:[%s646_s0 + $0x24] sm:$0xf0]  ;;  %v330_v31 = vor.u32 %v400_v28, %v329_v26  ;;  %v358_v35 = vor.u32 %v405_v33, %v355_v34  ;;  %v337_v36 = vld [vmem:[%s646_s0 + $0x10] sm:$0xf] }
   0xb   :  { %v346_v32 = vor.u32 %v404_v30, %v345_v29  ;;  %v402_v37 = vld [vmem:[%s646_s0 + $0x14] sm:$0xf0]  ;;  %v353_v38 = vld [vmem:[%s646_s0 + $0x30] sm:$0xf]  ;;  %v417_v58 = vld [vmem:[%s649_s3] sm:$0xff]  }
   0xc   :  { %73 = vperm.xlu1 %469, %v51_v17   ;;  %v406_v39 = vld [vmem:[%s646_s0 + $0x34] sm:$0xf0]  ;;  %v338_v40 = vor.u32 %v402_v37, %v337_v36  ;;  %v418_v63 = vunpack.c.l.bf16 %v417_v58  ;;  %v419_v1 = vunpack.c.h.bf16 %v417_v58  ;;  %v453_v7 = vld [vmem:[%s649_s3 + $0x10] sm:$0xff]  }
   0xd   :  { %63 = vperm.xlu0 %468, %v49_v18   ;;  %v354_v41 = vor.u32 %v406_v39, %v353_v38  ;;  %v426_v15 = vunpack.c.l.bf16 %v453_v7  ;;  %v427_v17 = vunpack.c.h.bf16 %v453_v7 }
   0xe   :  { %202 = vmatpush.bf16.msra.mxu0 %v411_v13  ;;  %461 = vmatpush.bf16.msra.mxu2 %v411_v13 }
  0x10   :  { %83 = vperm.xlu2 %470, %v53_v27  }
  0x12   :  { %203 = vmatpush.bf16.msra.mxu0 %v410_v14  ;;  %462 = vmatpush.bf16.msra.mxu2 %v410_v14 }
  0x14   :  { %93 = vperm.xlu1 %469, %v55_v23  }
  0x15   :  { %88 = vperm.xlu0 %468, %v54_v24  }
  0x16   :  { %204 = vmatpush.bf16.msra.mxu0 %v409_v19  ;;  %463 = vmatpush.bf16.msra.mxu2 %v409_v19 }
  0x17   :  { %397 = vmatmul.msk.bf16.gmra.mxu3 %vm186_vm0, %v350_v21 }
  0x1a   :  { %205 = vmatpush.bf16.msra.mxu0 %v408_v22  ;;  %464 = vmatpush.bf16.msra.mxu2 %v408_v22 }
  0x1e   :  { %206 = vmatpush.bf16.msra.mxu0 %v407_v25  ;;  %465 = vmatpush.bf16.msra.mxu2 %v407_v25 }
  0x21   :  { %207 = vmatmul.bf16.vlgmr.msra.gmra.mxu0 %v330_v31  ;;  %217 = vmatmul.bf16.vlgmr.msra.gmra.mxu2 %v346_v32  ;;  %v452_v32 = vld [vmem:[%s649_s3 + $0x8] sm:$0xff]  }
  0x22   :  { %v422_v36 = vunpack.c.l.bf16 %v452_v32  ;;  %v423_v37 = vunpack.c.h.bf16 %v452_v32 }
  0x27   :  { %398 = vmatmul.msk.bf16.gmra.mxu3 %vm186_vm0, %v358_v35 }
  0x31   :  { %212 = vmatmul.bf16.gmra.mxu0 %v338_v40  ;;  %222 = vmatmul.bf16.gmra.mxu2 %v354_v41 }
  0x62   :  { %v79_v49 = vpop.permute.xlu2 %78 }
  0x6a   :  { %v84_v2 = vpop.permute.xlu2 %83 }
  0x76   :  { %v69_v60 = vpop.permute.xlu1 %68 }
  0x77   :  { %v59_v44 = vpop.permute.xlu0 %58 }
  0x7e   :  { %v74_v20 = vpop.permute.xlu1 %73 }
  0x7f   :  { %v64_v53 = vpop.permute.xlu0 %63 }
  0x84   :  { %v237_v45 = vpop.f32.mrf.mxu1 }
  0x86   :  { %v94_v40 = vpop.permute.xlu1 %93 }
  0x87   :  { %v89_v21 = vpop.permute.xlu0 %88 }
  0x8a   :  { %v242_v42 = vpop.f32.mrf.mxu3 }
  0x8c   :  { %v239_v56 = vpop.f32.mrf.mxu1 }
  0x92   :  { %v605_v43 = vpop.f32.mrf.mxu3 }
  0x9a   :  { %v247_v48 = vpop.f32.mrf.mxu3 }
  0x9e   :  { %v208_v46 = vpop.f32.mrf.mxu0 }
  0x9f   :  { %v209_v47 = vadd.f32 %v208_v46, %v59_v44  ;;  %v454_v44 = vld [vmem:[%s649_s3 + $0x18] sm:$0xff]  }
  0xa1   :  { %v238_v50 = vadd.f32 %v237_v45, %v209_v47 }
  0xa2   :  { %v249_v0 = vpop.f32.mrf.mxu3 }
  0xa3   :  { %v267_v57 = vmul.f32 %v610_v51, %v238_v50  ;;  %vm258_vm1 = vcmp.gt.f32.partialorder %v238_v50, 0.0 }
  0xa4   :  { %v218_v52 = vpop.f32.mrf.mxu2 }
  0xa5   :  { %v219_v54 = vadd.f32 %v218_v52, %v79_v49  ;;  %v275_v3 = vsel %vm258_vm1, %v238_v50, %v267_v57  ;;  %v430_v50 = vunpack.c.l.bf16 %v454_v44 }
  0xa6   :  { %v210_v55 = vpop.f32.mrf.mxu0  ;;  %v299_v10 = vadd.f32 %v418_v63, %v275_v3 }
  0xa7   :  { %v211_v59 = vadd.f32 %v210_v55, %v64_v53  ;;  %v248_v61 = vadd.f32 %v247_v48, %v219_v54  ;;  %v431_v53 = vunpack.c.h.bf16 %v454_v44 }
  0xa9   :  { %v240_v62 = vadd.f32 %v239_v56, %v211_v59  ;;  %v271_v6 = vmul.f32 %v610_v51, %v248_v61  ;;  %vm262_vm3 = vcmp.gt.f32.partialorder %v248_v61, 0.0 }
  0xaa   :  { %v252_v26 = vpop.f32.mrf.mxu3 }
  0xab   :  { %vm259_vm2 = vcmp.gt.f32.partialorder %v240_v62, 0.0  ;;  %v268_v4 = vmul.f32 %v610_v51, %v240_v62  ;;  %v279_v18 = vsel %vm262_vm3, %v248_v61, %v271_v6 }
  0xac   :  { %v220_v5 = vpop.f32.mrf.mxu2  ;;  %v303_v24 = vadd.f32 %v426_v15, %v279_v18 }
  0xad   :  { %v276_v8 = vsel %vm259_vm2, %v240_v62, %v268_v4  ;;  %v221_v9 = vadd.f32 %v220_v5, %v84_v2 }
  0xae   :  { %v300_v11 = vadd.f32 %v419_v1, %v276_v8  ;;  %v213_v12 = vpop.f32.mrf.mxu0 }
  0xaf   :  { %v250_v13 = vadd.f32 %v249_v0, %v221_v9  ;;  %v214_v14 = vadd.f32 %v213_v12, %v69_v60 }
  0xb0   :  { %v435_v16 = vpack.c.bf16 %v300_v11, %v299_v10 }
  0xb1   :  { %vm263_vm4 = vcmp.gt.f32.partialorder %v250_v13, 0.0  ;;  %v272_v19 = vmul.f32 %v610_v51, %v250_v13  ;;  %v243_v23 = vadd.f32 %v242_v42, %v214_v14 }
  0xb2   :  { %436 = vst [vmem:[%s650_s5] sm:$0xff] %v435_v16  }
  0xb3   :  { %v280_v22 = vsel %vm263_vm4, %v250_v13, %v272_v19  ;;  %v269_v31 = vmul.f32 %v610_v51, %v243_v23  ;;  %vm260_vm5 = vcmp.gt.f32.partialorder %v243_v23, 0.0 }
  0xb4   :  { %v304_v25 = vadd.f32 %v427_v17, %v280_v22  ;;  %v223_v27 = vpop.f32.mrf.mxu2 }
  0xb5   :  { %v224_v28 = vadd.f32 %v223_v27, %v89_v21  ;;  %v277_v38 = vsel %vm260_vm5, %v243_v23, %v269_v31 }
  0xb6   :  { %v445_v29 = vpack.c.bf16 %v304_v25, %v303_v24  ;;  %v215_v30 = vpop.f32.mrf.mxu0  ;;  %v301_v47 = vadd.f32 %v422_v36, %v277_v38 }
  0xb7   :  { %v216_v33 = vadd.f32 %v215_v30, %v74_v20  ;;  %v253_v34 = vadd.f32 %v252_v26, %v224_v28 }
  0xb8   :  { %456 = vst [vmem:[%s650_s5 + $0x10] sm:$0xff] %v445_v29  }
  0xb9   :  { %v245_v35 = vadd.f32 %v605_v43, %v216_v33  ;;  %v273_v42 = vmul.f32 %v610_v51, %v253_v34  ;;  %vm264_vm7 = vcmp.gt.f32.partialorder %v253_v34, 0.0  ;;  %v254_v43 = vpop.f32.mrf.mxu3 }
  0xbb   :  { %vm261_vm6 = vcmp.gt.f32.partialorder %v245_v35, 0.0  ;;  %v270_v39 = vmul.f32 %v610_v51, %v245_v35  ;;  %v281_v54 = vsel %vm264_vm7, %v253_v34, %v273_v42 }
  0xbc   :  { %v225_v41 = vpop.f32.mrf.mxu2  ;;  %v305_v57 = vadd.f32 %v430_v50, %v281_v54 }
  0xbd   :  { %v278_v45 = vsel %vm261_vm6, %v245_v35, %v270_v39  ;;  %v226_v46 = vadd.f32 %v225_v41, %v94_v40 }
  0xbe   :  { %v302_v48 = vadd.f32 %v423_v37, %v278_v45 }
  0xbf   :  { %v255_v49 = vadd.f32 %v254_v43, %v226_v46 }
  0xc0   :  { %v440_v52 = vpack.c.bf16 %v302_v48, %v301_v47 }
  0xc1   :  { %vm265_vm8 = vcmp.gt.f32.partialorder %v255_v49, 0.0  ;;  %v274_v55 = vmul.f32 %v610_v51, %v255_v49 }
  0xc2   :  { %455 = vst [vmem:[%s650_s5 + $0x8] sm:$0xff] %v440_v52  }
  0xc3   :  { %v282_v56 = vsel %vm265_vm8, %v255_v49, %v274_v55 }
  0xc4   :  { %v306_v58 = vadd.f32 %v431_v53, %v282_v56 }
  0xc6   :  { %v450_v59 = vpack.c.bf16 %v306_v58, %v305_v57 }
  0xc8   :  { %457 = vst [vmem:[%s650_s5 + $0x18] sm:$0xff] %v450_v59  }

// kernel: net_forward.31
= control target key start
LH: loop header
LB: loop body
LE: loop exit
PB: predicated region body
PF: predicated region fallthrough
CT: control target
= control target key end

     0   :  { %s870_s0 = inlined_call_operand.vmem [shape: bf16[64,16], index: 0, kind: input, shape index: {}]   ;;  %s871_s1 = inlined_call_operand.vmem [shape: bf16[16,512], index: 1, kind: input, shape index: {}]   ;;  %s872_s2 = inlined_call_operand.vmem [shape: f32[64,1], index: 2, kind: input, shape index: {}]   ;;  %s873_s3 = inlined_call_operand.<no memory space> [shape: f32[1], index: 3, kind: input, shape index: {}]   ;;  %s874_s4 = inlined_call_operand.vmem [shape: bf16[64,512], index: 4, kind: output, shape index: {}]  }
   0x1   :  { %9 = sst [smem:[#allocation2]] %s873_s3 }
   0x2   :  { %s726_s17 = smov 0   ;;  %s728_s18 = smov 0  }
   0x3   :  { %s730_s19 = smov 0  }
   0x4 LB: > { %s588_s3 = sadd.s32 4294967295, %s695_s19   ;;  %s743_s20 = sadd.s32 1, %s695_s19   ;;  %s695_s19 = sphi %s730_s19, %s878_s19   ;;  %s691_s18 = sphi %s728_s18, %s877_s18   ;;  %s687_s17 = sphi %s726_s17, %s876_s17  }
   0x5   : > { %s40_s21 = ssub.s32 %s695_s19, %s743_s20  ;;  %s43_s22 = sadd.s32 1, %s691_s18 }
   0x6   : > { %p41_p0 = scmp.eq.s32.totalorder %s40_s21, 0  ;;  %p50_p1 = scmp.ne.s32.totalorder %s691_s18, %s687_s17 }
   0x7   : > { %p51_p2 = scmp.eq.s32.totalorder %s695_s19, 0  ;;  %p122_p3 = scmp.eq.s32.totalorder %s588_s3, 1 }
   0x8   : > { %s754_s23 = scalar_select %p41_p0, %s691_s18, %s43_s22  }
   0x9   : > { %p52_p4 = por %p51_p2, %p50_p1  ;;  %p756_p5 = por %p122_p3, %p50_p1 }
   0xa   : > { %p591_p6 = scmp.ge.s32.totalorder %s695_s19, 2 }
   0xc   : > { %153 = sbr.rel (%p591_p6) target bundleno = 23 (0x17), region = 28 }
  0x11   : > { %156 = sbr.rel (!%p52_p4) target bundleno = 23 (0x17), region = 32  ;;  %s158_s25 = sand.u32 (%p52_p4), 1, %s691_s18  }
  0x12   : > { %s635_s26 = sshll.u32 (%p52_p4), %s695_s19, 3  ;;  %s592_s27 = sshll.u32 (%p52_p4), %s158_s25, 4 }
  0x13   : > { %s163_s30 = scalar_lea.vmem (%p52_p4), %s871_s1, %s635_s26  ;;  %s160_s5 = scalar_lea.vmem (%p52_p4), [#allocation3], %s592_s27 }
  0x14   : > { %v194_v0 = vld [vmem:[%s163_s30] sm:$0xff] (%p52_p4)  ;;  %v196_v1 = vld [vmem:[%s163_s30 + $0x10] sm:$0xff] (%p52_p4) }
  0x15   : > { %195 = vst [vmem:[%s160_s5] sm:$0xff] (%p52_p4), %v194_v0 }
  0x16   : > { %197 = vst [vmem:[%s160_s5 + $0x8] sm:$0xff] %v196_v1 }
  0x17 PF: > { %p595_p7 = scmp.ge.s32.totalorder %s695_s19, 1  ;;  %p202_p8 = scmp.lt.s32.totalorder %s695_s19, 3 }
  0x19   : > { %p203_p9 = pnand %p595_p7, %p202_p8 }
  0x1a   : > { %s209_s6 = sand.u32 (!%p203_p9), 1, %s687_s17   ;;  %s395_s14 = sld [smem:[#allocation2]] (!%p203_p9) }
  0x1b   : > { %206 = sbr.rel (%p203_p9) target bundleno = 213 (0xd5), region = 70  ;;  %s596_s9 = sshll.u32 (!%p203_p9), %s209_s6, 4 }
  0x1c   : > { %s211_s12 = scalar_lea.vmem (!%p203_p9), [#allocation3], %s596_s9  ;;  %s597_s15 = sshll.u32 (!%p203_p9), %s209_s6, 6 }
  0x1d   : > { %s821_s16 = scalar_lea.vmem (!%p203_p9), [#allocation4], %s597_s15 }
  0x20   : > { %v248_v2 = vld [vmem:[%s872_s2 + $0x10] sm:$0xff]  ;;  %v697_v3 = vmov 0   ;;  %v246_v4 = vld [vmem:[%s872_s2] sm:$0xff]  ;;  %v641_v6 = vld [vmem:[%s211_s12 + $0x4] sm:$0xf0]  ;;  %vm324_vm0 = vcmask 130048   ;;  %v815_v23 = vstv %s395_s14 }
  0x21   : > { %671 = vset.pattern.permute.xlu1 %v697_v3  ;;  %670 = vset.pattern.permute.xlu0 %v697_v3  ;;  %v616_v5 = vld [vmem:[%s211_s12] sm:$0xf]  ;;  %v640_v7 = vld [vmem:[%s211_s12 + $0x4] sm:$0xf]  ;;  %v618_v9 = vld [vmem:[%s211_s12 + $0x8] sm:$0xf0] }
  0x22   : > { %266 = vperm.xlu1 %671, %v248_v2   ;;  %256 = vperm.xlu0 %670, %v246_v4   ;;  %v617_v8 = vor.u32 %v641_v6, %v616_v5  ;;  %v250_v10 = vld [vmem:[%s872_s2 + $0x20] sm:$0xff]  ;;  %v621_v11 = vor.u32 %v640_v7, %v618_v9  ;;  %v638_v13 = vld [vmem:[%s870_s0 + $0x10] sm:$0xff]  ;;  %v249_v14 = vld [vmem:[%s872_s2 + $0x18] sm:$0xff]  ;;  %s642_s17 = sshll.u32 (%p756_p5), %s588_s3, 3 }
  0x23   : > { %672 = vset.pattern.permute.xlu2 %v697_v3  ;;  %v636_v12 = vld [vmem:[%s870_s0] sm:$0xff]  ;;  %v247_v15 = vld [vmem:[%s872_s2 + $0x8] sm:$0xff]  ;;  %v253_v17 = vld [vmem:[%s872_s2 + $0x38] sm:$0xff]  ;;  %s470_s22 = scalar_lea.vmem (%p756_p5), %s874_s4, %s642_s17 }
  0x24   : > { %276 = vperm.xlu2 %672, %v250_v10   ;;  %344 = vmatpush.bf16.msra.mxu0 %v617_v8  ;;  %v251_v16 = vld [vmem:[%s872_s2 + $0x28] sm:$0xff]  ;;  %v252_v18 = vld [vmem:[%s872_s2 + $0x30] sm:$0xff]  ;;  %v639_v20 = vld [vmem:[%s870_s0 + $0x18] sm:$0xff] }
  0x25   : > { %643 = vmatpush.bf16.msra.mxu2 %v617_v8  ;;  %373 = vmatpush.bf16.msra.mxu1 %v621_v11  ;;  %v637_v19 = vld [vmem:[%s870_s0 + $0x8] sm:$0xff] }
  0x26   : > { %644 = vmatpush.bf16.msra.mxu3 %v621_v11 }
  0x27   : > { %622 = vmatmul.msk.bf16.vlgmr.msra.gmra.mxu0 %vm324_vm0, %v636_v12 }
  0x28   : > { %624 = vmatmul.msk.bf16.vlgmr.msra.gmra.mxu2 %vm324_vm0, %v638_v13  ;;  %626 = vmatmul.msk.bf16.vlgmr.msra.gmra.mxu1 %vm324_vm0, %v636_v12 }
  0x29   : > { %628 = vmatmul.msk.bf16.vlgmr.msra.gmra.mxu3 %vm324_vm0, %v638_v13 }
  0x2a   : > { %271 = vperm.xlu1 %671, %v249_v14   ;;  %261 = vperm.xlu0 %670, %v247_v15  }
  0x2c   : > { %281 = vperm.xlu2 %672, %v251_v16  }
  0x32   : > { %291 = vperm.xlu1 %671, %v253_v17   ;;  %286 = vperm.xlu0 %670, %v252_v18  }
  0x37   : > { %623 = vmatmul.msk.bf16.gmra.mxu0 %vm324_vm0, %v637_v19 }
  0x38   : > { %625 = vmatmul.msk.bf16.gmra.mxu2 %vm324_vm0, %v639_v20  ;;  %627 = vmatmul.msk.bf16.gmra.mxu1 %vm324_vm0, %v637_v19 }
  0x39   : > { %629 = vmatmul.msk.bf16.gmra.mxu3 %vm324_vm0, %v639_v20 }
  0x7e   : > { %v277_v27 = vpop.permute.xlu2 %276 }
  0x86   : > { %v282_v49 = vpop.permute.xlu2 %281 }
  0x94   : > { %v257_v21 = vpop.permute.xlu0 %256  ;;  %v267_v42 = vpop.permute.xlu1 %266 }
  0x9c   : > { %v262_v36 = vpop.permute.xlu0 %261  ;;  %v272_v2 = vpop.permute.xlu1 %271 }
  0xa4   : > { %v346_v22 = vpop.f32.mrf.mxu0  ;;  %v287_v7 = vpop.permute.xlu0 %286 }
  0xa5   : > { %v347_v24 = vadd.f32 %v346_v22, %v257_v21  ;;  %v375_v25 = vpop.f32.mrf.mxu1 }
  0xa6   : > { %v376_v26 = vadd.f32 %v375_v25, %v257_v21 }
  0xa7   : > { %vm396_vm1 = vcmp.gt.f32.partialorder %v347_v24, 0.0  ;;  %v413_v28 = vmul.f32 %v815_v23, %v347_v24 }
  0xa8   : > { %vm397_vm2 = vcmp.gt.f32.partialorder %v376_v26, 0.0  ;;  %v414_v29 = vmul.f32 %v815_v23, %v376_v26 }
  0xa9   : > { %v429_v30 = vsel %vm396_vm1, %v347_v24, %v413_v28 }
  0xaa   : > { %v430_v31 = vsel %vm397_vm2, %v376_v26, %v414_v29 }
  0xab   : > { %v356_v32 = vpop.f32.mrf.mxu2  ;;  %v445_v33 = vpack.c.bf16 %v430_v31, %v429_v30 }
  0xac   : > { %v357_v34 = vadd.f32 %v356_v32, %v277_v27  ;;  %v385_v35 = vpop.f32.mrf.mxu3  ;;  %v348_v38 = vpop.f32.mrf.mxu0 }
  0xad   : > { %v386_v37 = vadd.f32 %v385_v35, %v277_v27  ;;  %453 = vst [vmem:[%s821_s16] sm:$0xff] %v445_v33  ;;  %v349_v40 = vadd.f32 %v348_v38, %v262_v36  ;;  %v377_v41 = vpop.f32.mrf.mxu1  ;;  %v292_v27 = vpop.permute.xlu1 %291 }
  0xae   : > { %vm404_vm3 = vcmp.gt.f32.partialorder %v357_v34, 0.0  ;;  %v421_v39 = vmul.f32 %v815_v23, %v357_v34  ;;  %v378_v44 = vadd.f32 %v377_v41, %v262_v36 }
  0xaf   : > { %vm405_vm4 = vcmp.gt.f32.partialorder %v386_v37, 0.0  ;;  %v422_v43 = vmul.f32 %v815_v23, %v386_v37  ;;  %vm398_vm5 = vcmp.gt.f32.partialorder %v349_v40, 0.0  ;;  %v415_v46 = vmul.f32 %v815_v23, %v349_v40 }
  0xb0   : > { %v437_v45 = vsel %vm404_vm3, %v357_v34, %v421_v39  ;;  %vm399_vm6 = vcmp.gt.f32.partialorder %v378_v44, 0.0  ;;  %v416_v48 = vmul.f32 %v815_v23, %v378_v44 }
  0xb1   : > { %v438_v47 = vsel %vm405_vm4, %v386_v37, %v422_v43  ;;  %v431_v51 = vsel %vm398_vm5, %v349_v40, %v415_v46 }
  0xb2   : > { %v449_v50 = vpack.c.bf16 %v438_v47, %v437_v45  ;;  %v432_v52 = vsel %vm399_vm6, %v378_v44, %v416_v48 }
  0xb3   : > { %v358_v53 = vpop.f32.mrf.mxu2  ;;  %v446_v54 = vpack.c.bf16 %v432_v52, %v431_v51 }
  0xb4   : > { %457 = vst [vmem:[%s821_s16 + $0x20] sm:$0xff] %v449_v50  ;;  %v359_v55 = vadd.f32 %v358_v53, %v282_v49  ;;  %v387_v56 = vpop.f32.mrf.mxu3  ;;  %v351_v58 = vpop.f32.mrf.mxu0  ;;  %v513_v39 = vld [vmem:[%s821_s16] sm:$0xff] (%p756_p5) }
  0xb5   : > { %v388_v57 = vadd.f32 %v387_v56, %v282_v49  ;;  %454 = vst [vmem:[%s821_s16 + $0x8] sm:$0xff] %v446_v54  ;;  %v352_v60 = vadd.f32 %v351_v58, %v267_v42  ;;  %v380_v61 = vpop.f32.mrf.mxu1 }
  0xb6   : > { %vm406_vm7 = vcmp.gt.f32.partialorder %v359_v55, 0.0  ;;  %v423_v59 = vmul.f32 %v815_v23, %v359_v55  ;;  %v381_v63 = vadd.f32 %v380_v61, %v267_v42  ;;  %514 = vst [vmem:[%s470_s22] sm:$0xff] (%p756_p5), %v513_v39 }
  0xb7   : > { %vm407_vm8 = vcmp.gt.f32.partialorder %v388_v57, 0.0  ;;  %v424_v62 = vmul.f32 %v815_v23, %v388_v57  ;;  %vm400_vm9 = vcmp.gt.f32.partialorder %v352_v60, 0.0  ;;  %v417_v1 = vmul.f32 %v815_v23, %v352_v60 }
  0xb8   : > { %v439_v0 = vsel %vm406_vm7, %v359_v55, %v423_v59  ;;  %vm401_vm10 = vcmp.gt.f32.partialorder %v381_v63, 0.0  ;;  %v418_v4 = vmul.f32 %v815_v23, %v381_v63 }
  0xb9   : > { %v440_v3 = vsel %vm407_vm8, %v388_v57, %v424_v62  ;;  %v433_v6 = vsel %vm400_vm9, %v352_v60, %v417_v1 }
  0xba   : > { %v450_v5 = vpack.c.bf16 %v440_v3, %v439_v0  ;;  %v434_v8 = vsel %vm401_vm10, %v381_v63, %v418_v4 }
  0xbb   : > { %v361_v9 = vpop.f32.mrf.mxu2  ;;  %v447_v10 = vpack.c.bf16 %v434_v8, %v433_v6  ;;  %v521_v42 = vld [vmem:[%s821_s16 + $0x20] sm:$0xff] (%p756_p5) }
  0xbc   : > { %458 = vst [vmem:[%s821_s16 + $0x28] sm:$0xff] %v450_v5  ;;  %v362_v11 = vadd.f32 %v361_v9, %v287_v7  ;;  %v390_v12 = vpop.f32.mrf.mxu3  ;;  %v353_v14 = vpop.f32.mrf.mxu0 }
  0xbd   : > { %v391_v13 = vadd.f32 %v390_v12, %v287_v7  ;;  %455 = vst [vmem:[%s821_s16 + $0x10] sm:$0xff] %v447_v10  ;;  %v354_v16 = vadd.f32 %v353_v14, %v272_v2  ;;  %v382_v17 = vpop.f32.mrf.mxu1 }
  0xbe   : > { %vm408_vm11 = vcmp.gt.f32.partialorder %v362_v11, 0.0  ;;  %v425_v15 = vmul.f32 %v815_v23, %v362_v11  ;;  %v383_v19 = vadd.f32 %v382_v17, %v272_v2  ;;  %522 = vst [vmem:[%s470_s22 + $0x40] sm:$0xff] (%p756_p5), %v521_v42 }
  0xbf   : > { %vm409_vm12 = vcmp.gt.f32.partialorder %v391_v13, 0.0  ;;  %v426_v18 = vmul.f32 %v815_v23, %v391_v13  ;;  %vm402_vm13 = vcmp.gt.f32.partialorder %v354_v16, 0.0  ;;  %v419_v21 = vmul.f32 %v815_v23, %v354_v16 }
  0xc0   : > { %v441_v20 = vsel %vm408_vm11, %v362_v11, %v425_v15  ;;  %vm403_vm14 = vcmp.gt.f32.partialorder %v383_v19, 0.0  ;;  %v420_v24 = vmul.f32 %v815_v23, %v383_v19 }
  0xc1   : > { %v442_v22 = vsel %vm409_vm12, %v391_v13, %v426_v18  ;;  %v435_v26 = vsel %vm402_vm13, %v354_v16, %v419_v21 }
  0xc2   : > { %v451_v25 = vpack.c.bf16 %v442_v22, %v441_v20  ;;  %v436_v28 = vsel %vm403_vm14, %v383_v19, %v420_v24 }
  0xc3   : > { %v363_v29 = vpop.f32.mrf.mxu2  ;;  %v448_v30 = vpack.c.bf16 %v436_v28, %v435_v26  ;;  %v523_v43 = vld [vmem:[%s821_s16 + $0x28] sm:$0xff] (%p756_p5) }
  0xc4   : > { %459 = vst [vmem:[%s821_s16 + $0x30] sm:$0xff] %v451_v25  ;;  %v364_v31 = vadd.f32 %v363_v29, %v292_v27  ;;  %v392_v32 = vpop.f32.mrf.mxu3  ;;  %v517_v40 = vld [vmem:[%s821_s16 + $0x10] sm:$0xff] (%p756_p5) }
  0xc5   : > { %v393_v33 = vadd.f32 %v392_v32, %v292_v27  ;;  %456 = vst [vmem:[%s821_s16 + $0x18] sm:$0xff] %v448_v30 }
  0xc6   : > { %vm410_vm15 = vcmp.gt.f32.partialorder %v364_v31, 0.0  ;;  %v427_v34 = vmul.f32 %v815_v23, %v364_v31  ;;  %518 = vst [vmem:[%s470_s22 + $0x20] sm:$0xff] (%p756_p5), %v517_v40 }
  0xc7   : > { %vm411_vm0 = vcmp.gt.f32.partialorder %v393_v33, 0.0  ;;  %v428_v35 = vmul.f32 %v815_v23, %v393_v33  ;;  %v515_v23 = vld [vmem:[%s821_s16 + $0x8] sm:$0xff] (%p756_p5)  ;;  %524 = vst [vmem:[%s470_s22 + $0x50] sm:$0xff] (%p756_p5), %v523_v43 }
  0xc8   : > { %v443_v36 = vsel %vm410_vm15, %v364_v31, %v427_v34  ;;  %467 = sbr.rel (!%p756_p5) target bundleno = 213 (0xd5), region = 78  ;;  %516 = vst [vmem:[%s470_s22 + $0x10] sm:$0xff] (%p756_p5), %v515_v23 }
  0xc9   : > { %v444_v37 = vsel %vm411_vm0, %v393_v33, %v428_v35 }
  0xca   : > { %v452_v38 = vpack.c.bf16 %v444_v37, %v443_v36 }
  0xcb   : > { %v525_v44 = vld [vmem:[%s821_s16 + $0x30] sm:$0xff] (%p756_p5) }
  0xcc   : > { %460 = vst [vmem:[%s821_s16 + $0x38] sm:$0xff] %v452_v38  ;;  %v519_v41 = vld [vmem:[%s821_s16 + $0x18] sm:$0xff] (%p756_p5) }
  0xcd   : > { %520 = vst [vmem:[%s470_s22 + $0x30] sm:$0xff] %v519_v41 }
  0xce   : > { %526 = vst [vmem:[%s470_s22 + $0x60] sm:$0xff] %v525_v44 }
  0xd3   : > { %v527_v45 = vld [vmem:[%s821_s16 + $0x38] sm:$0xff] }
  0xd4   : > { %528 = vst [vmem:[%s470_s22 + $0x70] sm:$0xff] %v527_v45 }
  0xd5 PF: > { %p12_p10 = scmp.ge.s32.totalorder %s743_s20, 4   ;;  %s876_s17 = smov %s691_s18 }
  0xd6   : > { %s877_s18 = smov %s754_s23  ;;  %s878_s19 = smov %s743_s20 }
  0xd7   :  { %14 = sbr.rel (!%p12_p10) target bundleno = 4 (0x4), region = 147 }

</bundles_post_ra>
